<compile_context>
chip_gen: v5e
topology: v5e:2x2
jax: 0.10.0
libtpu: 0.0.40
codegen_flags: <defaults>
</compile_context>

<pallas_src>
import jax
import jax.numpy as jnp
from jax.experimental import pallas as pl
from jax.experimental.pallas import tpu as pltpu

K_IN = 28 * 28      # 784, PyTorch flatten width
K_PAD = 896         # 784 padded up to a multiple of 128 (explicit, zero-filled)
H = 512             # hidden width
N_OUT = 10          # logits
N_PAD = 128         # lane-dense padded output width
TB = 128            # batch tile: fills MXU rows on v5e, fine on v6e/v7x


def mlp_kernel(x_ref, w1_ref, b1_ref, w2_ref, b2_ref, w3_ref, b3_ref, o_ref):
    # Layer 1: (TB, 896) bf16 @ (896, 512) bf16 -> fp32 acc, bias + ReLU in fp32
    h1 = jnp.dot(x_ref[...], w1_ref[...], preferred_element_type=jnp.float32)
    h1 = jnp.maximum(h1 + b1_ref[...], 0.0)
    # Layer 2: (TB, 512) @ (512, 512)
    h2 = jnp.dot(h1.astype(jnp.bfloat16), w2_ref[...],
                 preferred_element_type=jnp.float32)
    h2 = jnp.maximum(h2 + b2_ref[...], 0.0)
    # Layer 3 (logits, padded to 128 lanes for unmasked vector stores)
    logits = jnp.dot(h2.astype(jnp.bfloat16), w3_ref[...],
                     preferred_element_type=jnp.float32)
    o_ref[...] = (logits + b3_ref[...]).astype(o_ref.dtype)


def neural_network_forward(x_nchw, params, *, batch_tile=TB):
    """x_nchw: (B, 1, 28, 28) float32. Returns (B, 10) float32 logits."""
    B = x_nchw.shape[0]
    x = x_nchw.reshape(B, -1).astype(jnp.float32)        # nn.Flatten -> (B, 784)
    w1, b1, w2, b2, w3, b3 = params

    # Pad batch to a multiple of the batch tile; pad K 784->896 with zeros
    # (zero rows in w1 make this exact). Cast matmul operands to bf16.
    n_tiles = pl.cdiv(B, batch_tile)
    Bp = n_tiles * batch_tile
    xp = jnp.zeros((Bp, K_PAD), jnp.float32).at[:B, :K_IN].set(x)
    xp = xp.astype(jnp.bfloat16)

    w1p = jnp.zeros((K_PAD, H), jnp.float32).at[:K_IN, :].set(w1).astype(jnp.bfloat16)
    w2p = w2.astype(jnp.bfloat16)
    w3p = jnp.zeros((H, N_PAD), jnp.float32).at[:, :N_OUT].set(w3).astype(jnp.bfloat16)
    b3p = jnp.zeros((1, N_PAD), jnp.float32).at[:, :N_OUT].set(b3)

    resident = lambda i: (0, 0)   # weights/biases: same block every grid step

    cost = pl.CostEstimate(
        flops=2 * B * (K_IN * H + H * H + H * N_OUT),
        transcendentals=0,
        bytes_accessed=(xp.size * 2 + w1p.size * 2 + w2p.size * 2 + w3p.size * 2
                        + b1.size * 4 + b2.size * 4 + b3p.size * 4
                        + Bp * N_PAD * 4),
    )

    out = pl.pallas_call(
        mlp_kernel,
        out_shape=jax.ShapeDtypeStruct((Bp, N_PAD), jnp.float32),
        grid=(n_tiles,),
        in_specs=[
            pl.BlockSpec((batch_tile, K_PAD), lambda i: (i, 0)),  # x tile (pipelined)
            pl.BlockSpec((K_PAD, H), resident),                   # W1
            pl.BlockSpec((1, H), resident),                       # b1
            pl.BlockSpec((H, H), resident),                       # W2
            pl.BlockSpec((1, H), resident),                       # b2
            pl.BlockSpec((H, N_PAD), resident),                   # W3 (padded)
            pl.BlockSpec((1, N_PAD), resident),                   # b3 (padded)
        ],
        out_specs=pl.BlockSpec((batch_tile, N_PAD), lambda i: (i, 0)),
        compiler_params=pltpu.CompilerParams(
            dimension_semantics=("parallel",),          # shard batch tiles on v7x 2-TC
            vmem_limit_bytes=32 * 1024 * 1024,          # ~2 MB resident weights + tiles
        ),
        cost_estimate=cost,
    )(xp, w1p, b1, w2p, b2, w3p, b3p)

    return out[:B, :N_OUT]


def init_params(key):
    """Deterministic init matching the nn.Linear shapes, stored as (in, out)."""
    k1, k2, k3, k4, k5, k6 = jax.random.split(key, 6)

    def lin(kw, kb, fan_in, fan_out):
        bound = 1.0 / (fan_in ** 0.5)
        w = jax.random.uniform(kw, (fan_in, fan_out), jnp.float32, -bound, bound)
        b = jax.random.uniform(kb, (1, fan_out), jnp.float32, -bound, bound)
        return w, b

    w1, b1 = lin(k1, k2, K_IN, H)
    w2, b2 = lin(k3, k4, H, H)
    w3, b3 = lin(k5, k6, H, N_OUT)
    return (w1, b1, w2, b2, w3, b3)


def _reference(x_nchw, params):
    # Pure-JAX reference using the same bf16 operand quantization as the kernel
    # (fp32 accumulation), so the check isolates kernel bugs from bf16 rounding.
    w1, b1, w2, b2, w3, b3 = params
    q = lambda a: a.astype(jnp.bfloat16).astype(jnp.float32)
    x = q(x_nchw.reshape(x_nchw.shape[0], -1))
    h1 = jnp.maximum(x @ q(w1) + b1, 0.0)
    h2 = jnp.maximum(q(h1) @ q(w2) + b2, 0.0)
    return q(h2) @ q(w3) + b3


if __name__ == "__main__":
    key = jax.random.PRNGKey(0)
    kx, kp = jax.random.split(key)

    B = 8  # small serving batch; kernel pads to one TB=128 tile
    x = jax.random.normal(kx, (B, 1, 28, 28), jnp.float32)  # NCHW, like MNIST
    params = init_params(kp)

    logits = neural_network_forward(x, params)
    logits = jax.block_until_ready(logits)

    ref = _reference(x, params)
    assert logits.shape == (B, 10)
    assert jnp.allclose(logits, ref, atol=1e-2, rtol=1e-2), float(
        jnp.max(jnp.abs(logits - ref)))

    print("KERNEL_OK")
</pallas_src>

<mosaic_0001>
module attributes {stable_mosaic.version = 11 : i64} {
  func.func @mlp_kernel(%arg0: i32, %arg1: memref<128x896xbf16, #tpu.memory_space<vmem>>, %arg2: memref<896x512xbf16, #tpu.memory_space<vmem>>, %arg3: memref<1x512xf32, #tpu.memory_space<vmem>>, %arg4: memref<512x512xbf16, #tpu.memory_space<vmem>>, %arg5: memref<1x512xf32, #tpu.memory_space<vmem>>, %arg6: memref<512x128xbf16, #tpu.memory_space<vmem>>, %arg7: memref<1x128xf32, #tpu.memory_space<vmem>>, %arg8: memref<128x128xf32, #tpu.memory_space<vmem>>) attributes {dimension_semantics = [#tpu.dimension_semantics<parallel>], iteration_bounds = array<i64: 1>, scalar_prefetch = 0 : i64, scratch_operands = 0 : i64, tpu.core_type = #tpu.core_type<tc>, window_params = [{transform_indices = @transform_0, window_bounds = array<i64: 128, 896>}, {pipeline_mode = #tpu.pipeline_mode<synchronous>, transform_indices = @transform_1, window_bounds = array<i64: 896, 512>}, {pipeline_mode = #tpu.pipeline_mode<synchronous>, transform_indices = @transform_2, window_bounds = array<i64: 1, 512>}, {pipeline_mode = #tpu.pipeline_mode<synchronous>, transform_indices = @transform_3, window_bounds = array<i64: 512, 512>}, {pipeline_mode = #tpu.pipeline_mode<synchronous>, transform_indices = @transform_4, window_bounds = array<i64: 1, 512>}, {pipeline_mode = #tpu.pipeline_mode<synchronous>, transform_indices = @transform_5, window_bounds = array<i64: 512, 128>}, {pipeline_mode = #tpu.pipeline_mode<synchronous>, transform_indices = @transform_6, window_bounds = array<i64: 1, 128>}, {transform_indices = @transform_7, window_bounds = array<i64: 128, 128>}]} {
    %c0 = arith.constant 0 : index
    %c0_0 = arith.constant 0 : index
    %0 = vector.load %arg1[%c0, %c0_0] : memref<128x896xbf16, #tpu.memory_space<vmem>>, vector<128x896xbf16>
    %c0_1 = arith.constant 0 : index
    %c0_2 = arith.constant 0 : index
    %1 = vector.load %arg2[%c0_1, %c0_2] : memref<896x512xbf16, #tpu.memory_space<vmem>>, vector<896x512xbf16>
    %cst = arith.constant dense<0.000000e+00> : vector<128x512xf32>
    %2 = tpu.matmul %0, %1, %cst {dimension_numbers = #tpu.dot_dimension_numbers<[1], [0], [0], [1], [0, 0, 1, 1], [], []>} : vector<128x896xbf16>, vector<896x512xbf16>, vector<128x512xf32> -> vector<128x512xf32>
    %c0_3 = arith.constant 0 : index
    %c0_4 = arith.constant 0 : index
    %3 = vector.load %arg3[%c0_3, %c0_4] : memref<1x512xf32, #tpu.memory_space<vmem>>, vector<1x512xf32>
    %4 = vector.broadcast %3 : vector<1x512xf32> to vector<128x512xf32>
    %5 = arith.addf %2, %4 : vector<128x512xf32>
    %cst_5 = arith.constant 0.000000e+00 : f32
    %6 = vector.broadcast %cst_5 : f32 to vector<128x512xf32>
    %7 = arith.maximumf %5, %6 : vector<128x512xf32>
    %8 = arith.truncf %7 : vector<128x512xf32> to vector<128x512xbf16>
    %c0_6 = arith.constant 0 : index
    %c0_7 = arith.constant 0 : index
    %9 = vector.load %arg4[%c0_6, %c0_7] : memref<512x512xbf16, #tpu.memory_space<vmem>>, vector<512x512xbf16>
    %cst_8 = arith.constant dense<0.000000e+00> : vector<128x512xf32>
    %10 = tpu.matmul %8, %9, %cst_8 {dimension_numbers = #tpu.dot_dimension_numbers<[1], [0], [0], [1], [0, 0, 1, 1], [], []>} : vector<128x512xbf16>, vector<512x512xbf16>, vector<128x512xf32> -> vector<128x512xf32>
    %c0_9 = arith.constant 0 : index
    %c0_10 = arith.constant 0 : index
    %11 = vector.load %arg5[%c0_9, %c0_10] : memref<1x512xf32, #tpu.memory_space<vmem>>, vector<1x512xf32>
    %12 = vector.broadcast %11 : vector<1x512xf32> to vector<128x512xf32>
    %13 = arith.addf %10, %12 : vector<128x512xf32>
    %cst_11 = arith.constant 0.000000e+00 : f32
    %14 = vector.broadcast %cst_11 : f32 to vector<128x512xf32>
    %15 = arith.maximumf %13, %14 : vector<128x512xf32>
    %16 = arith.truncf %15 : vector<128x512xf32> to vector<128x512xbf16>
    %c0_12 = arith.constant 0 : index
    %c0_13 = arith.constant 0 : index
    %17 = vector.load %arg6[%c0_12, %c0_13] : memref<512x128xbf16, #tpu.memory_space<vmem>>, vector<512x128xbf16>
    %cst_14 = arith.constant dense<0.000000e+00> : vector<128x128xf32>
    %18 = tpu.matmul %16, %17, %cst_14 {dimension_numbers = #tpu.dot_dimension_numbers<[1], [0], [0], [1], [0, 0, 1, 1], [], []>} : vector<128x512xbf16>, vector<512x128xbf16>, vector<128x128xf32> -> vector<128x128xf32>
    %c0_15 = arith.constant 0 : index
    %c0_16 = arith.constant 0 : index
    %19 = vector.load %arg7[%c0_15, %c0_16] : memref<1x128xf32, #tpu.memory_space<vmem>>, vector<1x128xf32>
    %20 = vector.broadcast %19 : vector<1x128xf32> to vector<128x128xf32>
    %21 = arith.addf %18, %20 : vector<128x128xf32>
    %c0_17 = arith.constant 0 : index
    %c0_18 = arith.constant 0 : index
    %22 = vector.load %arg8[%c0_17, %c0_18] : memref<128x128xf32, #tpu.memory_space<vmem>>, vector<128x128xf32>
    tpu.vector_store %arg8[%c0_17, %c0_18], %21 {strides = array<i32>} : memref<128x128xf32, #tpu.memory_space<vmem>>, vector<128x128xf32>,
    return
  }
  func.func @transform_0(%arg0: i32) -> (i32, i32) {
    %c0_i32 = arith.constant 0 : i32
    %c0_i32_0 = arith.constant 0 : i32
    return %arg0, %c0_i32 : i32, i32
  }
  func.func @transform_1(%arg0: i32) -> (i32, i32) {
    %c0_i32 = arith.constant 0 : i32
    %c0_i32_0 = arith.constant 0 : i32
    %c0_i32_1 = arith.constant 0 : i32
    return %c0_i32, %c0_i32_0 : i32, i32
  }
  func.func @transform_2(%arg0: i32) -> (i32, i32) {
    %c0_i32 = arith.constant 0 : i32
    %c0_i32_0 = arith.constant 0 : i32
    %c0_i32_1 = arith.constant 0 : i32
    return %c0_i32, %c0_i32_0 : i32, i32
  }
  func.func @transform_3(%arg0: i32) -> (i32, i32) {
    %c0_i32 = arith.constant 0 : i32
    %c0_i32_0 = arith.constant 0 : i32
    %c0_i32_1 = arith.constant 0 : i32
    return %c0_i32, %c0_i32_0 : i32, i32
  }
  func.func @transform_4(%arg0: i32) -> (i32, i32) {
    %c0_i32 = arith.constant 0 : i32
    %c0_i32_0 = arith.constant 0 : i32
    %c0_i32_1 = arith.constant 0 : i32
    return %c0_i32, %c0_i32_0 : i32, i32
  }
  func.func @transform_5(%arg0: i32) -> (i32, i32) {
    %c0_i32 = arith.constant 0 : i32
    %c0_i32_0 = arith.constant 0 : i32
    %c0_i32_1 = arith.constant 0 : i32
    return %c0_i32, %c0_i32_0 : i32, i32
  }
  func.func @transform_6(%arg0: i32) -> (i32, i32) {
    %c0_i32 = arith.constant 0 : i32
    %c0_i32_0 = arith.constant 0 : i32
    %c0_i32_1 = arith.constant 0 : i32
    return %c0_i32, %c0_i32_0 : i32, i32
  }
  func.func @transform_7(%arg0: i32) -> (i32, i32) {
    %c0_i32 = arith.constant 0 : i32
    %c0_i32_0 = arith.constant 0 : i32
    return %arg0, %c0_i32 : i32, i32
  }
}

</mosaic_0001>

<bundles_post_ra>
// kernel: tpu_custom_call.1
= control target key start
LH: loop header
LB: loop body
LE: loop exit
PB: predicated region body
PF: predicated region fallthrough
CT: control target
= control target key end

     0   :  { %12 = vsyncpa [#allocation3], 0  ;;  %s8993_s0 = inlined_call_operand.hbm [shape: bf16[128,896], index: 0, kind: input, shape index: {}]   ;;  %s8994_s1 = inlined_call_operand.hbm [shape: bf16[896,512], index: 1, kind: input, shape index: {}]   ;;  %s8995_s2 = inlined_call_operand.hbm [shape: f32[1,512], index: 2, kind: input, shape index: {}]   ;;  %s8996_s3 = inlined_call_operand.hbm [shape: bf16[512,512], index: 3, kind: input, shape index: {}]   ;;  %s8997_s4 = inlined_call_operand.hbm [shape: f32[1,512], index: 4, kind: input, shape index: {}]   ;;  %s8998_s5 = inlined_call_operand.hbm [shape: bf16[512,128], index: 5, kind: input, shape index: {}]   ;;  %s8999_s6 = inlined_call_operand.vmem [shape: f32[1,128], index: 6, kind: input, shape index: {}]   ;;  %s9000_s7 = inlined_call_operand.hbm [shape: f32[128,128], index: 7, kind: output, shape index: {}]  }
   0x1   :  { %13 = vsyncpa [#allocation6], 0 }
   0x2   :  { %14 = vsyncpa [#allocation9], 0 }
   0x3   :  { %15 = vsyncpa [#allocation12], 0  ;;  %s34_s26 = sshll.u32 %s8994_s1, 4  ;;  %s35_s26 = int_to_ptr.hbm [resolvable:$true] %s34_s26 }
   0x4   :  { %16 = vsyncpa [#allocation4], 0  ;;  %s7840_s27 = smov [#allocation5]   ;;  %s58_s8 = sshll.u32 %s8996_s3, 4  ;;  %s59_s8 = int_to_ptr.hbm [resolvable:$true] %s58_s8 }
   0x5   :  { %s36_s28 = sshll.u32 %s7840_s27, 4  ;;  %s7841_s9 = smov 256   ;;  %s37_s28 = int_to_ptr.vmem [resolvable:$true] %s36_s28 }
   0x6   :  { %s7842_s10 = smov 16   ;;  %s7843_s11 = smov [#allocation8]  }
   0x7   :  { %42 = dma.hbm_to_vmem [thread:$0]  %s35_s26, 28672, %s37_s28, [#allocation6], %s7841_s9, %s7841_s9, %s7842_s10  }
   0x8   :  { %s60_s12 = sshll.u32 %s7843_s11, 4  ;;  %s21_s15 = sshll.u32 %s8993_s0, 4  ;;  %s61_s12 = int_to_ptr.vmem [resolvable:$true] %s60_s12  ;;  %s22_s15 = int_to_ptr.hbm [resolvable:$true] %s21_s15 }
   0x9   :  { %66 = dma.hbm_to_vmem [thread:$0]  %s59_s8, 16384, %s61_s12, [#allocation9], %s7841_s9, %s7841_s9, %s7842_s10  }
   0xa   :  { %s7844_s1 = smov [#allocation2]   ;;  %s48_s3 = sshll.u32 %s8995_s2, 4  ;;  %s49_s3 = int_to_ptr.hbm [resolvable:$true] %s48_s3 }
   0xb   :  { %s23_s16 = sshll.u32 %s7844_s1, 4  ;;  %s7845_s19 = smov 448   ;;  %s24_s16 = int_to_ptr.vmem [resolvable:$true] %s23_s16 }
   0xc   :  { %s7846_s20 = smov 28   ;;  %s7847_s21 = smov [#allocation7]  }
   0xd   :  { %29 = dma.hbm_to_vmem [thread:$0]  %s22_s15, 7168, %s24_s16, [#allocation3], %s7845_s19, %s7845_s19, %s7846_s20  }
   0xe   :  { %s50_s22 = sshll.u32 %s7847_s21, 4  ;;  %s72_s0 = sshll.u32 %s8997_s4, 4  ;;  %s51_s22 = int_to_ptr.vmem [resolvable:$true] %s50_s22  ;;  %s73_s0 = int_to_ptr.hbm [resolvable:$true] %s72_s0 }
   0xf   :  { %53 = dma.hbm_to_vmem [thread:$0]  %s49_s3, 64, %s51_s22, [#allocation6]  }
  0x10   :  { %s82_s27 = sshll.u32 %s8998_s5, 4  ;;  %s7848_s28 = smov [#allocation10]   ;;  %s83_s27 = int_to_ptr.hbm [resolvable:$true] %s82_s27 }
  0x11   :  { %s74_s29 = sshll.u32 %s7848_s28, 4  ;;  %s7849_s2 = smov [#allocation11]   ;;  %s75_s29 = int_to_ptr.vmem [resolvable:$true] %s74_s29 }
  0x12   :  { %77 = dma.hbm_to_vmem [thread:$0]  %s73_s0, 64, %s75_s29, [#allocation9]  }
  0x13   :  { %s84_s30 = sshll.u32 %s7849_s2, 4  ;;  %s7850_s8 = smov 64   ;;  %s85_s30 = int_to_ptr.vmem [resolvable:$true] %s84_s30 }
  0x14   :  { %s7851_s9 = smov 4  }
  0x15   :  { %90 = dma.hbm_to_vmem [thread:$0]  %s83_s27, 4096, %s85_s30, [#allocation12], %s7850_s8, %s7850_s8, %s7851_s9  }
  0x16   :  { %7830 = dma.done.wait [#allocation3], 7168  }
  0x17   :  { %7831 = vsyncadd [#allocation3], 4294960128 }
  0x18   :  { %7832 = dma.done.wait [#allocation6], 28736  }
  0x19   :  { %7833 = vsyncadd [#allocation6], 4294938560 }
  0x1a   :  { %7834 = dma.done.wait [#allocation9], 16448  }
  0x1b   :  { %7835 = vsyncadd [#allocation9], 4294950848 }
  0x1c   :  { %7836 = dma.done.wait [#allocation12], 4096  }
  0x1d   :  { %7837 = vsyncadd [#allocation12], 4294963200  ;;  %v5781_v0 = vld [vmem:[#allocation5 + $0xe0] sm:$0xf]  ;;  %v7289_v1 = vld [vmem:[#allocation5 + $0xec] sm:$0xf0] }
  0x1e   :  { %v5909_v2 = vld [vmem:[#allocation5 + $0x1e0] sm:$0xf]  ;;  %v5782_v3 = vor.u32 %v7289_v1, %v5781_v0  ;;  %v7321_v4 = vld [vmem:[#allocation5 + $0x1ec] sm:$0xf0]  ;;  %s5427_s13 = sshll.u32 %s9000_s7, 4  ;;  %s7853_s14 = smov 128   ;;  %s5428_s13 = int_to_ptr.hbm [resolvable:$true] %s5427_s13 }
  0x1f   :  { %v6037_v5 = vld [vmem:[#allocation5 + $0x2e0] sm:$0xf]  ;;  %v7353_v6 = vld [vmem:[#allocation5 + $0x2ec] sm:$0xf0]  ;;  %v5910_v7 = vor.u32 %v7321_v4, %v5909_v2  ;;  %s7854_s15 = smov 8  }
  0x20   :  { %v6038_v8 = vor.u32 %v7353_v6, %v6037_v5  ;;  %v6165_v9 = vld [vmem:[#allocation5 + $0x3e0] sm:$0xf]  ;;  %v7385_v10 = vld [vmem:[#allocation5 + $0x3ec] sm:$0xf0]  ;;  %1823 = vmatpush.bf16.msra.mxu0 %v5782_v3 }
  0x21   :  { %v5765_v11 = vld [vmem:[#allocation5 + $0xc0] sm:$0xf]  ;;  %v6166_v12 = vor.u32 %v7385_v10, %v6165_v9  ;;  %v7285_v13 = vld [vmem:[#allocation5 + $0xcc] sm:$0xf0]  ;;  %1872 = vmatpush.bf16.msra.mxu1 %v5910_v7 }
  0x22   :  { %v5893_v14 = vld [vmem:[#allocation5 + $0x1c0] sm:$0xf]  ;;  %v7317_v15 = vld [vmem:[#allocation5 + $0x1cc] sm:$0xf0]  ;;  %1921 = vmatpush.bf16.msra.mxu2 %v6038_v8  ;;  %v5766_v16 = vor.u32 %v7285_v13, %v5765_v11 }
  0x23   :  { %v5894_v17 = vor.u32 %v7317_v15, %v5893_v14  ;;  %v6021_v18 = vld [vmem:[#allocation5 + $0x2c0] sm:$0xf]  ;;  %v7349_v19 = vld [vmem:[#allocation5 + $0x2cc] sm:$0xf0]  ;;  %1970 = vmatpush.bf16.msra.mxu3 %v6166_v12 }
  0x24   :  { %v6149_v20 = vld [vmem:[#allocation5 + $0x3c0] sm:$0xf]  ;;  %v6022_v21 = vor.u32 %v7349_v19, %v6021_v18  ;;  %v7381_v22 = vld [vmem:[#allocation5 + $0x3cc] sm:$0xf0]  ;;  %1824 = vmatpush.bf16.msra.mxu0 %v5766_v16 }
  0x25   :  { %v5749_v23 = vld [vmem:[#allocation5 + $0xa0] sm:$0xf]  ;;  %v7281_v24 = vld [vmem:[#allocation5 + $0xac] sm:$0xf0]  ;;  %v6150_v25 = vor.u32 %v7381_v22, %v6149_v20  ;;  %1873 = vmatpush.bf16.msra.mxu1 %v5894_v17 }
  0x26   :  { %v5877_v26 = vld [vmem:[#allocation5 + $0x1a0] sm:$0xf]  ;;  %v7313_v27 = vld [vmem:[#allocation5 + $0x1ac] sm:$0xf0]  ;;  %v5750_v29 = vor.u32 %v7281_v24, %v5749_v23  ;;  %1922 = vmatpush.bf16.msra.mxu2 %v6022_v21 }
  0x27   :  { %v6005_v28 = vld [vmem:[#allocation5 + $0x2a0] sm:$0xf]  ;;  %v7345_v30 = vld [vmem:[#allocation5 + $0x2ac] sm:$0xf0]  ;;  %v5878_v33 = vor.u32 %v7313_v27, %v5877_v26  ;;  %1971 = vmatpush.bf16.msra.mxu3 %v6150_v25 }
  0x28   :  { %v6133_v31 = vld [vmem:[#allocation5 + $0x3a0] sm:$0xf]  ;;  %v7377_v32 = vld [vmem:[#allocation5 + $0x3ac] sm:$0xf0]  ;;  %v6006_v34 = vor.u32 %v7345_v30, %v6005_v28  ;;  %1825 = vmatpush.bf16.msra.mxu0 %v5750_v29  ;;  %v7206_v29 = vld [vmem:[#allocation2 + $0x18] sm:$0xf0] }
  0x29   :  { %v5733_v35 = vld [vmem:[#allocation5 + $0x80] sm:$0xf]  ;;  %v7277_v36 = vld [vmem:[#allocation5 + $0x8c] sm:$0xf0]  ;;  %v6134_v38 = vor.u32 %v7377_v32, %v6133_v31  ;;  %1874 = vmatpush.bf16.msra.mxu1 %v5878_v33  ;;  %v7203_v30 = vld [vmem:[#allocation2 + $0x4] sm:$0xf] }
  0x2a   :  { %v5861_v37 = vld [vmem:[#allocation5 + $0x180] sm:$0xf]  ;;  %v7309_v39 = vld [vmem:[#allocation5 + $0x18c] sm:$0xf0]  ;;  %v5734_v44 = vor.u32 %v7277_v36, %v5733_v35  ;;  %1923 = vmatpush.bf16.msra.mxu2 %v6006_v34  ;;  %v5453_v35 = vld [vmem:[#allocation2 + $0x8] sm:$0xf] }
  0x2b   :  { %v5989_v40 = vld [vmem:[#allocation5 + $0x280] sm:$0xf]  ;;  %v7341_v41 = vld [vmem:[#allocation5 + $0x28c] sm:$0xf0]  ;;  %v5862_v45 = vor.u32 %v7309_v39, %v5861_v37  ;;  %1972 = vmatpush.bf16.msra.mxu3 %v6134_v38  ;;  %v7287_v36 = vld [vmem:[#allocation5 + $0xe4] sm:$0xf] }
  0x2c   :  { %v6117_v42 = vld [vmem:[#allocation5 + $0x380] sm:$0xf]  ;;  %v7373_v43 = vld [vmem:[#allocation5 + $0x38c] sm:$0xf0]  ;;  %v5990_v46 = vor.u32 %v7341_v41, %v5989_v40  ;;  %1826 = vmatpush.bf16.msra.mxu0 %v5734_v44  ;;  %v5783_v37 = vld [vmem:[#allocation5 + $0xf0] sm:$0xf0] }
  0x2d   :  { %v5717_v47 = vld [vmem:[#allocation5 + $0x60] sm:$0xf]  ;;  %v7273_v48 = vld [vmem:[#allocation5 + $0x6c] sm:$0xf0]  ;;  %v6118_v50 = vor.u32 %v7373_v43, %v6117_v42  ;;  %1875 = vmatpush.bf16.msra.mxu1 %v5862_v45  ;;  %v7207_v40 = vld [vmem:[#allocation2 + $0x20] sm:$0xf0] }
  0x2e   :  { %v5845_v49 = vld [vmem:[#allocation5 + $0x160] sm:$0xf]  ;;  %v7305_v51 = vld [vmem:[#allocation5 + $0x16c] sm:$0xf0]  ;;  %v5718_v56 = vor.u32 %v7273_v48, %v5717_v47  ;;  %1924 = vmatpush.bf16.msra.mxu2 %v5990_v46  ;;  %v7204_v41 = vld [vmem:[#allocation2 + $0xc] sm:$0xf] }
  0x2f   :  { %v5973_v52 = vld [vmem:[#allocation5 + $0x260] sm:$0xf]  ;;  %v7337_v53 = vld [vmem:[#allocation5 + $0x26c] sm:$0xf0]  ;;  %v5846_v57 = vor.u32 %v7305_v51, %v5845_v49  ;;  %1973 = vmatpush.bf16.msra.mxu3 %v6118_v50  ;;  %v5455_v42 = vld [vmem:[#allocation2 + $0x24] sm:$0xf0]  ;;  %v5786_v49 = vor.u32 %v7287_v36, %v5783_v37 }
  0x30   :  { %v6101_v54 = vld [vmem:[#allocation5 + $0x360] sm:$0xf]  ;;  %v7369_v55 = vld [vmem:[#allocation5 + $0x36c] sm:$0xf0]  ;;  %v5974_v58 = vor.u32 %v7337_v53, %v5973_v52  ;;  %1827 = vmatpush.bf16.msra.mxu0 %v5718_v56  ;;  %v5767_v56 = vld [vmem:[#allocation5 + $0xd0] sm:$0xf0] }
  0x31   :  { %v5701_v59 = vld [vmem:[#allocation5 + $0x40] sm:$0xf]  ;;  %v7269_v60 = vld [vmem:[#allocation5 + $0x4c] sm:$0xf0]  ;;  %v6102_v62 = vor.u32 %v7369_v55, %v6101_v54  ;;  %1876 = vmatpush.bf16.msra.mxu1 %v5846_v57  ;;  %v7917_v54 = vor.u32 %v7207_v40, %v5453_v35  ;;  %v7283_v55 = vld [vmem:[#allocation5 + $0xc4] sm:$0xf]  ;;  %v7919_v57 = vor.u32 %v7204_v41, %v5455_v42 }
  0x32   :  { %v5829_v61 = vld [vmem:[#allocation5 + $0x140] sm:$0xf]  ;;  %v7301_v63 = vld [vmem:[#allocation5 + $0x14c] sm:$0xf0]  ;;  %v5702_v4 = vor.u32 %v7269_v60, %v5701_v59  ;;  %1925 = vmatpush.bf16.msra.mxu2 %v5974_v58  ;;  %v7220_v41 = vld [vmem:[#allocation2 + $0x88] sm:$0xf0] }
  0x33   :  { %v5957_v0 = vld [vmem:[#allocation5 + $0x240] sm:$0xf]  ;;  %v7333_v1 = vld [vmem:[#allocation5 + $0x24c] sm:$0xf0]  ;;  %v5830_v5 = vor.u32 %v7301_v63, %v5829_v61  ;;  %1974 = vmatpush.bf16.msra.mxu3 %v6102_v62  ;;  %v5770_v63 = vor.u32 %v7283_v55, %v5767_v56  ;;  %v7217_v42 = vld [vmem:[#allocation2 + $0x74] sm:$0xf] }
  0x34   :  { %v6085_v2 = vld [vmem:[#allocation5 + $0x340] sm:$0xf]  ;;  %v7365_v3 = vld [vmem:[#allocation5 + $0x34c] sm:$0xf0]  ;;  %v5958_v6 = vor.u32 %v7333_v1, %v5957_v0  ;;  %1828 = vmatpush.bf16.msra.mxu0 %v5702_v4 }
  0x35   :  { %v5685_v7 = vld [vmem:[#allocation5 + $0x20] sm:$0xf]  ;;  %v7265_v8 = vld [vmem:[#allocation5 + $0x2c] sm:$0xf0]  ;;  %v6086_v10 = vor.u32 %v7365_v3, %v6085_v2  ;;  %1877 = vmatpush.bf16.msra.mxu1 %v5830_v5 }
  0x36   :  { %v5813_v9 = vld [vmem:[#allocation5 + $0x120] sm:$0xf]  ;;  %v7297_v11 = vld [vmem:[#allocation5 + $0x12c] sm:$0xf0]  ;;  %v5686_v17 = vor.u32 %v7265_v8, %v5685_v7  ;;  %1926 = vmatpush.bf16.msra.mxu2 %v5958_v6 }
  0x37   :  { %v5941_v12 = vld [vmem:[#allocation5 + $0x220] sm:$0xf]  ;;  %v7329_v13 = vld [vmem:[#allocation5 + $0x22c] sm:$0xf0]  ;;  %v5814_v21 = vor.u32 %v7297_v11, %v5813_v9  ;;  %1975 = vmatpush.bf16.msra.mxu3 %v6086_v10  ;;  %v7279_v9 = vld [vmem:[#allocation5 + $0xa4] sm:$0xf] }
  0x38   :  { %v6069_v14 = vld [vmem:[#allocation5 + $0x320] sm:$0xf]  ;;  %v7361_v15 = vld [vmem:[#allocation5 + $0x32c] sm:$0xf0]  ;;  %v5942_v22 = vor.u32 %v7329_v13, %v5941_v12  ;;  %1829 = vmatpush.bf16.msra.mxu0 %v5686_v17  ;;  %v5751_v10 = vld [vmem:[#allocation5 + $0xb0] sm:$0xf0] }
  0x39   :  { %v5669_v16 = vld [vmem:[#allocation5] sm:$0xf]  ;;  %v7261_v18 = vld [vmem:[#allocation5 + $0xc] sm:$0xf0]  ;;  %v6070_v26 = vor.u32 %v7361_v15, %v6069_v14  ;;  %1878 = vmatpush.bf16.msra.mxu1 %v5814_v21  ;;  %v5754_v11 = vor.u32 %v7279_v9, %v5751_v10  ;;  %v7213_v17 = vld [vmem:[#allocation2 + $0x50] sm:$0xf0] }
  0x3a   :  { %v5797_v19 = vld [vmem:[#allocation5 + $0x100] sm:$0xf]  ;;  %v7293_v20 = vld [vmem:[#allocation5 + $0x10c] sm:$0xf0]  ;;  %v5670_v34 = vor.u32 %v7261_v18, %v5669_v16  ;;  %1927 = vmatpush.bf16.msra.mxu2 %v5942_v22  ;;  %v5473_v16 = vld [vmem:[#allocation2 + $0x38] sm:$0xf] }
  0x3b   :  { %v5925_v23 = vld [vmem:[#allocation5 + $0x200] sm:$0xf]  ;;  %v7325_v24 = vld [vmem:[#allocation5 + $0x20c] sm:$0xf0]  ;;  %v5798_v38 = vor.u32 %v7293_v20, %v5797_v19  ;;  %1976 = vmatpush.bf16.msra.mxu3 %v6070_v26  ;;  %v7210_v18 = vld [vmem:[#allocation2 + $0x3c] sm:$0xf] }
  0x3c   :  { %v6053_v25 = vld [vmem:[#allocation5 + $0x300] sm:$0xf]  ;;  %v7357_v27 = vld [vmem:[#allocation5 + $0x30c] sm:$0xf0]  ;;  %v5926_v39 = vor.u32 %v7325_v24, %v5925_v23  ;;  %1830 = vmatpush.bf16.msra.mxu0 %v5670_v34  ;;  %v5475_v19 = vld [vmem:[#allocation2 + $0x54] sm:$0xf0]  ;;  %v7925_v24 = vor.u32 %v7213_v17, %v5473_v16 }
  0x3d   :  { %v5445_v28 = vld [vmem:[#allocation2] sm:$0xf]  ;;  %v7481_v33 = vld [vmem:[#allocation5 + $0x6ec] sm:$0xf0]  ;;  %v6054_v43 = vor.u32 %v7357_v27, %v6053_v25  ;;  %1879 = vmatpush.bf16.msra.mxu1 %v5798_v38  ;;  %v7214_v21 = vld [vmem:[#allocation2 + $0x58] sm:$0xf0]  ;;  %v7927_v25 = vor.u32 %v7210_v18, %v5475_v19 }
  0x3e   :  { %v5447_v31 = vld [vmem:[#allocation2 + $0x1c] sm:$0xf0]  ;;  %v7417_v46 = vld [vmem:[#allocation5 + $0x4ec] sm:$0xf0]  ;;  %v7913_v48 = vor.u32 %v7206_v29, %v5445_v28  ;;  %1928 = vmatpush.bf16.msra.mxu2 %v5926_v39  ;;  %v7211_v22 = vld [vmem:[#allocation2 + $0x44] sm:$0xf] }
  0x3f   :  { %v6549_v32 = vld [vmem:[#allocation5 + $0x6e0] sm:$0xf]  ;;  %v7449_v50 = vld [vmem:[#allocation5 + $0x5ec] sm:$0xf0]  ;;  %v7915_v53 = vor.u32 %v7203_v30, %v5447_v31  ;;  %1977 = vmatpush.bf16.msra.mxu3 %v6054_v43  ;;  %9088 = vst [vmem:[#allocation21_spill] sm:$0xff] %v7925_v24 }
  0x40   :  { %v6550_v44 = vor.u32 %v7481_v33, %v6549_v32  ;;  %v6293_v45 = vld [vmem:[#allocation5 + $0x4e0] sm:$0xf]  ;;  %9086 = vst [vmem:[#allocation19_spill] sm:$0xff] %v7913_v48  ;;  %v7477_v52 = vld [vmem:[#allocation5 + $0x6cc] sm:$0xf0]  ;;  %1831 = vmatmul.bf16.vlgmr.msra.gmra.mxu0 %v7913_v48 }
  0x41   :  { %v6421_v47 = vld [vmem:[#allocation5 + $0x5e0] sm:$0xf]  ;;  %9087 = vst [vmem:[#allocation20_spill] sm:$0xff] %v7915_v53  ;;  %v6294_v58 = vor.u32 %v7417_v46, %v6293_v45  ;;  %v7413_v62 = vld [vmem:[#allocation5 + $0x4cc] sm:$0xf0]  ;;  %1880 = vmatmul.bf16.vlgmr.msra.gmra.mxu1 %v7915_v53  ;;  %1929 = vmatmul.bf16.vlgmr.msra.gmra.mxu2 %v7917_v54 }
  0x42   :  { %v6533_v51 = vld [vmem:[#allocation5 + $0x6c0] sm:$0xf]  ;;  %2117 = vmatpush.bf16.msrb.mxu2 %v6550_v44  ;;  %v6422_v59 = vor.u32 %v7449_v50, %v6421_v47  ;;  %v7445_v1 = vld [vmem:[#allocation5 + $0x5cc] sm:$0xf0]  ;;  %1978 = vmatmul.bf16.vlgmr.msra.gmra.mxu3 %v7919_v57  ;;  %9089 = vst [vmem:[#allocation22_spill] sm:$0xff] %v7927_v25 }
  0x43   :  { %v6534_v60 = vor.u32 %v7477_v52, %v6533_v51  ;;  %v6277_v61 = vld [vmem:[#allocation5 + $0x4c0] sm:$0xf]  ;;  %2166 = vmatpush.bf16.msrb.mxu3 %v5786_v49  ;;  %2019 = vmatpush.bf16.msrb.mxu0 %v6294_v58  ;;  %v7473_v4 = vld [vmem:[#allocation5 + $0x6ac] sm:$0xf0]  ;;  %v7275_v33 = vld [vmem:[#allocation5 + $0x84] sm:$0xf] }
  0x44   :  { %v6405_v0 = vld [vmem:[#allocation5 + $0x5c0] sm:$0xf]  ;;  %v6278_v2 = vor.u32 %v7413_v62, %v6277_v61  ;;  %2068 = vmatpush.bf16.msrb.mxu1 %v6422_v59  ;;  %v7409_v8 = vld [vmem:[#allocation5 + $0x4ac] sm:$0xf0]  ;;  %v5735_v34 = vld [vmem:[#allocation5 + $0x90] sm:$0xf0] }
  0x45   :  { %v6517_v3 = vld [vmem:[#allocation5 + $0x6a0] sm:$0xf]  ;;  %v6406_v6 = vor.u32 %v7445_v1, %v6405_v0  ;;  %v7441_v13 = vld [vmem:[#allocation5 + $0x5ac] sm:$0xf0]  ;;  %v5738_v36 = vor.u32 %v7275_v33, %v5735_v34  ;;  %v5509_v44 = vld [vmem:[#allocation2 + $0x78] sm:$0xf] }
  0x46   :  { %v6261_v5 = vld [vmem:[#allocation5 + $0x4a0] sm:$0xf]  ;;  %2118 = vmatpush.bf16.msrb.mxu2 %v6534_v60  ;;  %v6518_v7 = vor.u32 %v7473_v4, %v6517_v3  ;;  %v7469_v29 = vld [vmem:[#allocation5 + $0x68c] sm:$0xf0]  ;;  %v7221_v45 = vld [vmem:[#allocation2 + $0x90] sm:$0xf0] }
  0x47   :  { %2167 = vmatpush.bf16.msrb.mxu3 %v5770_v63  ;;  %v6389_v12 = vld [vmem:[#allocation5 + $0x5a0] sm:$0xf]  ;;  %2020 = vmatpush.bf16.msrb.mxu0 %v6278_v2  ;;  %v6262_v14 = vor.u32 %v7409_v8, %v6261_v5  ;;  %v7405_v32 = vld [vmem:[#allocation5 + $0x48c] sm:$0xf0]  ;;  %v7218_v46 = vld [vmem:[#allocation2 + $0x7c] sm:$0xf]  ;;  %v7941_v51 = vor.u32 %v7221_v45, %v5509_v44 }
  0x48   :  { %2069 = vmatpush.bf16.msrb.mxu1 %v6406_v6  ;;  %v6390_v15 = vor.u32 %v7441_v13, %v6389_v12  ;;  %v5481_v20 = vld [vmem:[#allocation2 + $0x40] sm:$0xf]  ;;  %v7437_v38 = vld [vmem:[#allocation5 + $0x58c] sm:$0xf0]  ;;  %v5511_v47 = vld [vmem:[#allocation2 + $0x94] sm:$0xf0] }
  0x49   :  { %v5483_v23 = vld [vmem:[#allocation2 + $0x5c] sm:$0xf0]  ;;  %v7929_v26 = vor.u32 %v7214_v21, %v5481_v20  ;;  %v5501_v40 = vld [vmem:[#allocation2 + $0x70] sm:$0xf]  ;;  %v7943_v52 = vor.u32 %v7218_v46, %v5511_v47  ;;  %v7271_v61 = vld [vmem:[#allocation5 + $0x64] sm:$0xf] }
  0x4a   :  { %2119 = vmatpush.bf16.msrb.mxu2 %v6518_v7  ;;  %v7931_v27 = vor.u32 %v7211_v22, %v5483_v23  ;;  %v6501_v28 = vld [vmem:[#allocation5 + $0x680] sm:$0xf]  ;;  %v5503_v43 = vld [vmem:[#allocation2 + $0x8c] sm:$0xf0]  ;;  %v7937_v49 = vor.u32 %v7220_v41, %v5501_v40  ;;  %v5719_v62 = vld [vmem:[#allocation5 + $0x70] sm:$0xf0] }
  0x4b   :  { %2168 = vmatpush.bf16.msrb.mxu3 %v5754_v11  ;;  %2021 = vmatpush.bf16.msrb.mxu0 %v6262_v14  ;;  %v6245_v30 = vld [vmem:[#allocation5 + $0x480] sm:$0xf]  ;;  %v6502_v31 = vor.u32 %v7469_v29, %v6501_v28  ;;  %v7939_v50 = vor.u32 %v7217_v42, %v5503_v43  ;;  %v7465_v56 = vld [vmem:[#allocation5 + $0x66c] sm:$0xf0]  ;;  %v5722_v0 = vor.u32 %v7271_v61, %v5719_v62  ;;  %v5529_v4 = vld [vmem:[#allocation2 + $0xa8] sm:$0xf] }
  0x4c   :  { %2070 = vmatpush.bf16.msrb.mxu1 %v6390_v15  ;;  %v6246_v35 = vor.u32 %v7405_v32, %v6245_v30  ;;  %v6373_v37 = vld [vmem:[#allocation5 + $0x580] sm:$0xf]  ;;  %9090 = vst [vmem:[#allocation23_spill] sm:$0xff] %v7937_v49  ;;  %v7401_v60 = vld [vmem:[#allocation5 + $0x46c] sm:$0xf0] }
  0x4d   :  { %v6374_v39 = vor.u32 %v7437_v38, %v6373_v37  ;;  %9091 = vst [vmem:[#allocation24_spill] sm:$0xff] %v7939_v50  ;;  %v6485_v55 = vld [vmem:[#allocation5 + $0x660] sm:$0xf]  ;;  %v7433_v2 = vld [vmem:[#allocation5 + $0x56c] sm:$0xf0] }
  0x4e   :  { %2120 = vmatpush.bf16.msrb.mxu2 %v6502_v31  ;;  %v6229_v58 = vld [vmem:[#allocation5 + $0x460] sm:$0xf]  ;;  %v6486_v59 = vor.u32 %v7465_v56, %v6485_v55  ;;  %v7227_v5 = vld [vmem:[#allocation2 + $0xc0] sm:$0xf0]  ;;  %v7224_v6 = vld [vmem:[#allocation2 + $0xac] sm:$0xf] }
  0x4f   :  { %2022 = vmatpush.bf16.msrb.mxu0 %v6246_v35  ;;  %2169 = vmatpush.bf16.msrb.mxu3 %v5738_v36  ;;  %v6230_v63 = vor.u32 %v7401_v60, %v6229_v58  ;;  %v6357_v1 = vld [vmem:[#allocation5 + $0x560] sm:$0xf]  ;;  %v5531_v7 = vld [vmem:[#allocation2 + $0xc4] sm:$0xf0]  ;;  %v5537_v8 = vld [vmem:[#allocation2 + $0xb0] sm:$0xf]  ;;  %v7949_v12 = vor.u32 %v7227_v5, %v5529_v4 }
  0x50   :  { %1836 = vmatmul.bf16.gmra.mxu0 %v7925_v24  ;;  %2071 = vmatpush.bf16.msrb.mxu1 %v6374_v39  ;;  %v6358_v3 = vor.u32 %v7433_v2, %v6357_v1  ;;  %v7228_v9 = vld [vmem:[#allocation2 + $0xc8] sm:$0xf0]  ;;  %v7225_v10 = vld [vmem:[#allocation2 + $0xb4] sm:$0xf]  ;;  %v5539_v11 = vld [vmem:[#allocation2 + $0xcc] sm:$0xf0]  ;;  %v7951_v13 = vor.u32 %v7224_v6, %v5531_v7 }
  0x51   :  { %1885 = vmatmul.bf16.gmra.mxu1 %v7927_v25  ;;  %1934 = vmatmul.bf16.gmra.mxu2 %v7929_v26  ;;  %9092 = vst [vmem:[#allocation25_spill] sm:$0xff] %v7949_v12  ;;  %v7953_v14 = vor.u32 %v7228_v9, %v5537_v8  ;;  %v7955_v15 = vor.u32 %v7225_v10, %v5539_v11  ;;  %v6469_v16 = vld [vmem:[#allocation5 + $0x640] sm:$0xf]  ;;  %v7461_v17 = vld [vmem:[#allocation5 + $0x64c] sm:$0xf0] }
  0x52   :  { %1983 = vmatmul.bf16.gmra.mxu3 %v7931_v27  ;;  %2121 = vmatpush.bf16.msrb.mxu2 %v6486_v59  ;;  %9093 = vst [vmem:[#allocation26_spill] sm:$0xff] %v7951_v13  ;;  %v6213_v18 = vld [vmem:[#allocation5 + $0x440] sm:$0xf]  ;;  %v6470_v19 = vor.u32 %v7461_v17, %v6469_v16  ;;  %v7397_v20 = vld [vmem:[#allocation5 + $0x44c] sm:$0xf0] }
  0x53   :  { %2023 = vmatpush.bf16.msrb.mxu0 %v6230_v63  ;;  %2170 = vmatpush.bf16.msrb.mxu3 %v5722_v0  ;;  %v7267_v21 = vld [vmem:[#allocation5 + $0x44] sm:$0xf]  ;;  %v5703_v22 = vld [vmem:[#allocation5 + $0x50] sm:$0xf0]  ;;  %v6214_v23 = vor.u32 %v7397_v20, %v6213_v18  ;;  %v6341_v29 = vld [vmem:[#allocation5 + $0x540] sm:$0xf] }
  0x54   :  { %2072 = vmatpush.bf16.msrb.mxu1 %v6358_v3  ;;  %v5706_v28 = vor.u32 %v7267_v21, %v5703_v22  ;;  %v7429_v30 = vld [vmem:[#allocation5 + $0x54c] sm:$0xf0]  ;;  %v5557_v32 = vld [vmem:[#allocation2 + $0xe0] sm:$0xf]  ;;  %v7234_v33 = vld [vmem:[#allocation2 + $0xf8] sm:$0xf0] }
  0x55   :  { %v6342_v31 = vor.u32 %v7429_v30, %v6341_v29  ;;  %v7231_v34 = vld [vmem:[#allocation2 + $0xe4] sm:$0xf]  ;;  %v5559_v35 = vld [vmem:[#allocation2 + $0xfc] sm:$0xf0]  ;;  %v5565_v36 = vld [vmem:[#allocation2 + $0xe8] sm:$0xf]  ;;  %v7961_v40 = vor.u32 %v7234_v33, %v5557_v32 }
  0x56   :  { %2122 = vmatpush.bf16.msrb.mxu2 %v6470_v19  ;;  %v7235_v37 = vld [vmem:[#allocation2 + $0x100] sm:$0xf0]  ;;  %v7232_v38 = vld [vmem:[#allocation2 + $0xec] sm:$0xf]  ;;  %v5567_v39 = vld [vmem:[#allocation2 + $0x104] sm:$0xf0]  ;;  %v7963_v41 = vor.u32 %v7231_v34, %v5559_v35 }
  0x57   :  { %2024 = vmatpush.bf16.msrb.mxu0 %v6214_v23  ;;  %2171 = vmatpush.bf16.msrb.mxu3 %v5706_v28  ;;  %9094 = vst [vmem:[#allocation27_spill] sm:$0xff] %v7961_v40  ;;  %v7965_v42 = vor.u32 %v7235_v37, %v5565_v36  ;;  %v7967_v43 = vor.u32 %v7232_v38, %v5567_v39  ;;  %v6453_v44 = vld [vmem:[#allocation5 + $0x620] sm:$0xf]  ;;  %v7457_v45 = vld [vmem:[#allocation5 + $0x62c] sm:$0xf0] }
  0x58   :  { %2073 = vmatpush.bf16.msrb.mxu1 %v6342_v31  ;;  %9095 = vst [vmem:[#allocation28_spill] sm:$0xff] %v7963_v41  ;;  %v6197_v46 = vld [vmem:[#allocation5 + $0x420] sm:$0xf]  ;;  %v6454_v47 = vor.u32 %v7457_v45, %v6453_v44  ;;  %v7393_v55 = vld [vmem:[#allocation5 + $0x42c] sm:$0xf0] }
  0x59   :  { %v7263_v56 = vld [vmem:[#allocation5 + $0x24] sm:$0xf]  ;;  %v5687_v58 = vld [vmem:[#allocation5 + $0x30] sm:$0xf0]  ;;  %v6198_v59 = vor.u32 %v7393_v55, %v6197_v46  ;;  %v6325_v61 = vld [vmem:[#allocation5 + $0x520] sm:$0xf] }
  0x5a   :  { %v5690_v60 = vor.u32 %v7263_v56, %v5687_v58  ;;  %v7425_v62 = vld [vmem:[#allocation5 + $0x52c] sm:$0xf0]  ;;  %2123 = vmatpush.bf16.msrb.mxu2 %v6454_v47  ;;  %v5585_v0 = vld [vmem:[#allocation2 + $0x118] sm:$0xf]  ;;  %v7241_v1 = vld [vmem:[#allocation2 + $0x130] sm:$0xf0] }
  0x5b   :  { %v6326_v63 = vor.u32 %v7425_v62, %v6325_v61  ;;  %2025 = vmatpush.bf16.msrb.mxu0 %v6198_v59  ;;  %v7238_v2 = vld [vmem:[#allocation2 + $0x11c] sm:$0xf]  ;;  %v5587_v3 = vld [vmem:[#allocation2 + $0x134] sm:$0xf0]  ;;  %v5593_v4 = vld [vmem:[#allocation2 + $0x120] sm:$0xf]  ;;  %v7973_v8 = vor.u32 %v7241_v1, %v5585_v0 }
  0x5c   :  { %2172 = vmatpush.bf16.msrb.mxu3 %v5690_v60  ;;  %v7242_v5 = vld [vmem:[#allocation2 + $0x138] sm:$0xf0]  ;;  %v7239_v6 = vld [vmem:[#allocation2 + $0x124] sm:$0xf]  ;;  %v5595_v7 = vld [vmem:[#allocation2 + $0x13c] sm:$0xf0]  ;;  %v7975_v9 = vor.u32 %v7238_v2, %v5587_v3 }
  0x5d   :  { %2074 = vmatpush.bf16.msrb.mxu1 %v6326_v63  ;;  %9096 = vst [vmem:[#allocation29_spill] sm:$0xff] %v7973_v8  ;;  %v7977_v10 = vor.u32 %v7242_v5, %v5593_v4  ;;  %v7979_v11 = vor.u32 %v7239_v6, %v5595_v7  ;;  %v6437_v16 = vld [vmem:[#allocation5 + $0x600] sm:$0xf]  ;;  %v7453_v17 = vld [vmem:[#allocation5 + $0x60c] sm:$0xf0] }
  0x5e   :  { %9097 = vst [vmem:[#allocation30_spill] sm:$0xff] %v7975_v9  ;;  %v6181_v18 = vld [vmem:[#allocation5 + $0x400] sm:$0xf]  ;;  %v6438_v19 = vor.u32 %v7453_v17, %v6437_v16  ;;  %v7389_v20 = vld [vmem:[#allocation5 + $0x40c] sm:$0xf0] }
  0x5f   :  { %v7259_v21 = vld [vmem:[#allocation5 + $0x4] sm:$0xf]  ;;  %v5671_v22 = vld [vmem:[#allocation5 + $0x10] sm:$0xf0]  ;;  %v6182_v23 = vor.u32 %v7389_v20, %v6181_v18  ;;  %v6309_v29 = vld [vmem:[#allocation5 + $0x500] sm:$0xf] }
  0x60   :  { %1841 = vmatmul.bf16.gmra.mxu0 %v7937_v49  ;;  %v5674_v28 = vor.u32 %v7259_v21, %v5671_v22  ;;  %v7421_v30 = vld [vmem:[#allocation5 + $0x50c] sm:$0xf0]  ;;  %2124 = vmatpush.bf16.msrb.mxu2 %v6438_v19  ;;  %v7248_v33 = vld [vmem:[#allocation2 + $0x168] sm:$0xf0]  ;;  %v7245_v34 = vld [vmem:[#allocation2 + $0x154] sm:$0xf] }
  0x61   :  { %1890 = vmatmul.bf16.gmra.mxu1 %v7939_v50  ;;  %1939 = vmatmul.bf16.gmra.mxu2 %v7941_v51  ;;  %v6310_v31 = vor.u32 %v7421_v30, %v6309_v29  ;;  %v5613_v32 = vld [vmem:[#allocation2 + $0x150] sm:$0xf]  ;;  %v5621_v36 = vld [vmem:[#allocation2 + $0x158] sm:$0xf]  ;;  %v7249_v37 = vld [vmem:[#allocation2 + $0x170] sm:$0xf0] }
  0x62   :  { %1988 = vmatmul.bf16.gmra.mxu3 %v7943_v52  ;;  %2026 = vmatpush.bf16.msrb.mxu0 %v6182_v23  ;;  %v5615_v35 = vld [vmem:[#allocation2 + $0x16c] sm:$0xf0]  ;;  %v7246_v38 = vld [vmem:[#allocation2 + $0x15c] sm:$0xf]  ;;  %v5623_v39 = vld [vmem:[#allocation2 + $0x174] sm:$0xf0]  ;;  %v7985_v44 = vor.u32 %v7248_v33, %v5613_v32  ;;  %v7989_v46 = vor.u32 %v7249_v37, %v5621_v36 }
  0x63   :  { %2173 = vmatpush.bf16.msrb.mxu3 %v5674_v28  ;;  %2075 = vmatpush.bf16.msrb.mxu1 %v6310_v31  ;;  %v7987_v45 = vor.u32 %v7245_v34, %v5615_v35  ;;  %v7991_v47 = vor.u32 %v7246_v38, %v5623_v39  ;;  %v7383_v55 = vld [vmem:[#allocation5 + $0x3e4] sm:$0xf]  ;;  %v6167_v56 = vld [vmem:[#allocation5 + $0x3f0] sm:$0xf0]  ;;  %v5641_v4 = vld [vmem:[#allocation2 + $0x188] sm:$0xf] }
  0x64   :  { %9098 = vst [vmem:[#allocation31_spill] sm:$0xff] %v7985_v44  ;;  %v7319_v58 = vld [vmem:[#allocation5 + $0x1e4] sm:$0xf]  ;;  %v6170_v59 = vor.u32 %v7383_v55, %v6167_v56  ;;  %v5911_v60 = vld [vmem:[#allocation5 + $0x1f0] sm:$0xf0] }
  0x65   :  { %9099 = vst [vmem:[#allocation32_spill] sm:$0xff] %v7987_v45  ;;  %v7415_v61 = vld [vmem:[#allocation5 + $0x4e4] sm:$0xf]  ;;  %v6295_v62 = vld [vmem:[#allocation5 + $0x4f0] sm:$0xf0]  ;;  %v5914_v63 = vor.u32 %v7319_v58, %v5911_v60 }
  0x66   :  { %9100 = vst [vmem:[#allocation33_spill] sm:$0xff] %v7991_v47  ;;  %v6298_v0 = vor.u32 %v7415_v61, %v6295_v62  ;;  %2313 = vmatpush.bf16.msra.mxu2 %v6170_v59  ;;  %v7351_v1 = vld [vmem:[#allocation5 + $0x2e4] sm:$0xf]  ;;  %v6039_v2 = vld [vmem:[#allocation5 + $0x2f0] sm:$0xf0] }
  0x67   :  { %2215 = vmatpush.bf16.msra.mxu0 %v5914_v63  ;;  %v6042_v3 = vor.u32 %v7351_v1, %v6039_v2  ;;  %v7255_v5 = vld [vmem:[#allocation2 + $0x1a0] sm:$0xf0]  ;;  %v7252_v6 = vld [vmem:[#allocation2 + $0x18c] sm:$0xf]  ;;  %v5643_v7 = vld [vmem:[#allocation2 + $0x1a4] sm:$0xf0] }
  0x68   :  { %2362 = vmatpush.bf16.msra.mxu3 %v6298_v0  ;;  %v5649_v16 = vld [vmem:[#allocation2 + $0x190] sm:$0xf]  ;;  %v7256_v17 = vld [vmem:[#allocation2 + $0x1a8] sm:$0xf0]  ;;  %v7253_v18 = vld [vmem:[#allocation2 + $0x194] sm:$0xf]  ;;  %v7997_v20 = vor.u32 %v7255_v5, %v5641_v4  ;;  %v7999_v21 = vor.u32 %v7252_v6, %v5643_v7 }
  0x69   :  { %2264 = vmatpush.bf16.msra.mxu1 %v6042_v3  ;;  %v5651_v19 = vld [vmem:[#allocation2 + $0x1ac] sm:$0xf0]  ;;  %v8001_v22 = vor.u32 %v7256_v17, %v5649_v16  ;;  %v7379_v28 = vld [vmem:[#allocation5 + $0x3c4] sm:$0xf]  ;;  %v6151_v29 = vld [vmem:[#allocation5 + $0x3d0] sm:$0xf0] }
  0x6a   :  { %9101 = vst [vmem:[#allocation34_spill] sm:$0xff] %v7997_v20  ;;  %v8003_v23 = vor.u32 %v7253_v18, %v5651_v19  ;;  %v7315_v30 = vld [vmem:[#allocation5 + $0x1c4] sm:$0xf]  ;;  %v6154_v31 = vor.u32 %v7379_v28, %v6151_v29  ;;  %v5895_v32 = vld [vmem:[#allocation5 + $0x1d0] sm:$0xf0] }
  0x6b   :  { %9102 = vst [vmem:[#allocation35_spill] sm:$0xff] %v7999_v21  ;;  %v7411_v33 = vld [vmem:[#allocation5 + $0x4c4] sm:$0xf]  ;;  %v6279_v34 = vld [vmem:[#allocation5 + $0x4d0] sm:$0xf0]  ;;  %v5898_v35 = vor.u32 %v7315_v30, %v5895_v32 }
  0x6c   :  { %9103 = vst [vmem:[#allocation36_spill] sm:$0xff] %v8001_v22  ;;  %v6282_v36 = vor.u32 %v7411_v33, %v6279_v34  ;;  %v405_v37 = vld [vmem:[#allocation7] sm:$0xf]  ;;  %2314 = vmatpush.bf16.msra.mxu2 %v6154_v31  ;;  %v7347_v38 = vld [vmem:[#allocation5 + $0x2c4] sm:$0xf] }
  0x6d   :  { %9104 = vst [vmem:[#allocation37_spill] sm:$0xff] %v8003_v23  ;;  %2216 = vmatpush.bf16.msra.mxu0 %v5898_v35  ;;  %v6023_v39 = vld [vmem:[#allocation5 + $0x2d0] sm:$0xf0]  ;;  %v8009_v55 = vperm.slane %v405_v37, 0  ;;  %v5461_v58 = vld [vmem:[#allocation2 + $0x10] sm:$0xf] }
  0x6e   :  { %2363 = vmatpush.bf16.msra.mxu3 %v6282_v36  ;;  %v6026_v56 = vor.u32 %v7347_v38, %v6023_v39  ;;  %v7208_v59 = vld [vmem:[#allocation2 + $0x28] sm:$0xf0]  ;;  %v7205_v60 = vld [vmem:[#allocation2 + $0x14] sm:$0xf]  ;;  %v5463_v61 = vld [vmem:[#allocation2 + $0x2c] sm:$0xf0] }
  0x6f   :  { %v5469_v62 = vld [vmem:[#allocation2 + $0x18] sm:$0xf]  ;;  %v7209_v63 = vld [vmem:[#allocation2 + $0x30] sm:$0xf0]  ;;  %v8011_v0 = vor.u32 %v7208_v59, %v5461_v58  ;;  %v8013_v2 = vor.u32 %v7205_v60, %v5463_v61  ;;  %v7375_v7 = vld [vmem:[#allocation5 + $0x3a4] sm:$0xf] }
  0x70   :  { %1846 = vmatmul.bf16.gmra.mxu0 %v7949_v12  ;;  %2265 = vmatpush.bf16.msra.mxu1 %v6026_v56  ;;  %v8015_v3 = vor.u32 %v7209_v63, %v5469_v62  ;;  %v6135_v16 = vld [vmem:[#allocation5 + $0x3b0] sm:$0xf0]  ;;  %v7311_v17 = vld [vmem:[#allocation5 + $0x1a4] sm:$0xf]  ;;  %v5489_v60 = vld [vmem:[#allocation2 + $0x48] sm:$0xf] }
  0x71   :  { %1895 = vmatmul.bf16.gmra.mxu1 %v7951_v13  ;;  %1944 = vmatmul.bf16.gmra.mxu2 %v7953_v14  ;;  %9105 = vst [vmem:[#allocation38_spill] sm:$0xff] %v8013_v2  ;;  %v6138_v18 = vor.u32 %v7375_v7, %v6135_v16  ;;  %v5879_v19 = vld [vmem:[#allocation5 + $0x1b0] sm:$0xf0]  ;;  %v7407_v28 = vld [vmem:[#allocation5 + $0x4a4] sm:$0xf] }
  0x72   :  { %1993 = vmatmul.bf16.gmra.mxu3 %v7955_v15  ;;  %9106 = vst [vmem:[#allocation39_spill] sm:$0xff] %v8015_v3  ;;  %v6263_v29 = vld [vmem:[#allocation5 + $0x4b0] sm:$0xf0]  ;;  %v5882_v31 = vor.u32 %v7311_v17, %v5879_v19  ;;  %v7343_v39 = vld [vmem:[#allocation5 + $0x2a4] sm:$0xf] }
  0x73   :  { %v6266_v32 = vor.u32 %v7407_v28, %v6263_v29  ;;  %2315 = vmatpush.bf16.msra.mxu2 %v6138_v18  ;;  %v6007_v56 = vld [vmem:[#allocation5 + $0x2b0] sm:$0xf0]  ;;  %v7215_v61 = vld [vmem:[#allocation2 + $0x60] sm:$0xf0]  ;;  %v7212_v62 = vld [vmem:[#allocation2 + $0x4c] sm:$0xf] }
  0x74   :  { %2217 = vmatpush.bf16.msra.mxu0 %v5882_v31  ;;  %v6010_v59 = vor.u32 %v7343_v39, %v6007_v56  ;;  %v5491_v63 = vld [vmem:[#allocation2 + $0x64] sm:$0xf0]  ;;  %v6247_v39 = vld [vmem:[#allocation5 + $0x490] sm:$0xf0] }
  0x75   :  { %2364 = vmatpush.bf16.msra.mxu3 %v6266_v32  ;;  %v8027_v18 = vor.u32 %v7212_v62, %v5491_v63  ;;  %v7371_v32 = vld [vmem:[#allocation5 + $0x384] sm:$0xf] }
  0x76   :  { %2266 = vmatpush.bf16.msra.mxu1 %v6010_v59 }
  0x77   :  { %9107 = vst [vmem:[#allocation40_spill] sm:$0xff] %v8027_v18 }
  0x80   :  { %1851 = vmatmul.bf16.gmra.mxu0 %v7961_v40 }
  0x81   :  { %1900 = vmatmul.bf16.gmra.mxu1 %v7963_v41  ;;  %1949 = vmatmul.bf16.gmra.mxu2 %v7965_v42 }
  0x82   :  { %1998 = vmatmul.bf16.gmra.mxu3 %v7967_v43 }
  0x90   :  { %1856 = vmatmul.bf16.gmra.mxu0 %v7973_v8 }
  0x91   :  { %1905 = vmatmul.bf16.gmra.mxu1 %v7975_v9  ;;  %1954 = vmatmul.bf16.gmra.mxu2 %v7977_v10 }
  0x92   :  { %2003 = vmatmul.bf16.gmra.mxu3 %v7979_v11 }
  0xa0   :  { %1861 = vmatmul.bf16.gmra.mxu0 %v7985_v44 }
  0xa1   :  { %1910 = vmatmul.bf16.gmra.mxu1 %v7987_v45  ;;  %1959 = vmatmul.bf16.gmra.mxu2 %v7989_v46 }
  0xa2   :  { %2008 = vmatmul.bf16.gmra.mxu3 %v7991_v47 }
  0xb0   :  { %1866 = vmatmul.bf16.gmra.mxu0 %v7997_v20 }
  0xb1   :  { %1915 = vmatmul.bf16.gmra.mxu1 %v7999_v21  ;;  %1964 = vmatmul.bf16.gmra.mxu2 %v8001_v22  ;;  %v7257_v22 = vld [vmem:[#allocation2 + $0x1b0] sm:$0xf0]  ;;  %v7254_v21 = vld [vmem:[#allocation2 + $0x19c] sm:$0xf] }
  0xb2   :  { %2013 = vmatmul.bf16.gmra.mxu3 %v8003_v23  ;;  %v7247_v23 = vld [vmem:[#allocation2 + $0x164] sm:$0xf] }
  0xbd   :  { %v1832_v1 = vpop.f32.mrf.mxu0 }
  0xbe   :  { %v1833_v4 = vadd.f32 %v1832_v1, %v8009_v55  ;;  %v1881_v5 = vpop.f32.mrf.mxu1  ;;  %v5497_v1 = vld [vmem:[#allocation2 + $0x50] sm:$0xf] }
  0xc0   :  { %v1882_v6 = vadd.f32 %v1881_v5, %v1833_v4  ;;  %2027 = vmatmul.bf16.vlgmr.msrb.gmra.mxu0 %v8011_v0  ;;  %v7216_v4 = vld [vmem:[#allocation2 + $0x68] sm:$0xf0] }
  0xc1   :  { %2076 = vmatmul.bf16.vlgmr.msrb.gmra.mxu1 %v8013_v2  ;;  %2125 = vmatmul.bf16.vlgmr.msrb.gmra.mxu2 %v8015_v3  ;;  %v8029_v19 = vor.u32 %v7216_v4, %v5497_v1  ;;  %v7240_v3 = vld [vmem:[#allocation2 + $0x12c] sm:$0xf]  ;;  %v7250_v2 = vld [vmem:[#allocation2 + $0x178] sm:$0xf0] }
  0xc2   :  { %2174 = vmatmul.bf16.vlgmr.msrb.gmra.mxu3 %v7913_v48  ;;  %v7243_v48 = vld [vmem:[#allocation2 + $0x140] sm:$0xf0] }
  0xc3   :  { %9108 = vst [vmem:[#allocation41_spill] sm:$0xff] %v8029_v19 }
  0xc4   :  { %v1930_v30 = vpop.f32.mrf.mxu2 }
  0xc5   :  { %v1931_v33 = vadd.f32 %v1930_v30, %v1882_v6  ;;  %v1979_v34 = vpop.f32.mrf.mxu3  ;;  %v1834_v35 = vpop.f32.mrf.mxu0  ;;  %v8025_v6 = vor.u32 %v7215_v61, %v5489_v60 }
  0xc6   :  { %v1835_v36 = vadd.f32 %v1834_v35, %v8009_v55  ;;  %v1883_v37 = vpop.f32.mrf.mxu1 }
  0xc7   :  { %v8023_v38 = vadd.f32 %v1979_v34, %v1931_v33  ;;  %v6119_v33 = vld [vmem:[#allocation5 + $0x390] sm:$0xf0]  ;;  %v7307_v34 = vld [vmem:[#allocation5 + $0x184] sm:$0xf] }
  0xc8   :  { %v1884_v58 = vadd.f32 %v1883_v37, %v1835_v36  ;;  %v6122_v35 = vor.u32 %v7371_v32, %v6119_v33  ;;  %v5863_v36 = vld [vmem:[#allocation5 + $0x190] sm:$0xf0]  ;;  %v7403_v37 = vld [vmem:[#allocation5 + $0x484] sm:$0xf]  ;;  %v5519_v33 = vld [vmem:[#allocation2 + $0x9c] sm:$0xf0] }
  0xc9   :  { %v6250_v59 = vor.u32 %v7403_v37, %v6247_v39  ;;  %v7219_v32 = vld [vmem:[#allocation2 + $0x84] sm:$0xf] }
  0xca   :  { %2316 = vmatpush.bf16.msra.mxu2 %v6122_v35 }
  0xcb   :  { %2365 = vmatpush.bf16.msra.mxu3 %v6250_v59 }
  0xcc   :  { %v1932_v5 = vpop.f32.mrf.mxu2 }
  0xcd   :  { %v1933_v7 = vadd.f32 %v1932_v5, %v1884_v58  ;;  %v1981_v16 = vpop.f32.mrf.mxu3  ;;  %v1837_v17 = vpop.f32.mrf.mxu0  ;;  %v5866_v58 = vor.u32 %v7307_v34, %v5863_v36  ;;  %v7339_v5 = vld [vmem:[#allocation5 + $0x284] sm:$0xf]  ;;  %v5525_v34 = vld [vmem:[#allocation2 + $0x88] sm:$0xf] }
  0xce   :  { %v1838_v28 = vadd.f32 %v1837_v17, %v8009_v55  ;;  %v1886_v29 = vpop.f32.mrf.mxu1 }
  0xcf   :  { %v8032_v30 = vadd.f32 %v1981_v16, %v1933_v7  ;;  %2218 = vmatpush.bf16.msra.mxu0 %v5866_v58  ;;  %v5991_v7 = vld [vmem:[#allocation5 + $0x290] sm:$0xf0]  ;;  %v8043_v58 = vor.u32 %v7219_v32, %v5519_v33 }
  0xd0   :  { %v1887_v31 = vadd.f32 %v1886_v29, %v1838_v28  ;;  %2032 = vmatmul.bf16.gmra.mxu0 %v8025_v6  ;;  %v5994_v17 = vor.u32 %v7339_v5, %v5991_v7  ;;  %v5517_v28 = vld [vmem:[#allocation2 + $0x80] sm:$0xf]  ;;  %v7222_v29 = vld [vmem:[#allocation2 + $0x98] sm:$0xf0]  ;;  %v6103_v5 = vld [vmem:[#allocation5 + $0x370] sm:$0xf0] }
  0xd1   :  { %2081 = vmatmul.bf16.gmra.mxu1 %v8027_v18  ;;  %2130 = vmatmul.bf16.gmra.mxu2 %v8029_v19  ;;  %v8041_v35 = vor.u32 %v7222_v29, %v5517_v28  ;;  %9109 = vst [vmem:[#allocation42_spill] sm:$0xff] %v8043_v58  ;;  %v7303_v7 = vld [vmem:[#allocation5 + $0x164] sm:$0xf]  ;;  %v6231_v29 = vld [vmem:[#allocation5 + $0x470] sm:$0xf0] }
  0xd2   :  { %2179 = vmatmul.bf16.gmra.mxu3 %v7925_v24  ;;  %2267 = vmatpush.bf16.msra.mxu1 %v5994_v17  ;;  %v5847_v17 = vld [vmem:[#allocation5 + $0x170] sm:$0xf0]  ;;  %v7399_v28 = vld [vmem:[#allocation5 + $0x464] sm:$0xf]  ;;  %v7226_v24 = vld [vmem:[#allocation2 + $0xbc] sm:$0xf] }
  0xd3   :  { %v5850_v33 = vor.u32 %v7303_v7, %v5847_v17  ;;  %v5547_v7 = vld [vmem:[#allocation2 + $0xd4] sm:$0xf0]  ;;  %v5553_v17 = vld [vmem:[#allocation2 + $0xc0] sm:$0xf]  ;;  %v7236_v19 = vld [vmem:[#allocation2 + $0x108] sm:$0xf0] }
  0xd4   :  { %v1935_v56 = vpop.f32.mrf.mxu2  ;;  %v7233_v18 = vld [vmem:[#allocation2 + $0xf4] sm:$0xf] }
  0xd5   :  { %v1936_v60 = vadd.f32 %v1935_v56, %v1887_v31  ;;  %v1984_v61 = vpop.f32.mrf.mxu3  ;;  %v1839_v62 = vpop.f32.mrf.mxu0  ;;  %v7223_v31 = vld [vmem:[#allocation2 + $0xa0] sm:$0xf0]  ;;  %2219 = vmatpush.bf16.msra.mxu0 %v5850_v33 }
  0xd6   :  { %v1840_v63 = vadd.f32 %v1839_v62, %v8009_v55  ;;  %v1888_v1 = vpop.f32.mrf.mxu1  ;;  %v8045_v59 = vor.u32 %v7223_v31, %v5525_v34  ;;  %v6234_v34 = vor.u32 %v7399_v28, %v6231_v29 }
  0xd7   :  { %v8039_v4 = vadd.f32 %v1984_v61, %v1936_v60 }
  0xd8   :  { %v1889_v16 = vadd.f32 %v1888_v1, %v1840_v63  ;;  %9110 = vst [vmem:[#allocation43_spill] sm:$0xff] %v8045_v59  ;;  %v7367_v1 = vld [vmem:[#allocation5 + $0x364] sm:$0xf]  ;;  %2366 = vmatpush.bf16.msra.mxu3 %v6234_v34  ;;  %v8059_v34 = vor.u32 %v7226_v24, %v5547_v7 }
  0xd9   :  { %v7299_v24 = vld [vmem:[#allocation5 + $0x144] sm:$0xf] }
  0xda   :  { %9111 = vst [vmem:[#allocation44_spill] sm:$0xff] %v8059_v34 }
  0xdc   :  { %v1937_v36 = vpop.f32.mrf.mxu2 }
  0xdd   :  { %v1938_v37 = vadd.f32 %v1937_v36, %v1889_v16  ;;  %v1986_v39 = vpop.f32.mrf.mxu3  ;;  %v1842_v56 = vpop.f32.mrf.mxu0  ;;  %v6106_v16 = vor.u32 %v7367_v1, %v6103_v5 }
  0xde   :  { %v1843_v60 = vadd.f32 %v1842_v56, %v8009_v55  ;;  %v1891_v61 = vpop.f32.mrf.mxu1 }
  0xdf   :  { %v8048_v62 = vadd.f32 %v1986_v39, %v1938_v37  ;;  %2317 = vmatpush.bf16.msra.mxu2 %v6106_v16 }
  0xe0   :  { %v1892_v63 = vadd.f32 %v1891_v61, %v1843_v60  ;;  %2037 = vmatmul.bf16.gmra.mxu0 %v8041_v35  ;;  %v7335_v61 = vld [vmem:[#allocation5 + $0x264] sm:$0xf] }
  0xe1   :  { %2086 = vmatmul.bf16.gmra.mxu1 %v8043_v58  ;;  %2135 = vmatmul.bf16.gmra.mxu2 %v8045_v59  ;;  %v5545_v59 = vld [vmem:[#allocation2 + $0xb8] sm:$0xf]  ;;  %v7229_v58 = vld [vmem:[#allocation2 + $0xd0] sm:$0xf0] }
  0xe2   :  { %2184 = vmatmul.bf16.gmra.mxu3 %v7937_v49  ;;  %v5975_v49 = vld [vmem:[#allocation5 + $0x270] sm:$0xf0]  ;;  %v8057_v16 = vor.u32 %v7229_v58, %v5545_v59  ;;  %v7363_v58 = vld [vmem:[#allocation5 + $0x344] sm:$0xf] }
  0xe3   :  { %v5978_v5 = vor.u32 %v7335_v61, %v5975_v49  ;;  %v6087_v59 = vld [vmem:[#allocation5 + $0x350] sm:$0xf0] }
  0xe4   :  { %v1940_v32 = vpop.f32.mrf.mxu2  ;;  %v5831_v61 = vld [vmem:[#allocation5 + $0x150] sm:$0xf0] }
  0xe5   :  { %v1941_v31 = vadd.f32 %v1940_v32, %v1892_v63  ;;  %v1989_v36 = vpop.f32.mrf.mxu3  ;;  %v1844_v37 = vpop.f32.mrf.mxu0  ;;  %v7230_v63 = vld [vmem:[#allocation2 + $0xd8] sm:$0xf0]  ;;  %2268 = vmatpush.bf16.msra.mxu1 %v5978_v5  ;;  %v6215_v5 = vld [vmem:[#allocation5 + $0x450] sm:$0xf0] }
  0xe6   :  { %v1845_v39 = vadd.f32 %v1844_v37, %v8009_v55  ;;  %v1893_v56 = vpop.f32.mrf.mxu1 }
  0xe7   :  { %v8055_v60 = vadd.f32 %v1989_v36, %v1941_v31  ;;  %v8061_v31 = vor.u32 %v7230_v63, %v5553_v17  ;;  %v5834_v17 = vor.u32 %v7299_v24, %v5831_v61  ;;  %v5575_v24 = vld [vmem:[#allocation2 + $0x10c] sm:$0xf0]  ;;  %v5581_v61 = vld [vmem:[#allocation2 + $0xf8] sm:$0xf] }
  0xe8   :  { %v1894_v1 = vadd.f32 %v1893_v56, %v1845_v39  ;;  %v6090_v56 = vor.u32 %v7363_v58, %v6087_v59 }
  0xe9   :  { %9112 = vst [vmem:[#allocation45_spill] sm:$0xff] %v8061_v31  ;;  %2220 = vmatpush.bf16.msra.mxu0 %v5834_v17 }
  0xea   :  { %2318 = vmatpush.bf16.msra.mxu2 %v6090_v56 }
  0xec   :  { %v1942_v28 = vpop.f32.mrf.mxu2 }
  0xed   :  { %v1943_v29 = vadd.f32 %v1942_v28, %v1894_v1  ;;  %v1991_v32 = vpop.f32.mrf.mxu3  ;;  %v1847_v33 = vpop.f32.mrf.mxu0  ;;  %v7395_v1 = vld [vmem:[#allocation5 + $0x444] sm:$0xf] }
  0xee   :  { %v1848_v36 = vadd.f32 %v1847_v33, %v8009_v55  ;;  %v1896_v49 = vpop.f32.mrf.mxu1  ;;  %v6218_v63 = vor.u32 %v7395_v1, %v6215_v5 }
  0xef   :  { %v8064_v37 = vadd.f32 %v1991_v32, %v1943_v29 }
  0xf0   :  { %v1897_v39 = vadd.f32 %v1896_v49, %v1848_v36  ;;  %2042 = vmatmul.bf16.gmra.mxu0 %v8057_v16  ;;  %2367 = vmatpush.bf16.msra.mxu3 %v6218_v63  ;;  %v8075_v63 = vor.u32 %v7233_v18, %v5575_v24  ;;  %v7295_v18 = vld [vmem:[#allocation5 + $0x124] sm:$0xf] }
  0xf1   :  { %2091 = vmatmul.bf16.gmra.mxu1 %v8059_v34  ;;  %2140 = vmatmul.bf16.gmra.mxu2 %v8061_v31  ;;  %v5959_v31 = vld [vmem:[#allocation5 + $0x250] sm:$0xf0]  ;;  %v5573_v34 = vld [vmem:[#allocation2 + $0xf0] sm:$0xf] }
  0xf2   :  { %2189 = vmatmul.bf16.gmra.mxu3 %v7949_v12  ;;  %v7331_v12 = vld [vmem:[#allocation5 + $0x244] sm:$0xf]  ;;  %v8073_v56 = vor.u32 %v7236_v19, %v5573_v34  ;;  %9113 = vst [vmem:[#allocation46_spill] sm:$0xff] %v8075_v63  ;;  %v6071_v34 = vld [vmem:[#allocation5 + $0x330] sm:$0xf0] }
  0xf3   :  { %v5962_v59 = vor.u32 %v7331_v12, %v5959_v31  ;;  %v7359_v19 = vld [vmem:[#allocation5 + $0x324] sm:$0xf] }
  0xf4   :  { %v1945_v7 = vpop.f32.mrf.mxu2 }
  0xf5   :  { %v1946_v28 = vadd.f32 %v1945_v7, %v1897_v39  ;;  %v1994_v29 = vpop.f32.mrf.mxu3  ;;  %v1849_v32 = vpop.f32.mrf.mxu0  ;;  %v7237_v39 = vld [vmem:[#allocation2 + $0x110] sm:$0xf0]  ;;  %2269 = vmatpush.bf16.msra.mxu1 %v5962_v59 }
  0xf6   :  { %v1850_v33 = vadd.f32 %v1849_v32, %v8009_v55  ;;  %v1898_v36 = vpop.f32.mrf.mxu1  ;;  %v6199_v59 = vld [vmem:[#allocation5 + $0x430] sm:$0xf0] }
  0xf7   :  { %v8071_v49 = vadd.f32 %v1994_v29, %v1946_v28  ;;  %v8077_v28 = vor.u32 %v7237_v39, %v5581_v61 }
  0xf8   :  { %v1899_v58 = vadd.f32 %v1898_v36, %v1850_v33  ;;  %v6074_v33 = vor.u32 %v7359_v19, %v6071_v34  ;;  %v5815_v36 = vld [vmem:[#allocation5 + $0x130] sm:$0xf0] }
  0xf9   :  { %9114 = vst [vmem:[#allocation47_spill] sm:$0xff] %v8077_v28  ;;  %v5818_v61 = vor.u32 %v7295_v18, %v5815_v36  ;;  %v5603_v18 = vld [vmem:[#allocation2 + $0x144] sm:$0xf0]  ;;  %v5609_v36 = vld [vmem:[#allocation2 + $0x130] sm:$0xf] }
  0xfa   :  { %2319 = vmatpush.bf16.msra.mxu2 %v6074_v33 }
  0xfb   :  { %2221 = vmatpush.bf16.msra.mxu0 %v5818_v61 }
  0xfc   :  { %v1947_v1 = vpop.f32.mrf.mxu2 }
  0xfd   :  { %v1948_v5 = vadd.f32 %v1947_v1, %v1899_v58  ;;  %v1996_v7 = vpop.f32.mrf.mxu3  ;;  %v1852_v17 = vpop.f32.mrf.mxu0  ;;  %v7391_v58 = vld [vmem:[#allocation5 + $0x424] sm:$0xf] }
  0xfe   :  { %v1853_v29 = vadd.f32 %v1852_v17, %v8009_v55  ;;  %v1901_v12 = vpop.f32.mrf.mxu1  ;;  %v6202_v39 = vor.u32 %v7391_v58, %v6199_v59 }
  0xff   :  { %v8080_v31 = vadd.f32 %v1996_v7, %v1948_v5 }
 0x100   :  { %v1902_v32 = vadd.f32 %v1901_v12, %v1853_v29  ;;  %2047 = vmatmul.bf16.gmra.mxu0 %v8073_v56  ;;  %2368 = vmatpush.bf16.msra.mxu3 %v6202_v39  ;;  %v8091_v39 = vor.u32 %v7240_v3, %v5603_v18  ;;  %v7291_v3 = vld [vmem:[#allocation5 + $0x104] sm:$0xf] }
 0x101   :  { %2096 = vmatmul.bf16.gmra.mxu1 %v8075_v63  ;;  %2145 = vmatmul.bf16.gmra.mxu2 %v8077_v28  ;;  %v5943_v28 = vld [vmem:[#allocation5 + $0x230] sm:$0xf0]  ;;  %v5601_v63 = vld [vmem:[#allocation2 + $0x128] sm:$0xf] }
 0x102   :  { %2194 = vmatmul.bf16.gmra.mxu3 %v7961_v40  ;;  %v7327_v40 = vld [vmem:[#allocation5 + $0x224] sm:$0xf]  ;;  %v8089_v33 = vor.u32 %v7243_v48, %v5601_v63  ;;  %9115 = vst [vmem:[#allocation48_spill] sm:$0xff] %v8091_v39  ;;  %v6055_v63 = vld [vmem:[#allocation5 + $0x310] sm:$0xf0] }
 0x103   :  { %v5946_v34 = vor.u32 %v7327_v40, %v5943_v28  ;;  %v7355_v48 = vld [vmem:[#allocation5 + $0x304] sm:$0xf] }
 0x104   :  { %v1950_v24 = vpop.f32.mrf.mxu2 }
 0x105   :  { %v1951_v1 = vadd.f32 %v1950_v24, %v1902_v32  ;;  %v1999_v5 = vpop.f32.mrf.mxu3  ;;  %v1854_v7 = vpop.f32.mrf.mxu0  ;;  %v7244_v32 = vld [vmem:[#allocation2 + $0x148] sm:$0xf0]  ;;  %2270 = vmatpush.bf16.msra.mxu1 %v5946_v34  ;;  %v6183_v34 = vld [vmem:[#allocation5 + $0x410] sm:$0xf0] }
 0x106   :  { %v1855_v17 = vadd.f32 %v1854_v7, %v8009_v55  ;;  %v1903_v29 = vpop.f32.mrf.mxu1 }
 0x107   :  { %v8087_v12 = vadd.f32 %v1999_v5, %v1951_v1  ;;  %v8093_v1 = vor.u32 %v7244_v32, %v5609_v36 }
 0x108   :  { %v1904_v19 = vadd.f32 %v1903_v29, %v1855_v17  ;;  %v6058_v17 = vor.u32 %v7355_v48, %v6055_v63  ;;  %v5799_v29 = vld [vmem:[#allocation5 + $0x110] sm:$0xf0] }
 0x109   :  { %9116 = vst [vmem:[#allocation49_spill] sm:$0xff] %v8093_v1  ;;  %v5802_v36 = vor.u32 %v7291_v3, %v5799_v29  ;;  %v5631_v3 = vld [vmem:[#allocation2 + $0x17c] sm:$0xf0]  ;;  %v5637_v29 = vld [vmem:[#allocation2 + $0x168] sm:$0xf] }
 0x10a   :  { %2320 = vmatpush.bf16.msra.mxu2 %v6058_v17 }
 0x10b   :  { %2222 = vmatpush.bf16.msra.mxu0 %v5802_v36 }
 0x10c   :  { %v1952_v58 = vpop.f32.mrf.mxu2 }
 0x10d   :  { %v1953_v59 = vadd.f32 %v1952_v58, %v1904_v19  ;;  %v2001_v24 = vpop.f32.mrf.mxu3  ;;  %v1857_v61 = vpop.f32.mrf.mxu0  ;;  %v7387_v19 = vld [vmem:[#allocation5 + $0x404] sm:$0xf] }
 0x10e   :  { %v1858_v5 = vadd.f32 %v1857_v61, %v8009_v55  ;;  %v1906_v40 = vpop.f32.mrf.mxu1  ;;  %v6186_v32 = vor.u32 %v7387_v19, %v6183_v34 }
 0x10f   :  { %v8096_v28 = vadd.f32 %v2001_v24, %v1953_v59 }
 0x110   :  { %v1907_v7 = vadd.f32 %v1906_v40, %v1858_v5  ;;  %2052 = vmatmul.bf16.gmra.mxu0 %v8089_v33  ;;  %2369 = vmatpush.bf16.msra.mxu3 %v6186_v32  ;;  %v8107_v32 = vor.u32 %v7247_v23, %v5631_v3  ;;  %v7447_v23 = vld [vmem:[#allocation5 + $0x5e4] sm:$0xf] }
 0x111   :  { %2101 = vmatmul.bf16.gmra.mxu1 %v8091_v39  ;;  %2150 = vmatmul.bf16.gmra.mxu2 %v8093_v1  ;;  %v5927_v1 = vld [vmem:[#allocation5 + $0x210] sm:$0xf0]  ;;  %v5629_v39 = vld [vmem:[#allocation2 + $0x160] sm:$0xf] }
 0x112   :  { %2199 = vmatmul.bf16.gmra.mxu3 %v7973_v8  ;;  %v7323_v8 = vld [vmem:[#allocation5 + $0x204] sm:$0xf]  ;;  %v8105_v17 = vor.u32 %v7250_v2, %v5629_v39  ;;  %9118 = vst [vmem:[#allocation51_spill] sm:$0xff] %v8107_v32  ;;  %v5789_v2 = vld [vmem:[#allocation5 + $0xe8] sm:$0xf] }
 0x113   :  { %v5930_v63 = vor.u32 %v7323_v8, %v5927_v1  ;;  %v7290_v39 = vld [vmem:[#allocation5 + $0xf4] sm:$0xf0] }
 0x114   :  { %v1955_v18 = vpop.f32.mrf.mxu2  ;;  %9117 = vst [vmem:[#allocation50_spill] sm:$0xff] %v8105_v17 }
 0x115   :  { %v1956_v58 = vadd.f32 %v1955_v18, %v1907_v7  ;;  %v2004_v59 = vpop.f32.mrf.mxu3  ;;  %v1859_v24 = vpop.f32.mrf.mxu0  ;;  %v7251_v7 = vld [vmem:[#allocation2 + $0x180] sm:$0xf0]  ;;  %2271 = vmatpush.bf16.msra.mxu1 %v5930_v63  ;;  %v7322_v63 = vld [vmem:[#allocation5 + $0x1f4] sm:$0xf0] }
 0x116   :  { %v1860_v61 = vadd.f32 %v1859_v24, %v8009_v55  ;;  %v1908_v5 = vpop.f32.mrf.mxu1 }
 0x117   :  { %v8103_v40 = vadd.f32 %v2004_v59, %v1956_v58  ;;  %v8109_v58 = vor.u32 %v7251_v7, %v5637_v29 }
 0x118   :  { %v1909_v48 = vadd.f32 %v1908_v5, %v1860_v61  ;;  %v5790_v61 = vor.u32 %v7290_v39, %v5789_v2  ;;  %v6423_v5 = vld [vmem:[#allocation5 + $0x5f0] sm:$0xf0] }
 0x119   :  { %9119 = vst [vmem:[#allocation52_spill] sm:$0xff] %v8109_v58  ;;  %v6426_v29 = vor.u32 %v7447_v23, %v6423_v5  ;;  %v5659_v23 = vld [vmem:[#allocation2 + $0x1b4] sm:$0xf0]  ;;  %v5665_v5 = vld [vmem:[#allocation2 + $0x1a0] sm:$0xf] }
 0x11a   :  { %2509 = vmatpush.bf16.msrb.mxu2 %v5790_v61 }
 0x11b   :  { %2411 = vmatpush.bf16.msrb.mxu0 %v6426_v29 }
 0x11c   :  { %v1957_v19 = vpop.f32.mrf.mxu2 }
 0x11d   :  { %v1958_v34 = vadd.f32 %v1957_v19, %v1909_v48  ;;  %v2006_v18 = vpop.f32.mrf.mxu3  ;;  %v1862_v36 = vpop.f32.mrf.mxu0  ;;  %v5917_v48 = vld [vmem:[#allocation5 + $0x1e8] sm:$0xf] }
 0x11e   :  { %v1863_v59 = vadd.f32 %v1862_v36, %v8009_v55  ;;  %v1911_v8 = vpop.f32.mrf.mxu1  ;;  %v5918_v7 = vor.u32 %v7322_v63, %v5917_v48 }
 0x11f   :  { %v8112_v1 = vadd.f32 %v2006_v18, %v1958_v34 }
 0x120   :  { %v1912_v24 = vadd.f32 %v1911_v8, %v1863_v59  ;;  %2057 = vmatmul.bf16.gmra.mxu0 %v8105_v17  ;;  %2558 = vmatpush.bf16.msrb.mxu3 %v5918_v7  ;;  %v8123_v7 = vor.u32 %v7254_v21, %v5659_v23  ;;  %v7443_v21 = vld [vmem:[#allocation5 + $0x5c4] sm:$0xf] }
 0x121   :  { %2106 = vmatmul.bf16.gmra.mxu1 %v8107_v32  ;;  %2155 = vmatmul.bf16.gmra.mxu2 %v8109_v58  ;;  %v6551_v58 = vld [vmem:[#allocation5 + $0x6f0] sm:$0xf0]  ;;  %v5657_v32 = vld [vmem:[#allocation2 + $0x198] sm:$0xf] }
 0x122   :  { %2204 = vmatmul.bf16.gmra.mxu3 %v7985_v44  ;;  %v7479_v44 = vld [vmem:[#allocation5 + $0x6e4] sm:$0xf]  ;;  %v8121_v61 = vor.u32 %v7257_v22, %v5657_v32  ;;  %9121 = vst [vmem:[#allocation54_spill] sm:$0xff] %v8123_v7  ;;  %v5773_v22 = vld [vmem:[#allocation5 + $0xc8] sm:$0xf] }
 0x123   :  { %v6554_v39 = vor.u32 %v7479_v44, %v6551_v58  ;;  %v7286_v32 = vld [vmem:[#allocation5 + $0xd4] sm:$0xf0] }
 0x124   :  { %v1960_v3 = vpop.f32.mrf.mxu2  ;;  %9120 = vst [vmem:[#allocation53_spill] sm:$0xff] %v8121_v61 }
 0x125   :  { %v1961_v19 = vadd.f32 %v1960_v3, %v1912_v24  ;;  %v2009_v34 = vpop.f32.mrf.mxu3  ;;  %v1864_v18 = vpop.f32.mrf.mxu0  ;;  %v7258_v24 = vld [vmem:[#allocation2 + $0x1b8] sm:$0xf0]  ;;  %2460 = vmatpush.bf16.msrb.mxu1 %v6554_v39  ;;  %v7318_v39 = vld [vmem:[#allocation5 + $0x1d4] sm:$0xf0] }
 0x126   :  { %v1865_v36 = vadd.f32 %v1864_v18, %v8009_v55  ;;  %v1913_v59 = vpop.f32.mrf.mxu1 }
 0x127   :  { %v8119_v8 = vadd.f32 %v2009_v34, %v1961_v19  ;;  %v8125_v19 = vor.u32 %v7258_v24, %v5665_v5 }
 0x128   :  { %v1914_v2 = vadd.f32 %v1913_v59, %v1865_v36  ;;  %v5774_v36 = vor.u32 %v7286_v32, %v5773_v22  ;;  %v6407_v59 = vld [vmem:[#allocation5 + $0x5d0] sm:$0xf0] }
 0x129   :  { %9122 = vst [vmem:[#allocation55_spill] sm:$0xff] %v8125_v19  ;;  %v6410_v5 = vor.u32 %v7443_v21, %v6407_v59 }
 0x12a   :  { %2510 = vmatpush.bf16.msrb.mxu2 %v5774_v36 }
 0x12b   :  { %2412 = vmatpush.bf16.msrb.mxu0 %v6410_v5  ;;  %v5885_v5 = vld [vmem:[#allocation5 + $0x1a8] sm:$0xf] }
 0x12c   :  { %v1962_v48 = vpop.f32.mrf.mxu2 }
 0x12d   :  { %v1963_v63 = vadd.f32 %v1962_v48, %v1914_v2  ;;  %v2011_v3 = vpop.f32.mrf.mxu3  ;;  %v1867_v29 = vpop.f32.mrf.mxu0  ;;  %v5901_v2 = vld [vmem:[#allocation5 + $0x1c8] sm:$0xf] }
 0x12e   :  { %v1868_v34 = vadd.f32 %v1867_v29, %v8009_v55  ;;  %v1916_v44 = vpop.f32.mrf.mxu1  ;;  %v5902_v24 = vor.u32 %v7318_v39, %v5901_v2  ;;  %v7439_v39 = vld [vmem:[#allocation5 + $0x5a4] sm:$0xf] }
 0x12f   :  { %v8128_v58 = vadd.f32 %v2011_v3, %v1963_v63 }
 0x130   :  { %v1917_v18 = vadd.f32 %v1916_v44, %v1868_v34  ;;  %2062 = vmatmul.bf16.gmra.mxu0 %v8121_v61  ;;  %2559 = vmatpush.bf16.msrb.mxu3 %v5902_v24  ;;  %v7314_v24 = vld [vmem:[#allocation5 + $0x1b4] sm:$0xf0] }
 0x131   :  { %2111 = vmatmul.bf16.gmra.mxu1 %v8123_v7  ;;  %2160 = vmatmul.bf16.gmra.mxu2 %v8125_v19  ;;  %v6535_v19 = vld [vmem:[#allocation5 + $0x6d0] sm:$0xf0] }
 0x132   :  { %2209 = vmatmul.bf16.gmra.mxu3 %v7997_v20  ;;  %v7475_v20 = vld [vmem:[#allocation5 + $0x6c4] sm:$0xf] }
 0x133   :  { %v6538_v32 = vor.u32 %v7475_v20, %v6535_v19  ;;  %v5757_v20 = vld [vmem:[#allocation5 + $0xa8] sm:$0xf]  ;;  %v7282_v19 = vld [vmem:[#allocation5 + $0xb4] sm:$0xf0] }
 0x134   :  { %v1965_v23 = vpop.f32.mrf.mxu2 }
 0x135   :  { %v1966_v48 = vadd.f32 %v1965_v23, %v1917_v18  ;;  %v2014_v63 = vpop.f32.mrf.mxu3  ;;  %v1869_v3 = vpop.f32.mrf.mxu0  ;;  %2461 = vmatpush.bf16.msrb.mxu1 %v6538_v32  ;;  %v6391_v23 = vld [vmem:[#allocation5 + $0x5b0] sm:$0xf0]  ;;  %v7471_v32 = vld [vmem:[#allocation5 + $0x6a4] sm:$0xf] }
 0x136   :  { %v1870_v29 = vadd.f32 %v1869_v3, %v8009_v55  ;;  %v1918_v34 = vpop.f32.mrf.mxu1 }
 0x137   :  { %v8135_v44 = vadd.f32 %v2014_v63, %v1966_v48  ;;  %v6394_v48 = vor.u32 %v7439_v39, %v6391_v23 }
 0x138   :  { %v1919_v22 = vadd.f32 %v1918_v34, %v1870_v29 }
 0x139   :  { %2413 = vmatpush.bf16.msrb.mxu0 %v6394_v48  ;;  %v7278_v48 = vld [vmem:[#allocation5 + $0x94] sm:$0xf0] }
 0x13c   :  { %v1967_v7 = vpop.f32.mrf.mxu2 }
 0x13d   :  { %v1968_v61 = vadd.f32 %v1967_v7, %v1919_v22  ;;  %v2016_v21 = vpop.f32.mrf.mxu3  ;;  %v2028_v59 = vpop.f32.mrf.mxu0  ;;  %v5758_v7 = vor.u32 %v7282_v19, %v5757_v20 }
 0x13e   :  { %v2029_v18 = vadd.f32 %v2028_v59, %v8023_v38  ;;  %v2077_v2 = vpop.f32.mrf.mxu1 }
 0x13f   :  { %v8138_v36 = vadd.f32 %v2016_v21, %v1968_v61  ;;  %v5886_v61 = vor.u32 %v7314_v24, %v5885_v5  ;;  %2511 = vmatpush.bf16.msrb.mxu2 %v5758_v7  ;;  %v6519_v21 = vld [vmem:[#allocation5 + $0x6b0] sm:$0xf0] }
 0x140   :  { %v2078_v55 = vadd.f32 %v2077_v2, %v2029_v18  ;;  %2223 = vmatmul.bf16.vlgmr.msra.gmra.mxu0 %v7915_v53  ;;  %v6522_v18 = vor.u32 %v7471_v32, %v6519_v21 }
 0x141   :  { %2272 = vmatmul.bf16.vlgmr.msra.gmra.mxu1 %v7917_v54  ;;  %2321 = vmatmul.bf16.vlgmr.msra.gmra.mxu2 %v7919_v57 }
 0x142   :  { %2370 = vmatmul.bf16.vlgmr.msra.gmra.mxu3 %v8011_v0  ;;  %2462 = vmatpush.bf16.msrb.mxu1 %v6522_v18 }
 0x143   :  { %2560 = vmatpush.bf16.msrb.mxu3 %v5886_v61  ;;  %v7435_v61 = vld [vmem:[#allocation5 + $0x584] sm:$0xf] }
 0x144   :  { %v2126_v38 = vpop.f32.mrf.mxu2 }
 0x145   :  { %v2127_v63 = vadd.f32 %v2126_v38, %v2078_v55  ;;  %v8144_v3 = vpop.f32.mrf.mxu3  ;;  %v2030_v29 = vpop.f32.mrf.mxu0  ;;  %v5741_v38 = vld [vmem:[#allocation5 + $0x88] sm:$0xf] }
 0x146   :  { %v2031_v34 = vadd.f32 %v2030_v29, %v8032_v30  ;;  %v2079_v22 = vpop.f32.mrf.mxu1  ;;  %v5742_v29 = vor.u32 %v7278_v48, %v5741_v38 }
 0x147   :  { %v3195_v5 = vmax.f32 %v2127_v63, 0.0 }
 0x148   :  { %v2080_v59 = vadd.f32 %v2079_v22, %v2031_v34  ;;  %v6375_v34 = vld [vmem:[#allocation5 + $0x590] sm:$0xf0]  ;;  %v7310_v22 = vld [vmem:[#allocation5 + $0x194] sm:$0xf0]  ;;  %2512 = vmatpush.bf16.msrb.mxu2 %v5742_v29 }
 0x149   :  { %v6378_v32 = vor.u32 %v7435_v61, %v6375_v34 }
 0x14b   :  { %2414 = vmatpush.bf16.msrb.mxu0 %v6378_v32  ;;  %v7274_v32 = vld [vmem:[#allocation5 + $0x74] sm:$0xf0] }
 0x14c   :  { %v2128_v2 = vpop.f32.mrf.mxu2 }
 0x14d   :  { %v2129_v20 = vadd.f32 %v2128_v2, %v2080_v59  ;;  %v8147_v19 = vpop.f32.mrf.mxu3  ;;  %v2033_v39 = vpop.f32.mrf.mxu0 }
 0x14e   :  { %v2034_v55 = vadd.f32 %v2033_v39, %v8039_v4  ;;  %v2082_v23 = vpop.f32.mrf.mxu1  ;;  %v5869_v4 = vld [vmem:[#allocation5 + $0x188] sm:$0xf] }
 0x14f   :  { %v3199_v7 = vmax.f32 %v2129_v20, 0.0  ;;  %v5870_v21 = vor.u32 %v7310_v22, %v5869_v4 }
 0x150   :  { %v2083_v24 = vadd.f32 %v2082_v23, %v2034_v55  ;;  %2228 = vmatmul.bf16.gmra.mxu0 %v7927_v25  ;;  %v7467_v55 = vld [vmem:[#allocation5 + $0x684] sm:$0xf]  ;;  %v6503_v23 = vld [vmem:[#allocation5 + $0x690] sm:$0xf0] }
 0x151   :  { %v8151_v30 = vpack.c.bf16 %v3199_v7, %v3195_v5  ;;  %2277 = vmatmul.bf16.gmra.mxu1 %v7929_v26  ;;  %2326 = vmatmul.bf16.gmra.mxu2 %v7931_v27  ;;  %v6506_v7 = vor.u32 %v7467_v55, %v6503_v23 }
 0x152   :  { %2375 = vmatmul.bf16.gmra.mxu3 %v8025_v6 }
 0x153   :  { %9123 = vst [vmem:[#allocation56_spill] sm:$0xff] %v8151_v30  ;;  %2561 = vmatpush.bf16.msrb.mxu3 %v5870_v21  ;;  %2463 = vmatpush.bf16.msrb.mxu1 %v6506_v7  ;;  %v7431_v21 = vld [vmem:[#allocation5 + $0x564] sm:$0xf] }
 0x154   :  { %v2131_v63 = vpop.f32.mrf.mxu2 }
 0x155   :  { %v2132_v59 = vadd.f32 %v2131_v63, %v2083_v24  ;;  %v8156_v18 = vpop.f32.mrf.mxu3  ;;  %v2035_v2 = vpop.f32.mrf.mxu0  ;;  %v5725_v63 = vld [vmem:[#allocation5 + $0x68] sm:$0xf] }
 0x156   :  { %v2036_v20 = vadd.f32 %v2035_v2, %v8048_v62  ;;  %v2084_v39 = vpop.f32.mrf.mxu1  ;;  %v5726_v2 = vor.u32 %v7274_v32, %v5725_v63 }
 0x157   :  { %v3203_v4 = vmax.f32 %v2132_v59, 0.0 }
 0x158   :  { %v2085_v5 = vadd.f32 %v2084_v39, %v2036_v20  ;;  %v6359_v20 = vld [vmem:[#allocation5 + $0x570] sm:$0xf0]  ;;  %v7306_v39 = vld [vmem:[#allocation5 + $0x174] sm:$0xf0]  ;;  %2513 = vmatpush.bf16.msrb.mxu2 %v5726_v2 }
 0x159   :  { %v6362_v55 = vor.u32 %v7431_v21, %v6359_v20 }
 0x15b   :  { %2415 = vmatpush.bf16.msrb.mxu0 %v6362_v55  ;;  %v7270_v55 = vld [vmem:[#allocation5 + $0x54] sm:$0xf0] }
 0x15c   :  { %v2133_v38 = vpop.f32.mrf.mxu2 }
 0x15d   :  { %v2134_v48 = vadd.f32 %v2133_v38, %v2085_v5  ;;  %v8159_v30 = vpop.f32.mrf.mxu3  ;;  %v2038_v61 = vpop.f32.mrf.mxu0 }
 0x15e   :  { %v2039_v24 = vadd.f32 %v2038_v61, %v8055_v60  ;;  %v2087_v34 = vpop.f32.mrf.mxu1  ;;  %v5853_v60 = vld [vmem:[#allocation5 + $0x168] sm:$0xf] }
 0x15f   :  { %v3207_v29 = vmax.f32 %v2134_v48, 0.0  ;;  %v5854_v23 = vor.u32 %v7306_v39, %v5853_v60 }
 0x160   :  { %v2088_v22 = vadd.f32 %v2087_v34, %v2039_v24  ;;  %2233 = vmatmul.bf16.gmra.mxu0 %v7939_v50  ;;  %v7463_v24 = vld [vmem:[#allocation5 + $0x664] sm:$0xf]  ;;  %v6487_v34 = vld [vmem:[#allocation5 + $0x670] sm:$0xf0] }
 0x161   :  { %v8163_v62 = vpack.c.bf16 %v3207_v29, %v3203_v4  ;;  %2282 = vmatmul.bf16.gmra.mxu1 %v7941_v51  ;;  %2331 = vmatmul.bf16.gmra.mxu2 %v7943_v52  ;;  %v6490_v29 = vor.u32 %v7463_v24, %v6487_v34 }
 0x162   :  { %2380 = vmatmul.bf16.gmra.mxu3 %v8041_v35 }
 0x163   :  { %9124 = vst [vmem:[#allocation57_spill] sm:$0xff] %v8163_v62  ;;  %2562 = vmatpush.bf16.msrb.mxu3 %v5854_v23  ;;  %2464 = vmatpush.bf16.msrb.mxu1 %v6490_v29  ;;  %v7427_v23 = vld [vmem:[#allocation5 + $0x544] sm:$0xf] }
 0x164   :  { %v2136_v59 = vpop.f32.mrf.mxu2 }
 0x165   :  { %v2137_v5 = vadd.f32 %v2136_v59, %v2088_v22  ;;  %v8168_v7 = vpop.f32.mrf.mxu3  ;;  %v2040_v38 = vpop.f32.mrf.mxu0  ;;  %v5709_v59 = vld [vmem:[#allocation5 + $0x48] sm:$0xf] }
 0x166   :  { %v2041_v48 = vadd.f32 %v2040_v38, %v8064_v37  ;;  %v2089_v61 = vpop.f32.mrf.mxu1  ;;  %v5710_v38 = vor.u32 %v7270_v55, %v5709_v59 }
 0x167   :  { %v3211_v60 = vmax.f32 %v2137_v5, 0.0 }
 0x168   :  { %v2090_v4 = vadd.f32 %v2089_v61, %v2041_v48  ;;  %v6343_v48 = vld [vmem:[#allocation5 + $0x550] sm:$0xf0]  ;;  %v7302_v61 = vld [vmem:[#allocation5 + $0x154] sm:$0xf0]  ;;  %2514 = vmatpush.bf16.msrb.mxu2 %v5710_v38 }
 0x169   :  { %v6346_v24 = vor.u32 %v7427_v23, %v6343_v48 }
 0x16b   :  { %2416 = vmatpush.bf16.msrb.mxu0 %v6346_v24  ;;  %v7266_v24 = vld [vmem:[#allocation5 + $0x34] sm:$0xf0] }
 0x16c   :  { %v2138_v63 = vpop.f32.mrf.mxu2 }
 0x16d   :  { %v2139_v32 = vadd.f32 %v2138_v63, %v2090_v4  ;;  %v8171_v62 = vpop.f32.mrf.mxu3  ;;  %v2043_v21 = vpop.f32.mrf.mxu0 }
 0x16e   :  { %v2044_v22 = vadd.f32 %v2043_v21, %v8071_v49  ;;  %v2092_v20 = vpop.f32.mrf.mxu1  ;;  %v5837_v49 = vld [vmem:[#allocation5 + $0x148] sm:$0xf] }
 0x16f   :  { %v3215_v2 = vmax.f32 %v2139_v32, 0.0  ;;  %v5838_v34 = vor.u32 %v7302_v61, %v5837_v49 }
 0x170   :  { %v2093_v39 = vadd.f32 %v2092_v20, %v2044_v22  ;;  %2238 = vmatmul.bf16.gmra.mxu0 %v7951_v13  ;;  %v7459_v22 = vld [vmem:[#allocation5 + $0x644] sm:$0xf]  ;;  %v6471_v20 = vld [vmem:[#allocation5 + $0x650] sm:$0xf0] }
 0x171   :  { %v8175_v37 = vpack.c.bf16 %v3215_v2, %v3211_v60  ;;  %2287 = vmatmul.bf16.gmra.mxu1 %v7953_v14  ;;  %2336 = vmatmul.bf16.gmra.mxu2 %v7955_v15  ;;  %v6474_v2 = vor.u32 %v7459_v22, %v6471_v20 }
 0x172   :  { %2385 = vmatmul.bf16.gmra.mxu3 %v8057_v16 }
 0x173   :  { %9125 = vst [vmem:[#allocation58_spill] sm:$0xff] %v8175_v37  ;;  %2563 = vmatpush.bf16.msrb.mxu3 %v5838_v34  ;;  %2465 = vmatpush.bf16.msrb.mxu1 %v6474_v2  ;;  %v7423_v34 = vld [vmem:[#allocation5 + $0x524] sm:$0xf] }
 0x174   :  { %v2141_v5 = vpop.f32.mrf.mxu2 }
 0x175   :  { %v2142_v4 = vadd.f32 %v2141_v5, %v2093_v39  ;;  %v8180_v29 = vpop.f32.mrf.mxu3  ;;  %v2045_v63 = vpop.f32.mrf.mxu0  ;;  %v5693_v5 = vld [vmem:[#allocation5 + $0x28] sm:$0xf] }
 0x176   :  { %v2046_v32 = vadd.f32 %v2045_v63, %v8080_v31  ;;  %v2094_v21 = vpop.f32.mrf.mxu1  ;;  %v5694_v63 = vor.u32 %v7266_v24, %v5693_v5 }
 0x177   :  { %v3219_v49 = vmax.f32 %v2142_v4, 0.0 }
 0x178   :  { %v2095_v60 = vadd.f32 %v2094_v21, %v2046_v32  ;;  %v6327_v32 = vld [vmem:[#allocation5 + $0x530] sm:$0xf0]  ;;  %v7298_v21 = vld [vmem:[#allocation5 + $0x134] sm:$0xf0]  ;;  %2515 = vmatpush.bf16.msrb.mxu2 %v5694_v63 }
 0x179   :  { %v6330_v22 = vor.u32 %v7423_v34, %v6327_v32 }
 0x17b   :  { %2417 = vmatpush.bf16.msrb.mxu0 %v6330_v22  ;;  %v7262_v22 = vld [vmem:[#allocation5 + $0x14] sm:$0xf0] }
 0x17c   :  { %v2143_v59 = vpop.f32.mrf.mxu2 }
 0x17d   :  { %v2144_v55 = vadd.f32 %v2143_v59, %v2095_v60  ;;  %v8183_v37 = vpop.f32.mrf.mxu3  ;;  %v2048_v23 = vpop.f32.mrf.mxu0 }
 0x17e   :  { %v2049_v39 = vadd.f32 %v2048_v23, %v8087_v12  ;;  %v2097_v48 = vpop.f32.mrf.mxu1  ;;  %v5821_v12 = vld [vmem:[#allocation5 + $0x128] sm:$0xf] }
 0x17f   :  { %v3223_v38 = vmax.f32 %v2144_v55, 0.0  ;;  %v5822_v20 = vor.u32 %v7298_v21, %v5821_v12 }
 0x180   :  { %v2098_v61 = vadd.f32 %v2097_v48, %v2049_v39  ;;  %2243 = vmatmul.bf16.gmra.mxu0 %v7963_v41  ;;  %v7455_v39 = vld [vmem:[#allocation5 + $0x624] sm:$0xf]  ;;  %v6455_v48 = vld [vmem:[#allocation5 + $0x630] sm:$0xf0] }
 0x181   :  { %v8187_v31 = vpack.c.bf16 %v3223_v38, %v3219_v49  ;;  %2292 = vmatmul.bf16.gmra.mxu1 %v7965_v42  ;;  %2341 = vmatmul.bf16.gmra.mxu2 %v7967_v43  ;;  %v6458_v38 = vor.u32 %v7455_v39, %v6455_v48 }
 0x182   :  { %2390 = vmatmul.bf16.gmra.mxu3 %v8073_v56 }
 0x183   :  { %9126 = vst [vmem:[#allocation59_spill] sm:$0xff] %v8187_v31  ;;  %2564 = vmatpush.bf16.msrb.mxu3 %v5822_v20  ;;  %2466 = vmatpush.bf16.msrb.mxu1 %v6458_v38  ;;  %v7419_v20 = vld [vmem:[#allocation5 + $0x504] sm:$0xf] }
 0x184   :  { %v2146_v4 = vpop.f32.mrf.mxu2 }
 0x185   :  { %v2147_v60 = vadd.f32 %v2146_v4, %v2098_v61  ;;  %v8192_v2 = vpop.f32.mrf.mxu3  ;;  %v2050_v59 = vpop.f32.mrf.mxu0  ;;  %v5677_v4 = vld [vmem:[#allocation5 + $0x8] sm:$0xf] }
 0x186   :  { %v2051_v55 = vadd.f32 %v2050_v59, %v8096_v28  ;;  %v2099_v23 = vpop.f32.mrf.mxu1  ;;  %v5678_v59 = vor.u32 %v7262_v22, %v5677_v4 }
 0x187   :  { %v3227_v12 = vmax.f32 %v2147_v60, 0.0 }
 0x188   :  { %v2100_v49 = vadd.f32 %v2099_v23, %v2051_v55  ;;  %v6311_v55 = vld [vmem:[#allocation5 + $0x510] sm:$0xf0]  ;;  %v7294_v23 = vld [vmem:[#allocation5 + $0x114] sm:$0xf0]  ;;  %2516 = vmatpush.bf16.msrb.mxu2 %v5678_v59 }
 0x189   :  { %v6314_v39 = vor.u32 %v7419_v20, %v6311_v55 }
 0x18b   :  { %2418 = vmatpush.bf16.msrb.mxu0 %v6314_v39  ;;  %v7418_v39 = vld [vmem:[#allocation5 + $0x4f4] sm:$0xf0] }
 0x18c   :  { %v2148_v5 = vpop.f32.mrf.mxu2 }
 0x18d   :  { %v2149_v24 = vadd.f32 %v2148_v5, %v2100_v49  ;;  %v8195_v31 = vpop.f32.mrf.mxu3  ;;  %v2053_v34 = vpop.f32.mrf.mxu0 }
 0x18e   :  { %v2054_v61 = vadd.f32 %v2053_v34, %v8103_v40  ;;  %v2102_v32 = vpop.f32.mrf.mxu1  ;;  %v5805_v40 = vld [vmem:[#allocation5 + $0x108] sm:$0xf] }
 0x18f   :  { %v3231_v63 = vmax.f32 %v2149_v24, 0.0  ;;  %v5806_v48 = vor.u32 %v7294_v23, %v5805_v40 }
 0x190   :  { %v2103_v21 = vadd.f32 %v2102_v32, %v2054_v61  ;;  %2248 = vmatmul.bf16.gmra.mxu0 %v7975_v9  ;;  %v7451_v61 = vld [vmem:[#allocation5 + $0x604] sm:$0xf]  ;;  %v6439_v32 = vld [vmem:[#allocation5 + $0x610] sm:$0xf0] }
 0x191   :  { %v8199_v28 = vpack.c.bf16 %v3231_v63, %v3227_v12  ;;  %2297 = vmatmul.bf16.gmra.mxu1 %v7977_v10  ;;  %2346 = vmatmul.bf16.gmra.mxu2 %v7979_v11  ;;  %v6442_v63 = vor.u32 %v7451_v61, %v6439_v32 }
 0x192   :  { %2395 = vmatmul.bf16.gmra.mxu3 %v8089_v33 }
 0x193   :  { %9127 = vst [vmem:[#allocation60_spill] sm:$0xff] %v8199_v28  ;;  %2565 = vmatpush.bf16.msrb.mxu3 %v5806_v48  ;;  %2467 = vmatpush.bf16.msrb.mxu1 %v6442_v63  ;;  %v6045_v48 = vld [vmem:[#allocation5 + $0x2e8] sm:$0xf] }
 0x194   :  { %v2151_v60 = vpop.f32.mrf.mxu2 }
 0x195   :  { %v2152_v49 = vadd.f32 %v2151_v60, %v2103_v21  ;;  %v8204_v38 = vpop.f32.mrf.mxu3  ;;  %v2055_v5 = vpop.f32.mrf.mxu0  ;;  %v6301_v60 = vld [vmem:[#allocation5 + $0x4e8] sm:$0xf] }
 0x196   :  { %v2056_v24 = vadd.f32 %v2055_v5, %v8112_v1  ;;  %v2104_v34 = vpop.f32.mrf.mxu1  ;;  %v6302_v5 = vor.u32 %v7418_v39, %v6301_v60 }
 0x197   :  { %v3235_v40 = vmax.f32 %v2152_v49, 0.0 }
 0x198   :  { %v2105_v12 = vadd.f32 %v2104_v34, %v2056_v24  ;;  %v7354_v24 = vld [vmem:[#allocation5 + $0x2f4] sm:$0xf0]  ;;  %2705 = vmatpush.bf16.msra.mxu2 %v6302_v5 }
 0x199   :  { %v7450_v34 = vld [vmem:[#allocation5 + $0x5f4] sm:$0xf0]  ;;  %v6046_v61 = vor.u32 %v7354_v24, %v6045_v48 }
 0x19b   :  { %2607 = vmatpush.bf16.msra.mxu0 %v6046_v61  ;;  %v9131_v61 = vld [vmem:[#allocation36_spill] sm:$0xff] }
 0x19c   :  { %v2153_v4 = vpop.f32.mrf.mxu2 }
 0x19d   :  { %v2154_v22 = vadd.f32 %v2153_v4, %v2105_v12  ;;  %v8207_v28 = vpop.f32.mrf.mxu3  ;;  %v2058_v20 = vpop.f32.mrf.mxu0 }
 0x19e   :  { %v2059_v21 = vadd.f32 %v2058_v20, %v8119_v8  ;;  %v2107_v55 = vpop.f32.mrf.mxu1  ;;  %v6429_v8 = vld [vmem:[#allocation5 + $0x5e8] sm:$0xf] }
 0x19f   :  { %v3239_v59 = vmax.f32 %v2154_v22, 0.0  ;;  %v6430_v32 = vor.u32 %v7450_v34, %v6429_v8 }
 0x1a0   :  { %v2108_v23 = vadd.f32 %v2107_v55, %v2059_v21  ;;  %2253 = vmatmul.bf16.gmra.mxu0 %v7987_v45  ;;  %v6173_v21 = vld [vmem:[#allocation5 + $0x3e8] sm:$0xf]  ;;  %v7386_v55 = vld [vmem:[#allocation5 + $0x3f4] sm:$0xf0] }
 0x1a1   :  { %v8211_v1 = vpack.c.bf16 %v3239_v59, %v3235_v40  ;;  %2302 = vmatmul.bf16.gmra.mxu1 %v7989_v46  ;;  %2351 = vmatmul.bf16.gmra.mxu2 %v7991_v47  ;;  %v6174_v59 = vor.u32 %v7386_v55, %v6173_v21  ;;  %v6029_v21 = vld [vmem:[#allocation5 + $0x2c8] sm:$0xf] }
 0x1a2   :  { %2400 = vmatmul.bf16.gmra.mxu3 %v8105_v17 }
 0x1a3   :  { %9128 = vst [vmem:[#allocation61_spill] sm:$0xff] %v8211_v1  ;;  %2754 = vmatpush.bf16.msra.mxu3 %v6430_v32  ;;  %2656 = vmatpush.bf16.msra.mxu1 %v6174_v59  ;;  %v9132_v32 = vld [vmem:[#allocation37_spill] sm:$0xff] }
 0x1a4   :  { %v2156_v49 = vpop.f32.mrf.mxu2  ;;  %v7446_v59 = vld [vmem:[#allocation5 + $0x5d4] sm:$0xf0] }
 0x1a5   :  { %v2157_v12 = vadd.f32 %v2156_v49, %v2108_v23  ;;  %v8216_v63 = vpop.f32.mrf.mxu3  ;;  %v2060_v4 = vpop.f32.mrf.mxu0 }
 0x1a6   :  { %v2061_v22 = vadd.f32 %v2060_v4, %v8128_v58  ;;  %v2109_v20 = vpop.f32.mrf.mxu1  ;;  %v9129_v58 = vld [vmem:[#allocation35_spill] sm:$0xff]  ;;  %v9133_v4 = vld [vmem:[#allocation53_spill] sm:$0xff] }
 0x1a7   :  { %v3243_v8 = vmax.f32 %v2157_v12, 0.0 }
 0x1a8   :  { %v2110_v40 = vadd.f32 %v2109_v20, %v2061_v22  ;;  %v6285_v22 = vld [vmem:[#allocation5 + $0x4c8] sm:$0xf]  ;;  %v7414_v20 = vld [vmem:[#allocation5 + $0x4d4] sm:$0xf0] }
 0x1a9   :  { %v6286_v55 = vor.u32 %v7414_v20, %v6285_v22 }
 0x1ab   :  { %2706 = vmatpush.bf16.msra.mxu2 %v6286_v55 }
 0x1ac   :  { %v2158_v60 = vpop.f32.mrf.mxu2 }
 0x1ad   :  { %v2159_v39 = vadd.f32 %v2158_v60, %v2110_v40  ;;  %v8219_v1 = vpop.f32.mrf.mxu3  ;;  %v2063_v48 = vpop.f32.mrf.mxu0  ;;  %v7350_v40 = vld [vmem:[#allocation5 + $0x2d4] sm:$0xf0] }
 0x1ae   :  { %v2064_v23 = vadd.f32 %v2063_v48, %v8135_v44  ;;  %v2112_v24 = vpop.f32.mrf.mxu1  ;;  %v6413_v44 = vld [vmem:[#allocation5 + $0x5c8] sm:$0xf]  ;;  %v6030_v60 = vor.u32 %v7350_v40, %v6029_v21 }
 0x1af   :  { %v3247_v5 = vmax.f32 %v2159_v39, 0.0  ;;  %v6414_v39 = vor.u32 %v7446_v59, %v6413_v44 }
 0x1b0   :  { %v2113_v34 = vadd.f32 %v2112_v24, %v2064_v23  ;;  %2258 = vmatmul.bf16.gmra.mxu0 %v9129_v58 }
 0x1b1   :  { %v8223_v49 = vpack.c.bf16 %v3247_v5, %v3243_v8  ;;  %2307 = vmatmul.bf16.gmra.mxu1 %v9131_v61  ;;  %2356 = vmatmul.bf16.gmra.mxu2 %v9132_v32  ;;  %v8231_v32 = vld [vmem:[#allocation7] sm:$0xf] }
 0x1b2   :  { %2405 = vmatmul.bf16.gmra.mxu3 %v9133_v4  ;;  %2608 = vmatpush.bf16.msra.mxu0 %v6030_v60  ;;  %v7382_v4 = vld [vmem:[#allocation5 + $0x3d4] sm:$0xf0]  ;;  %v8234_v22 = vperm.slane %v8231_v32, 1  ;;  %v9134_v61 = vld [vmem:[#allocation38_spill] sm:$0xff] }
 0x1b3   :  { %9130 = vst [vmem:[#allocation62_spill] sm:$0xff] %v8223_v49  ;;  %2755 = vmatpush.bf16.msra.mxu3 %v6414_v39  ;;  %v6157_v49 = vld [vmem:[#allocation5 + $0x3c8] sm:$0xf] }
 0x1b4   :  { %v2161_v12 = vpop.f32.mrf.mxu2  ;;  %v6158_v21 = vor.u32 %v7382_v4, %v6157_v49  ;;  %v9137_v49 = vld [vmem:[#allocation19_spill] sm:$0xff]  ;;  %v7410_v4 = vld [vmem:[#allocation5 + $0x4b4] sm:$0xf0] }
 0x1b5   :  { %v2162_v48 = vadd.f32 %v2161_v12, %v2113_v34  ;;  %v8228_v23 = vpop.f32.mrf.mxu3  ;;  %v2065_v24 = vpop.f32.mrf.mxu0  ;;  %v2176_v34 = vadd.f32 %v8144_v3, %v8234_v22  ;;  %v6269_v3 = vld [vmem:[#allocation5 + $0x4a8] sm:$0xf] }
 0x1b6   :  { %v2066_v8 = vadd.f32 %v2065_v24, %v8138_v36  ;;  %v2114_v5 = vpop.f32.mrf.mxu1  ;;  %2657 = vmatpush.bf16.msra.mxu1 %v6158_v21  ;;  %v7346_v21 = vld [vmem:[#allocation5 + $0x2b4] sm:$0xf0] }
 0x1b7   :  { %v3251_v60 = vmax.f32 %v2162_v48, 0.0  ;;  %v2178_v48 = vadd.f32 %v8147_v19, %v8234_v22  ;;  %v2181_v19 = vadd.f32 %v8156_v18, %v8234_v22  ;;  %v5997_v18 = vld [vmem:[#allocation5 + $0x288] sm:$0xf] }
 0x1b8   :  { %v2115_v20 = vadd.f32 %v2114_v5, %v2066_v8  ;;  %v9136_v8 = vld [vmem:[#allocation39_spill] sm:$0xff] }
 0x1b9   :  { %v6013_v5 = vld [vmem:[#allocation5 + $0x2a8] sm:$0xf] }
 0x1bc   :  { %v2163_v40 = vpop.f32.mrf.mxu2 }
 0x1bd   :  { %v2164_v55 = vadd.f32 %v2163_v40, %v2115_v20  ;;  %v8238_v44 = vpop.f32.mrf.mxu3  ;;  %v2224_v36 = vpop.f32.mrf.mxu0  ;;  %v6270_v20 = vor.u32 %v7410_v4, %v6269_v3  ;;  %v7442_v40 = vld [vmem:[#allocation5 + $0x5b4] sm:$0xf0]  ;;  %v6141_v3 = vld [vmem:[#allocation5 + $0x3a8] sm:$0xf] }
 0x1be   :  { %v2225_v59 = vadd.f32 %v2224_v36, %v2176_v34  ;;  %v2273_v12 = vpop.f32.mrf.mxu1  ;;  %v6397_v34 = vld [vmem:[#allocation5 + $0x5a8] sm:$0xf]  ;;  %v6014_v36 = vor.u32 %v7346_v21, %v6013_v5  ;;  %v7378_v4 = vld [vmem:[#allocation5 + $0x3b4] sm:$0xf0] }
 0x1bf   :  { %v3255_v39 = vmax.f32 %v2164_v55, 0.0  ;;  %2707 = vmatpush.bf16.msra.mxu2 %v6270_v20  ;;  %v6142_v47 = vor.u32 %v7378_v4, %v6141_v3  ;;  %v2183_v3 = vadd.f32 %v8159_v30, %v8234_v22  ;;  %v2186_v30 = vadd.f32 %v8168_v7, %v8234_v22  ;;  %v5981_v7 = vld [vmem:[#allocation5 + $0x268] sm:$0xf] }
 0x1c0   :  { %v2274_v24 = vadd.f32 %v2273_v12, %v2225_v59  ;;  %2419 = vmatmul.bf16.vlgmr.msrb.gmra.mxu0 %v9134_v61  ;;  %v6398_v59 = vor.u32 %v7442_v40, %v6397_v34 }
 0x1c1   :  { %v8241_v17 = vpack.c.bf16 %v3255_v39, %v3251_v60  ;;  %2468 = vmatmul.bf16.vlgmr.msrb.gmra.mxu1 %v9136_v8  ;;  %2517 = vmatmul.bf16.vlgmr.msrb.gmra.mxu2 %v9137_v49 }
 0x1c2   :  { %2566 = vmatmul.bf16.vlgmr.msrb.gmra.mxu3 %v7915_v53  ;;  %2609 = vmatpush.bf16.msra.mxu0 %v6014_v36  ;;  %v9138_v36 = vld [vmem:[#allocation40_spill] sm:$0xff] }
 0x1c3   :  { %9135 = vst [vmem:[#allocation38_spill] sm:$0xff] %v8241_v17  ;;  %2756 = vmatpush.bf16.msra.mxu3 %v6398_v59  ;;  %2658 = vmatpush.bf16.msra.mxu1 %v6142_v47  ;;  %v9139_v59 = vld [vmem:[#allocation41_spill] sm:$0xff]  ;;  %v6253_v47 = vld [vmem:[#allocation5 + $0x488] sm:$0xf] }
 0x1c4   :  { %v2322_v55 = vpop.f32.mrf.mxu2 }
 0x1c5   :  { %v2323_v12 = vadd.f32 %v2322_v55, %v2274_v24  ;;  %v2371_v60 = vpop.f32.mrf.mxu3  ;;  %v2226_v39 = vpop.f32.mrf.mxu0 }
 0x1c6   :  { %v2227_v17 = vadd.f32 %v2226_v39, %v2178_v48  ;;  %v2275_v49 = vpop.f32.mrf.mxu1  ;;  %v7438_v39 = vld [vmem:[#allocation5 + $0x594] sm:$0xf0] }
 0x1c7   :  { %v8248_v53 = vadd.f32 %v2371_v60, %v2323_v12  ;;  %v9140_v12 = vld [vmem:[#allocation21_spill] sm:$0xff]  ;;  %v6381_v60 = vld [vmem:[#allocation5 + $0x588] sm:$0xf] }
 0x1c8   :  { %v2276_v8 = vadd.f32 %v2275_v49, %v2227_v17  ;;  %v7406_v17 = vld [vmem:[#allocation5 + $0x494] sm:$0xf0] }
 0x1c9   :  { %v6254_v49 = vor.u32 %v7406_v17, %v6253_v47  ;;  %v6125_v47 = vld [vmem:[#allocation5 + $0x388] sm:$0xf]  ;;  %v7374_v17 = vld [vmem:[#allocation5 + $0x394] sm:$0xf0] }
 0x1cb   :  { %2708 = vmatpush.bf16.msra.mxu2 %v6254_v49 }
 0x1cc   :  { %v2324_v5 = vpop.f32.mrf.mxu2 }
 0x1cd   :  { %v2325_v21 = vadd.f32 %v2324_v5, %v2276_v8  ;;  %v2373_v24 = vpop.f32.mrf.mxu3  ;;  %v2229_v34 = vpop.f32.mrf.mxu0  ;;  %v7342_v8 = vld [vmem:[#allocation5 + $0x294] sm:$0xf0]  ;;  %v6382_v5 = vor.u32 %v7438_v39, %v6381_v60 }
 0x1ce   :  { %v2230_v40 = vadd.f32 %v2229_v34, %v2181_v19  ;;  %v2278_v20 = vpop.f32.mrf.mxu1  ;;  %v5998_v19 = vor.u32 %v7342_v8, %v5997_v18 }
 0x1cf   :  { %v8252_v48 = vadd.f32 %v2373_v24, %v2325_v21  ;;  %2757 = vmatpush.bf16.msra.mxu3 %v6382_v5  ;;  %v9142_v5 = vld [vmem:[#allocation43_spill] sm:$0xff] }
 0x1d0   :  { %v2279_v55 = vadd.f32 %v2278_v20, %v2230_v40  ;;  %2424 = vmatmul.bf16.gmra.mxu0 %v9138_v36 }
 0x1d1   :  { %2473 = vmatmul.bf16.gmra.mxu1 %v9139_v59  ;;  %2522 = vmatmul.bf16.gmra.mxu2 %v9140_v12  ;;  %v6126_v59 = vor.u32 %v7374_v17, %v6125_v47  ;;  %v2188_v47 = vadd.f32 %v8171_v62, %v8234_v22  ;;  %v2191_v62 = vadd.f32 %v8180_v29, %v8234_v22  ;;  %v5965_v29 = vld [vmem:[#allocation5 + $0x248] sm:$0xf] }
 0x1d2   :  { %2571 = vmatmul.bf16.gmra.mxu3 %v7927_v25  ;;  %2610 = vmatpush.bf16.msra.mxu0 %v5998_v19  ;;  %v9141_v19 = vld [vmem:[#allocation42_spill] sm:$0xff] }
 0x1d3   :  { %2659 = vmatpush.bf16.msra.mxu1 %v6126_v59  ;;  %v6237_v59 = vld [vmem:[#allocation5 + $0x468] sm:$0xf] }
 0x1d4   :  { %v2327_v4 = vpop.f32.mrf.mxu2 }
 0x1d5   :  { %v2328_v21 = vadd.f32 %v2327_v4, %v2279_v55  ;;  %v2376_v24 = vpop.f32.mrf.mxu3  ;;  %v2231_v34 = vpop.f32.mrf.mxu0 }
 0x1d6   :  { %v2232_v40 = vadd.f32 %v2231_v34, %v2183_v3  ;;  %v2280_v20 = vpop.f32.mrf.mxu1 }
 0x1d7   :  { %v8260_v25 = vadd.f32 %v2376_v24, %v2328_v21  ;;  %v9143_v21 = vld [vmem:[#allocation23_spill] sm:$0xff]  ;;  %v7402_v24 = vld [vmem:[#allocation5 + $0x474] sm:$0xf0] }
 0x1d8   :  { %v2281_v12 = vadd.f32 %v2280_v20, %v2232_v40  ;;  %v6238_v34 = vor.u32 %v7402_v24, %v6237_v59  ;;  %v6365_v40 = vld [vmem:[#allocation5 + $0x568] sm:$0xf]  ;;  %v7434_v20 = vld [vmem:[#allocation5 + $0x574] sm:$0xf0] }
 0x1d9   :  { %v6109_v59 = vld [vmem:[#allocation5 + $0x368] sm:$0xf]  ;;  %v7370_v24 = vld [vmem:[#allocation5 + $0x374] sm:$0xf0] }
 0x1da   :  { %2709 = vmatpush.bf16.msra.mxu2 %v6238_v34 }
 0x1dc   :  { %v2329_v18 = vpop.f32.mrf.mxu2 }
 0x1dd   :  { %v2330_v8 = vadd.f32 %v2329_v18, %v2281_v12  ;;  %v2378_v55 = vpop.f32.mrf.mxu3  ;;  %v2234_v60 = vpop.f32.mrf.mxu0  ;;  %v7338_v12 = vld [vmem:[#allocation5 + $0x274] sm:$0xf0]  ;;  %v6366_v18 = vor.u32 %v7434_v20, %v6365_v40 }
 0x1de   :  { %v2235_v39 = vadd.f32 %v2234_v60, %v2186_v30  ;;  %v2283_v49 = vpop.f32.mrf.mxu1  ;;  %v5982_v30 = vor.u32 %v7338_v12, %v5981_v7 }
 0x1df   :  { %v8264_v3 = vadd.f32 %v2378_v55, %v2330_v8  ;;  %2758 = vmatpush.bf16.msra.mxu3 %v6366_v18  ;;  %v9145_v18 = vld [vmem:[#allocation45_spill] sm:$0xff] }
 0x1e0   :  { %v2284_v4 = vadd.f32 %v2283_v49, %v2235_v39  ;;  %2429 = vmatmul.bf16.gmra.mxu0 %v9141_v19 }
 0x1e1   :  { %2478 = vmatmul.bf16.gmra.mxu1 %v9142_v5  ;;  %2527 = vmatmul.bf16.gmra.mxu2 %v9143_v21  ;;  %v6110_v5 = vor.u32 %v7370_v24, %v6109_v59  ;;  %v2193_v59 = vadd.f32 %v8183_v37, %v8234_v22  ;;  %v2196_v37 = vadd.f32 %v8192_v2, %v8234_v22  ;;  %v5949_v2 = vld [vmem:[#allocation5 + $0x228] sm:$0xf] }
 0x1e2   :  { %2576 = vmatmul.bf16.gmra.mxu3 %v7939_v50  ;;  %2611 = vmatpush.bf16.msra.mxu0 %v5982_v30  ;;  %v9144_v30 = vld [vmem:[#allocation44_spill] sm:$0xff] }
 0x1e3   :  { %2660 = vmatpush.bf16.msra.mxu1 %v6110_v5  ;;  %v6221_v5 = vld [vmem:[#allocation5 + $0x448] sm:$0xf] }
 0x1e4   :  { %v2332_v17 = vpop.f32.mrf.mxu2 }
 0x1e5   :  { %v2333_v8 = vadd.f32 %v2332_v17, %v2284_v4  ;;  %v2381_v55 = vpop.f32.mrf.mxu3  ;;  %v2236_v60 = vpop.f32.mrf.mxu0 }
 0x1e6   :  { %v2237_v39 = vadd.f32 %v2236_v60, %v2188_v47  ;;  %v2285_v49 = vpop.f32.mrf.mxu1 }
 0x1e7   :  { %v8272_v50 = vadd.f32 %v2381_v55, %v2333_v8  ;;  %v9146_v8 = vld [vmem:[#allocation25_spill] sm:$0xff] }
 0x1e8   :  { %v2286_v21 = vadd.f32 %v2285_v49, %v2237_v39  ;;  %v7398_v55 = vld [vmem:[#allocation5 + $0x454] sm:$0xf0]  ;;  %v6349_v39 = vld [vmem:[#allocation5 + $0x548] sm:$0xf] }
 0x1e9   :  { %v6222_v60 = vor.u32 %v7398_v55, %v6221_v5  ;;  %v7430_v49 = vld [vmem:[#allocation5 + $0x554] sm:$0xf0]  ;;  %v6093_v5 = vld [vmem:[#allocation5 + $0x348] sm:$0xf] }
 0x1ea   :  { %v7366_v55 = vld [vmem:[#allocation5 + $0x354] sm:$0xf0] }
 0x1eb   :  { %2710 = vmatpush.bf16.msra.mxu2 %v6222_v60 }
 0x1ec   :  { %v2334_v7 = vpop.f32.mrf.mxu2 }
 0x1ed   :  { %v2335_v12 = vadd.f32 %v2334_v7, %v2286_v21  ;;  %v2383_v4 = vpop.f32.mrf.mxu3  ;;  %v2239_v40 = vpop.f32.mrf.mxu0  ;;  %v7334_v21 = vld [vmem:[#allocation5 + $0x254] sm:$0xf0]  ;;  %v6350_v7 = vor.u32 %v7430_v49, %v6349_v39 }
 0x1ee   :  { %v2240_v20 = vadd.f32 %v2239_v40, %v2191_v62  ;;  %v2288_v34 = vpop.f32.mrf.mxu1  ;;  %v5966_v62 = vor.u32 %v7334_v21, %v5965_v29 }
 0x1ef   :  { %v8276_v47 = vadd.f32 %v2383_v4, %v2335_v12  ;;  %2759 = vmatpush.bf16.msra.mxu3 %v6350_v7  ;;  %v9148_v7 = vld [vmem:[#allocation47_spill] sm:$0xff] }
 0x1f0   :  { %v2289_v17 = vadd.f32 %v2288_v34, %v2240_v20  ;;  %2434 = vmatmul.bf16.gmra.mxu0 %v9144_v30 }
 0x1f1   :  { %2483 = vmatmul.bf16.gmra.mxu1 %v9145_v18  ;;  %2532 = vmatmul.bf16.gmra.mxu2 %v9146_v8  ;;  %v6094_v18 = vor.u32 %v7366_v55, %v6093_v5  ;;  %v2198_v5 = vadd.f32 %v8195_v31, %v8234_v22  ;;  %v2201_v31 = vadd.f32 %v8204_v38, %v8234_v22  ;;  %v5933_v38 = vld [vmem:[#allocation5 + $0x208] sm:$0xf] }
 0x1f2   :  { %2581 = vmatmul.bf16.gmra.mxu3 %v7951_v13  ;;  %2612 = vmatpush.bf16.msra.mxu0 %v5966_v62  ;;  %v9147_v62 = vld [vmem:[#allocation46_spill] sm:$0xff] }
 0x1f3   :  { %2661 = vmatpush.bf16.msra.mxu1 %v6094_v18  ;;  %v6205_v18 = vld [vmem:[#allocation5 + $0x428] sm:$0xf] }
 0x1f4   :  { %v2337_v24 = vpop.f32.mrf.mxu2 }
 0x1f5   :  { %v2338_v12 = vadd.f32 %v2337_v24, %v2289_v17  ;;  %v2386_v4 = vpop.f32.mrf.mxu3  ;;  %v2241_v40 = vpop.f32.mrf.mxu0 }
 0x1f6   :  { %v2242_v20 = vadd.f32 %v2241_v40, %v2193_v59  ;;  %v2290_v34 = vpop.f32.mrf.mxu1 }
 0x1f7   :  { %v8284_v13 = vadd.f32 %v2386_v4, %v2338_v12  ;;  %v9149_v12 = vld [vmem:[#allocation27_spill] sm:$0xff]  ;;  %v7394_v4 = vld [vmem:[#allocation5 + $0x434] sm:$0xf0] }
 0x1f8   :  { %v2291_v8 = vadd.f32 %v2290_v34, %v2242_v20  ;;  %v6206_v40 = vor.u32 %v7394_v4, %v6205_v18  ;;  %v6333_v20 = vld [vmem:[#allocation5 + $0x528] sm:$0xf]  ;;  %v7426_v34 = vld [vmem:[#allocation5 + $0x534] sm:$0xf0] }
 0x1f9   :  { %v6077_v18 = vld [vmem:[#allocation5 + $0x328] sm:$0xf]  ;;  %v7362_v4 = vld [vmem:[#allocation5 + $0x334] sm:$0xf0] }
 0x1fa   :  { %2711 = vmatpush.bf16.msra.mxu2 %v6206_v40 }
 0x1fc   :  { %v2339_v29 = vpop.f32.mrf.mxu2 }
 0x1fd   :  { %v2340_v21 = vadd.f32 %v2339_v29, %v2291_v8  ;;  %v2388_v17 = vpop.f32.mrf.mxu3  ;;  %v2244_v39 = vpop.f32.mrf.mxu0  ;;  %v7330_v8 = vld [vmem:[#allocation5 + $0x234] sm:$0xf0]  ;;  %v6334_v29 = vor.u32 %v7426_v34, %v6333_v20 }
 0x1fe   :  { %v2245_v49 = vadd.f32 %v2244_v39, %v2196_v37  ;;  %v2293_v60 = vpop.f32.mrf.mxu1  ;;  %v5950_v37 = vor.u32 %v7330_v8, %v5949_v2 }
 0x1ff   :  { %v8288_v59 = vadd.f32 %v2388_v17, %v2340_v21  ;;  %2760 = vmatpush.bf16.msra.mxu3 %v6334_v29  ;;  %v9151_v29 = vld [vmem:[#allocation49_spill] sm:$0xff] }
 0x200   :  { %v2294_v24 = vadd.f32 %v2293_v60, %v2245_v49  ;;  %2439 = vmatmul.bf16.gmra.mxu0 %v9147_v62 }
 0x201   :  { %2488 = vmatmul.bf16.gmra.mxu1 %v9148_v7  ;;  %2537 = vmatmul.bf16.gmra.mxu2 %v9149_v12  ;;  %v6078_v7 = vor.u32 %v7362_v4, %v6077_v18  ;;  %v2203_v18 = vadd.f32 %v8207_v28, %v8234_v22  ;;  %v2206_v28 = vadd.f32 %v8216_v63, %v8234_v22  ;;  %v6557_v63 = vld [vmem:[#allocation5 + $0x6e8] sm:$0xf] }
 0x202   :  { %2586 = vmatmul.bf16.gmra.mxu3 %v7963_v41  ;;  %2613 = vmatpush.bf16.msra.mxu0 %v5950_v37  ;;  %v9150_v37 = vld [vmem:[#allocation48_spill] sm:$0xff] }
 0x203   :  { %2662 = vmatpush.bf16.msra.mxu1 %v6078_v7  ;;  %v6189_v7 = vld [vmem:[#allocation5 + $0x408] sm:$0xf] }
 0x204   :  { %v2342_v55 = vpop.f32.mrf.mxu2 }
 0x205   :  { %v2343_v21 = vadd.f32 %v2342_v55, %v2294_v24  ;;  %v2391_v17 = vpop.f32.mrf.mxu3  ;;  %v2246_v39 = vpop.f32.mrf.mxu0 }
 0x206   :  { %v2247_v49 = vadd.f32 %v2246_v39, %v2198_v5  ;;  %v2295_v60 = vpop.f32.mrf.mxu1 }
 0x207   :  { %v8296_v41 = vadd.f32 %v2391_v17, %v2343_v21  ;;  %v9152_v21 = vld [vmem:[#allocation29_spill] sm:$0xff] }
 0x208   :  { %v2296_v12 = vadd.f32 %v2295_v60, %v2247_v49  ;;  %v7390_v17 = vld [vmem:[#allocation5 + $0x414] sm:$0xf0]  ;;  %v6317_v49 = vld [vmem:[#allocation5 + $0x508] sm:$0xf] }
 0x209   :  { %v6190_v39 = vor.u32 %v7390_v17, %v6189_v7  ;;  %v7422_v60 = vld [vmem:[#allocation5 + $0x514] sm:$0xf0]  ;;  %v6061_v7 = vld [vmem:[#allocation5 + $0x308] sm:$0xf] }
 0x20a   :  { %v7358_v17 = vld [vmem:[#allocation5 + $0x314] sm:$0xf0] }
 0x20b   :  { %2712 = vmatpush.bf16.msra.mxu2 %v6190_v39 }
 0x20c   :  { %v2344_v2 = vpop.f32.mrf.mxu2 }
 0x20d   :  { %v2345_v8 = vadd.f32 %v2344_v2, %v2296_v12  ;;  %v2393_v24 = vpop.f32.mrf.mxu3  ;;  %v2249_v20 = vpop.f32.mrf.mxu0  ;;  %v7326_v12 = vld [vmem:[#allocation5 + $0x214] sm:$0xf0]  ;;  %v6318_v2 = vor.u32 %v7422_v60, %v6317_v49 }
 0x20e   :  { %v2250_v34 = vadd.f32 %v2249_v20, %v2201_v31  ;;  %v2298_v40 = vpop.f32.mrf.mxu1  ;;  %v5934_v31 = vor.u32 %v7326_v12, %v5933_v38 }
 0x20f   :  { %v8300_v5 = vadd.f32 %v2393_v24, %v2345_v8  ;;  %2761 = vmatpush.bf16.msra.mxu3 %v6318_v2  ;;  %v9154_v2 = vld [vmem:[#allocation52_spill] sm:$0xff] }
 0x210   :  { %v2299_v55 = vadd.f32 %v2298_v40, %v2250_v34  ;;  %2444 = vmatmul.bf16.gmra.mxu0 %v9150_v37 }
 0x211   :  { %2493 = vmatmul.bf16.gmra.mxu1 %v9151_v29  ;;  %2542 = vmatmul.bf16.gmra.mxu2 %v9152_v21  ;;  %v6062_v29 = vor.u32 %v7358_v17, %v6061_v7  ;;  %v2208_v7 = vadd.f32 %v8219_v1, %v8234_v22  ;;  %v2211_v1 = vadd.f32 %v8228_v23, %v8234_v22  ;;  %v6541_v23 = vld [vmem:[#allocation5 + $0x6c8] sm:$0xf] }
 0x212   :  { %2591 = vmatmul.bf16.gmra.mxu3 %v7975_v9  ;;  %2614 = vmatpush.bf16.msra.mxu0 %v5934_v31  ;;  %v9153_v31 = vld [vmem:[#allocation51_spill] sm:$0xff] }
 0x213   :  { %2663 = vmatpush.bf16.msra.mxu1 %v6062_v29  ;;  %v7320_v29 = vld [vmem:[#allocation5 + $0x1ec] sm:$0xf] }
 0x214   :  { %v2347_v4 = vpop.f32.mrf.mxu2 }
 0x215   :  { %v2348_v8 = vadd.f32 %v2347_v4, %v2299_v55  ;;  %v2396_v24 = vpop.f32.mrf.mxu3  ;;  %v2251_v20 = vpop.f32.mrf.mxu0 }
 0x216   :  { %v2252_v34 = vadd.f32 %v2251_v20, %v2203_v18  ;;  %v2300_v40 = vpop.f32.mrf.mxu1 }
 0x217   :  { %v8308_v9 = vadd.f32 %v2396_v24, %v2348_v8  ;;  %v9155_v8 = vld [vmem:[#allocation31_spill] sm:$0xff]  ;;  %v5919_v24 = vld [vmem:[#allocation5 + $0x1f8] sm:$0xf0] }
 0x218   :  { %v2301_v21 = vadd.f32 %v2300_v40, %v2252_v34  ;;  %v5922_v20 = vor.u32 %v7320_v29, %v5919_v24  ;;  %v7352_v34 = vld [vmem:[#allocation5 + $0x2ec] sm:$0xf]  ;;  %v6047_v40 = vld [vmem:[#allocation5 + $0x2f8] sm:$0xf0] }
 0x219   :  { %v7288_v29 = vld [vmem:[#allocation5 + $0xec] sm:$0xf]  ;;  %v5791_v24 = vld [vmem:[#allocation5 + $0xf8] sm:$0xf0] }
 0x21a   :  { %2901 = vmatpush.bf16.msrb.mxu2 %v5922_v20 }
 0x21c   :  { %v2349_v38 = vpop.f32.mrf.mxu2 }
 0x21d   :  { %v2350_v12 = vadd.f32 %v2349_v38, %v2301_v21  ;;  %v2398_v55 = vpop.f32.mrf.mxu3  ;;  %v2254_v49 = vpop.f32.mrf.mxu0  ;;  %v7482_v21 = vld [vmem:[#allocation5 + $0x6f4] sm:$0xf0]  ;;  %v6050_v38 = vor.u32 %v7352_v34, %v6047_v40 }
 0x21e   :  { %v2255_v60 = vadd.f32 %v2254_v49, %v2206_v28  ;;  %v2303_v39 = vpop.f32.mrf.mxu1  ;;  %v6558_v28 = vor.u32 %v7482_v21, %v6557_v63 }
 0x21f   :  { %v8312_v18 = vadd.f32 %v2398_v55, %v2350_v12  ;;  %2950 = vmatpush.bf16.msrb.mxu3 %v6050_v38  ;;  %v9157_v38 = vld [vmem:[#allocation55_spill] sm:$0xff] }
 0x220   :  { %v2304_v4 = vadd.f32 %v2303_v39, %v2255_v60  ;;  %2449 = vmatmul.bf16.gmra.mxu0 %v9153_v31 }
 0x221   :  { %2498 = vmatmul.bf16.gmra.mxu1 %v9154_v2  ;;  %2547 = vmatmul.bf16.gmra.mxu2 %v9155_v8  ;;  %v5794_v2 = vor.u32 %v7288_v29, %v5791_v24  ;;  %v2213_v29 = vadd.f32 %v8238_v44, %v8234_v22 }
 0x222   :  { %2596 = vmatmul.bf16.gmra.mxu3 %v7987_v45  ;;  %2803 = vmatpush.bf16.msrb.mxu0 %v6558_v28  ;;  %v9156_v28 = vld [vmem:[#allocation54_spill] sm:$0xff] }
 0x223   :  { %2852 = vmatpush.bf16.msrb.mxu1 %v5794_v2  ;;  %v7316_v2 = vld [vmem:[#allocation5 + $0x1cc] sm:$0xf] }
 0x224   :  { %v2352_v17 = vpop.f32.mrf.mxu2 }
 0x225   :  { %v2353_v12 = vadd.f32 %v2352_v17, %v2304_v4  ;;  %v2401_v55 = vpop.f32.mrf.mxu3  ;;  %v2256_v49 = vpop.f32.mrf.mxu0 }
 0x226   :  { %v2257_v60 = vadd.f32 %v2256_v49, %v2208_v7  ;;  %v2305_v39 = vpop.f32.mrf.mxu1 }
 0x227   :  { %v8320_v45 = vadd.f32 %v2401_v55, %v2353_v12  ;;  %v9158_v12 = vld [vmem:[#allocation34_spill] sm:$0xff]  ;;  %v5903_v55 = vld [vmem:[#allocation5 + $0x1d8] sm:$0xf0] }
 0x228   :  { %v2306_v8 = vadd.f32 %v2305_v39, %v2257_v60  ;;  %v5906_v49 = vor.u32 %v7316_v2, %v5903_v55  ;;  %v7348_v60 = vld [vmem:[#allocation5 + $0x2cc] sm:$0xf]  ;;  %v6031_v39 = vld [vmem:[#allocation5 + $0x2d8] sm:$0xf0] }
 0x229   :  { %v7284_v2 = vld [vmem:[#allocation5 + $0xcc] sm:$0xf]  ;;  %v5775_v55 = vld [vmem:[#allocation5 + $0xd8] sm:$0xf0] }
 0x22a   :  { %2902 = vmatpush.bf16.msrb.mxu2 %v5906_v49 }
 0x22c   :  { %v2354_v63 = vpop.f32.mrf.mxu2 }
 0x22d   :  { %v2355_v21 = vadd.f32 %v2354_v63, %v2306_v8  ;;  %v2403_v4 = vpop.f32.mrf.mxu3  ;;  %v2259_v34 = vpop.f32.mrf.mxu0  ;;  %v7478_v8 = vld [vmem:[#allocation5 + $0x6d4] sm:$0xf0]  ;;  %v6034_v63 = vor.u32 %v7348_v60, %v6031_v39  ;;  %v8341_v39 = vperm.slane %v8231_v32, 2 }
 0x22e   :  { %v2260_v40 = vadd.f32 %v2259_v34, %v2211_v1  ;;  %v2308_v20 = vpop.f32.mrf.mxu1  ;;  %v6542_v1 = vor.u32 %v7478_v8, %v6541_v23 }
 0x22f   :  { %v8324_v7 = vadd.f32 %v2403_v4, %v2355_v21  ;;  %2951 = vmatpush.bf16.msrb.mxu3 %v6034_v63 }
 0x230   :  { %v2309_v17 = vadd.f32 %v2308_v20, %v2260_v40  ;;  %2454 = vmatmul.bf16.gmra.mxu0 %v9156_v28 }
 0x231   :  { %2503 = vmatmul.bf16.gmra.mxu1 %v9157_v38  ;;  %2552 = vmatmul.bf16.gmra.mxu2 %v9158_v12  ;;  %v5778_v38 = vor.u32 %v7284_v2, %v5775_v55 }
 0x232   :  { %2601 = vmatmul.bf16.gmra.mxu3 %v9129_v58  ;;  %2804 = vmatpush.bf16.msrb.mxu0 %v6542_v1 }
 0x233   :  { %2853 = vmatpush.bf16.msrb.mxu1 %v5778_v38  ;;  %v5887_v38 = vld [vmem:[#allocation5 + $0x1b8] sm:$0xf0] }
 0x234   :  { %v2357_v24 = vpop.f32.mrf.mxu2 }
 0x235   :  { %v2358_v21 = vadd.f32 %v2357_v24, %v2309_v17  ;;  %v2406_v4 = vpop.f32.mrf.mxu3  ;;  %v2261_v34 = vpop.f32.mrf.mxu0  ;;  %v7344_v24 = vld [vmem:[#allocation5 + $0x2ac] sm:$0xf] }
 0x236   :  { %v2262_v40 = vadd.f32 %v2261_v34, %v2213_v29  ;;  %v2310_v20 = vpop.f32.mrf.mxu1  ;;  %v6525_v29 = vld [vmem:[#allocation5 + $0x6a8] sm:$0xf] }
 0x237   :  { %v8332_v58 = vadd.f32 %v2406_v4, %v2358_v21  ;;  %v6015_v21 = vld [vmem:[#allocation5 + $0x2b8] sm:$0xf0] }
 0x238   :  { %v2311_v12 = vadd.f32 %v2310_v20, %v2262_v40  ;;  %v6018_v20 = vor.u32 %v7344_v24, %v6015_v21 }
 0x23a   :  { %2952 = vmatpush.bf16.msrb.mxu3 %v6018_v20  ;;  %v7470_v20 = vld [vmem:[#allocation5 + $0x694] sm:$0xf0] }
 0x23c   :  { %v2359_v28 = vpop.f32.mrf.mxu2 }
 0x23d   :  { %v2360_v22 = vadd.f32 %v2359_v28, %v2311_v12  ;;  %v2408_v44 = vpop.f32.mrf.mxu3  ;;  %v2420_v23 = vpop.f32.mrf.mxu0  ;;  %v7312_v28 = vld [vmem:[#allocation5 + $0x1ac] sm:$0xf] }
 0x23e   :  { %v2421_v17 = vadd.f32 %v2420_v23, %v8248_v53  ;;  %v2469_v8 = vpop.f32.mrf.mxu1  ;;  %v5890_v12 = vor.u32 %v7312_v28, %v5887_v38  ;;  %v7474_v53 = vld [vmem:[#allocation5 + $0x6b4] sm:$0xf0] }
 0x23f   :  { %v8335_v60 = vadd.f32 %v2408_v44, %v2360_v22  ;;  %v6526_v63 = vor.u32 %v7474_v53, %v6525_v29  ;;  %v7280_v22 = vld [vmem:[#allocation5 + $0xac] sm:$0xf]  ;;  %v5759_v44 = vld [vmem:[#allocation5 + $0xb8] sm:$0xf0] }
 0x240   :  { %v2470_v49 = vadd.f32 %v2469_v8, %v2421_v17  ;;  %2615 = vmatmul.bf16.vlgmr.msra.gmra.mxu0 %v7917_v54  ;;  %2903 = vmatpush.bf16.msrb.mxu2 %v5890_v12  ;;  %v5762_v17 = vor.u32 %v7280_v22, %v5759_v44  ;;  %v5999_v22 = vld [vmem:[#allocation5 + $0x298] sm:$0xf0] }
 0x241   :  { %2664 = vmatmul.bf16.vlgmr.msra.gmra.mxu1 %v7919_v57  ;;  %2713 = vmatmul.bf16.vlgmr.msra.gmra.mxu2 %v8011_v0 }
 0x242   :  { %2762 = vmatmul.bf16.vlgmr.msra.gmra.mxu3 %v9134_v61  ;;  %2805 = vmatpush.bf16.msrb.mxu0 %v6526_v63  ;;  %v3196_v8 = vmax.f32 %v2470_v49, 0.0  ;;  %v7308_v49 = vld [vmem:[#allocation5 + $0x18c] sm:$0xf] }
 0x243   :  { %2854 = vmatpush.bf16.msrb.mxu1 %v5762_v17 }
 0x244   :  { %v2518_v1 = vpop.f32.mrf.mxu2 }
 0x245   :  { %v2519_v4 = vadd.f32 %v2518_v1, %v8341_v39  ;;  %v2567_v34 = vpop.f32.mrf.mxu3  ;;  %v2422_v40 = vpop.f32.mrf.mxu0 }
 0x246   :  { %v2423_v32 = vadd.f32 %v2422_v40, %v8252_v48  ;;  %v2471_v2 = vpop.f32.mrf.mxu1  ;;  %v6509_v40 = vld [vmem:[#allocation5 + $0x688] sm:$0xf] }
 0x247   :  { %v8346_v55 = vadd.f32 %v2567_v34, %v2519_v4  ;;  %v5871_v4 = vld [vmem:[#allocation5 + $0x198] sm:$0xf0] }
 0x248   :  { %v2472_v23 = vadd.f32 %v2471_v2, %v2423_v32  ;;  %v5874_v34 = vor.u32 %v7308_v49, %v5871_v4  ;;  %v7340_v32 = vld [vmem:[#allocation5 + $0x28c] sm:$0xf] }
 0x24a   :  { %v3200_v28 = vmax.f32 %v2472_v23, 0.0  ;;  %2904 = vmatpush.bf16.msrb.mxu2 %v5874_v34 }
 0x24c   :  { %v8348_v38 = vpack.c.bf16 %v3200_v28, %v3196_v8  ;;  %v2520_v29 = vpop.f32.mrf.mxu2  ;;  %v6002_v8 = vor.u32 %v7340_v32, %v5999_v22 }
 0x24d   :  { %v2521_v12 = vadd.f32 %v2520_v29, %v8341_v39  ;;  %v2569_v53 = vpop.f32.mrf.mxu3  ;;  %v2425_v24 = vpop.f32.mrf.mxu0 }
 0x24e   :  { %9159 = vst [vmem:[#allocation40_spill] sm:$0xff] %v8348_v38  ;;  %v2426_v48 = vadd.f32 %v2425_v24, %v8260_v25  ;;  %v2474_v1 = vpop.f32.mrf.mxu1  ;;  %v6510_v25 = vor.u32 %v7470_v20, %v6509_v40  ;;  %2953 = vmatpush.bf16.msrb.mxu3 %v6002_v8  ;;  %v5743_v24 = vld [vmem:[#allocation5 + $0x98] sm:$0xf0]  ;;  %v6493_v8 = vld [vmem:[#allocation5 + $0x668] sm:$0xf] }
 0x24f   :  { %v8352_v63 = vadd.f32 %v2569_v53, %v2521_v12  ;;  %v7276_v53 = vld [vmem:[#allocation5 + $0x8c] sm:$0xf] }
 0x250   :  { %v2475_v21 = vadd.f32 %v2474_v1, %v2426_v48  ;;  %2620 = vmatmul.bf16.gmra.mxu0 %v7929_v26  ;;  %v5746_v1 = vor.u32 %v7276_v53, %v5743_v24  ;;  %v5983_v24 = vld [vmem:[#allocation5 + $0x278] sm:$0xf0] }
 0x251   :  { %2669 = vmatmul.bf16.gmra.mxu1 %v7931_v27  ;;  %2718 = vmatmul.bf16.gmra.mxu2 %v8025_v6 }
 0x252   :  { %2767 = vmatmul.bf16.gmra.mxu3 %v9138_v36  ;;  %2806 = vmatpush.bf16.msrb.mxu0 %v6510_v25  ;;  %v3204_v49 = vmax.f32 %v2475_v21, 0.0  ;;  %v7304_v21 = vld [vmem:[#allocation5 + $0x16c] sm:$0xf] }
 0x253   :  { %2855 = vmatpush.bf16.msrb.mxu1 %v5746_v1 }
 0x254   :  { %v2523_v2 = vpop.f32.mrf.mxu2 }
 0x255   :  { %v2524_v44 = vadd.f32 %v2523_v2, %v8341_v39  ;;  %v2572_v23 = vpop.f32.mrf.mxu3  ;;  %v2427_v17 = vpop.f32.mrf.mxu0 }
 0x256   :  { %v2428_v28 = vadd.f32 %v2427_v17, %v8264_v3  ;;  %v2476_v29 = vpop.f32.mrf.mxu1 }
 0x257   :  { %v8360_v12 = vadd.f32 %v2572_v23, %v2524_v44  ;;  %v5855_v23 = vld [vmem:[#allocation5 + $0x178] sm:$0xf0] }
 0x258   :  { %v2477_v48 = vadd.f32 %v2476_v29, %v2428_v28  ;;  %v5858_v17 = vor.u32 %v7304_v21, %v5855_v23  ;;  %v7466_v28 = vld [vmem:[#allocation5 + $0x674] sm:$0xf0]  ;;  %v7336_v29 = vld [vmem:[#allocation5 + $0x26c] sm:$0xf] }
 0x25a   :  { %v3208_v4 = vmax.f32 %v2477_v48, 0.0  ;;  %2905 = vmatpush.bf16.msrb.mxu2 %v5858_v17 }
 0x25c   :  { %v8362_v40 = vpack.c.bf16 %v3208_v4, %v3204_v49  ;;  %v2525_v20 = vpop.f32.mrf.mxu2  ;;  %v5986_v4 = vor.u32 %v7336_v29, %v5983_v24 }
 0x25d   :  { %v2526_v34 = vadd.f32 %v2525_v20, %v8341_v39  ;;  %v2574_v32 = vpop.f32.mrf.mxu3  ;;  %v2430_v2 = vpop.f32.mrf.mxu0 }
 0x25e   :  { %9160 = vst [vmem:[#allocation42_spill] sm:$0xff] %v8362_v40  ;;  %v2431_v3 = vadd.f32 %v2430_v2, %v8272_v50  ;;  %v2479_v25 = vpop.f32.mrf.mxu1  ;;  %v6494_v50 = vor.u32 %v7466_v28, %v6493_v8  ;;  %2954 = vmatpush.bf16.msrb.mxu3 %v5986_v4  ;;  %v7272_v2 = vld [vmem:[#allocation5 + $0x6c] sm:$0xf] }
 0x25f   :  { %v8366_v22 = vadd.f32 %v2574_v32, %v2526_v34 }
 0x260   :  { %v2480_v44 = vadd.f32 %v2479_v25, %v2431_v3  ;;  %2625 = vmatmul.bf16.gmra.mxu0 %v7941_v51  ;;  %v5727_v3 = vld [vmem:[#allocation5 + $0x78] sm:$0xf0] }
 0x261   :  { %2674 = vmatmul.bf16.gmra.mxu1 %v7943_v52  ;;  %2723 = vmatmul.bf16.gmra.mxu2 %v8041_v35  ;;  %v5730_v21 = vor.u32 %v7272_v2, %v5727_v3  ;;  %v7332_v2 = vld [vmem:[#allocation5 + $0x24c] sm:$0xf] }
 0x262   :  { %2772 = vmatmul.bf16.gmra.mxu3 %v9141_v19  ;;  %2807 = vmatpush.bf16.msrb.mxu0 %v6494_v50  ;;  %v3212_v23 = vmax.f32 %v2480_v44, 0.0  ;;  %v7300_v44 = vld [vmem:[#allocation5 + $0x14c] sm:$0xf] }
 0x263   :  { %2856 = vmatpush.bf16.msrb.mxu1 %v5730_v21 }
 0x264   :  { %v2528_v53 = vpop.f32.mrf.mxu2 }
 0x265   :  { %v2529_v48 = vadd.f32 %v2528_v53, %v8341_v39  ;;  %v2577_v1 = vpop.f32.mrf.mxu3  ;;  %v2432_v49 = vpop.f32.mrf.mxu0 }
 0x266   :  { %v2433_v20 = vadd.f32 %v2432_v49, %v8276_v47  ;;  %v2481_v34 = vpop.f32.mrf.mxu1  ;;  %v5839_v49 = vld [vmem:[#allocation5 + $0x158] sm:$0xf0] }
 0x267   :  { %v8374_v32 = vadd.f32 %v2577_v1, %v2529_v48  ;;  %v5842_v4 = vor.u32 %v7300_v44, %v5839_v49 }
 0x268   :  { %v2482_v25 = vadd.f32 %v2481_v34, %v2433_v20  ;;  %v6477_v20 = vld [vmem:[#allocation5 + $0x648] sm:$0xf]  ;;  %v7462_v34 = vld [vmem:[#allocation5 + $0x654] sm:$0xf0] }
 0x269   :  { %2906 = vmatpush.bf16.msrb.mxu2 %v5842_v4 }
 0x26a   :  { %v3216_v8 = vmax.f32 %v2482_v25, 0.0  ;;  %v5967_v25 = vld [vmem:[#allocation5 + $0x258] sm:$0xf0] }
 0x26c   :  { %v8376_v28 = vpack.c.bf16 %v3216_v8, %v3212_v23  ;;  %v2530_v53 = vpop.f32.mrf.mxu2 }
 0x26d   :  { %v2531_v17 = vadd.f32 %v2530_v53, %v8341_v39  ;;  %v2579_v29 = vpop.f32.mrf.mxu3  ;;  %v2435_v24 = vpop.f32.mrf.mxu0  ;;  %v5970_v53 = vor.u32 %v7332_v2, %v5967_v25 }
 0x26e   :  { %9161 = vst [vmem:[#allocation44_spill] sm:$0xff] %v8376_v28  ;;  %v2436_v47 = vadd.f32 %v2435_v24, %v8284_v13  ;;  %v2484_v50 = vpop.f32.mrf.mxu1  ;;  %v6478_v13 = vor.u32 %v7462_v34, %v6477_v20 }
 0x26f   :  { %v8380_v48 = vadd.f32 %v2579_v29, %v2531_v17  ;;  %2955 = vmatpush.bf16.msrb.mxu3 %v5970_v53  ;;  %v6461_v53 = vld [vmem:[#allocation5 + $0x628] sm:$0xf] }
 0x270   :  { %v2485_v1 = vadd.f32 %v2484_v50, %v2436_v47  ;;  %2630 = vmatmul.bf16.gmra.mxu0 %v7953_v14  ;;  %v7268_v47 = vld [vmem:[#allocation5 + $0x4c] sm:$0xf]  ;;  %v5711_v50 = vld [vmem:[#allocation5 + $0x58] sm:$0xf0] }
 0x271   :  { %2679 = vmatmul.bf16.gmra.mxu1 %v7955_v15  ;;  %2728 = vmatmul.bf16.gmra.mxu2 %v8057_v16  ;;  %v5714_v49 = vor.u32 %v7268_v47, %v5711_v50  ;;  %v5951_v50 = vld [vmem:[#allocation5 + $0x238] sm:$0xf0] }
 0x272   :  { %2777 = vmatmul.bf16.gmra.mxu3 %v9144_v30  ;;  %2808 = vmatpush.bf16.msrb.mxu0 %v6478_v13  ;;  %v3220_v28 = vmax.f32 %v2485_v1, 0.0  ;;  %v5823_v1 = vld [vmem:[#allocation5 + $0x138] sm:$0xf0] }
 0x273   :  { %2857 = vmatpush.bf16.msrb.mxu1 %v5714_v49 }
 0x274   :  { %v2533_v3 = vpop.f32.mrf.mxu2 }
 0x275   :  { %v2534_v21 = vadd.f32 %v2533_v3, %v8341_v39  ;;  %v2582_v23 = vpop.f32.mrf.mxu3  ;;  %v2437_v8 = vpop.f32.mrf.mxu0 }
 0x276   :  { %v2438_v17 = vadd.f32 %v2437_v8, %v8288_v59  ;;  %v2486_v29 = vpop.f32.mrf.mxu1 }
 0x277   :  { %v8388_v24 = vadd.f32 %v2582_v23, %v2534_v21 }
 0x278   :  { %v2487_v44 = vadd.f32 %v2486_v29, %v2438_v17  ;;  %v7458_v17 = vld [vmem:[#allocation5 + $0x634] sm:$0xf0]  ;;  %v7328_v29 = vld [vmem:[#allocation5 + $0x22c] sm:$0xf] }
 0x27a   :  { %v3224_v20 = vmax.f32 %v2487_v44, 0.0 }
 0x27c   :  { %v8390_v34 = vpack.c.bf16 %v3224_v20, %v3220_v28  ;;  %v2535_v3 = vpop.f32.mrf.mxu2  ;;  %v7296_v28 = vld [vmem:[#allocation5 + $0x12c] sm:$0xf] }
 0x27d   :  { %v2536_v4 = vadd.f32 %v2535_v3, %v8341_v39  ;;  %v2584_v2 = vpop.f32.mrf.mxu3  ;;  %v2440_v25 = vpop.f32.mrf.mxu0  ;;  %v5826_v8 = vor.u32 %v7296_v28, %v5823_v1  ;;  %v5954_v3 = vor.u32 %v7328_v29, %v5951_v50 }
 0x27e   :  { %9162 = vst [vmem:[#allocation46_spill] sm:$0xff] %v8390_v34  ;;  %v2441_v59 = vadd.f32 %v2440_v25, %v8296_v41  ;;  %v2489_v13 = vpop.f32.mrf.mxu1  ;;  %v6462_v41 = vor.u32 %v7458_v17, %v6461_v53 }
 0x27f   :  { %v8394_v21 = vadd.f32 %v2584_v2, %v2536_v4  ;;  %2907 = vmatpush.bf16.msrb.mxu2 %v5826_v8  ;;  %2956 = vmatpush.bf16.msrb.mxu3 %v5954_v3  ;;  %v6445_v3 = vld [vmem:[#allocation5 + $0x608] sm:$0xf] }
 0x280   :  { %v2490_v23 = vadd.f32 %v2489_v13, %v2441_v59  ;;  %2635 = vmatmul.bf16.gmra.mxu0 %v7965_v42  ;;  %v7264_v59 = vld [vmem:[#allocation5 + $0x2c] sm:$0xf]  ;;  %v5695_v13 = vld [vmem:[#allocation5 + $0x38] sm:$0xf0] }
 0x281   :  { %2684 = vmatmul.bf16.gmra.mxu1 %v7967_v43  ;;  %2733 = vmatmul.bf16.gmra.mxu2 %v8073_v56  ;;  %v5698_v1 = vor.u32 %v7264_v59, %v5695_v13  ;;  %v5935_v13 = vld [vmem:[#allocation5 + $0x218] sm:$0xf0] }
 0x282   :  { %2782 = vmatmul.bf16.gmra.mxu3 %v9147_v62  ;;  %2809 = vmatpush.bf16.msrb.mxu0 %v6462_v41  ;;  %v3228_v34 = vmax.f32 %v2490_v23, 0.0  ;;  %v5807_v23 = vld [vmem:[#allocation5 + $0x118] sm:$0xf0] }
 0x283   :  { %2858 = vmatpush.bf16.msrb.mxu1 %v5698_v1 }
 0x284   :  { %v2538_v47 = vpop.f32.mrf.mxu2 }
 0x285   :  { %v2539_v44 = vadd.f32 %v2538_v47, %v8341_v39  ;;  %v2587_v49 = vpop.f32.mrf.mxu3  ;;  %v2442_v20 = vpop.f32.mrf.mxu0 }
 0x286   :  { %v2443_v4 = vadd.f32 %v2442_v20, %v8300_v5  ;;  %v2491_v2 = vpop.f32.mrf.mxu1 }
 0x287   :  { %v8402_v25 = vadd.f32 %v2587_v49, %v2539_v44 }
 0x288   :  { %v2492_v28 = vadd.f32 %v2491_v2, %v2443_v4  ;;  %v7454_v4 = vld [vmem:[#allocation5 + $0x614] sm:$0xf0]  ;;  %v7324_v2 = vld [vmem:[#allocation5 + $0x20c] sm:$0xf] }
 0x28a   :  { %v3232_v53 = vmax.f32 %v2492_v28, 0.0 }
 0x28c   :  { %v8404_v17 = vpack.c.bf16 %v3232_v53, %v3228_v34  ;;  %v2540_v47 = vpop.f32.mrf.mxu2  ;;  %v7292_v34 = vld [vmem:[#allocation5 + $0x10c] sm:$0xf] }
 0x28d   :  { %v2541_v8 = vadd.f32 %v2540_v47, %v8341_v39  ;;  %v2589_v29 = vpop.f32.mrf.mxu3  ;;  %v2445_v50 = vpop.f32.mrf.mxu0  ;;  %v5810_v20 = vor.u32 %v7292_v34, %v5807_v23  ;;  %v5938_v47 = vor.u32 %v7324_v2, %v5935_v13 }
 0x28e   :  { %9163 = vst [vmem:[#allocation48_spill] sm:$0xff] %v8404_v17  ;;  %v2446_v5 = vadd.f32 %v2445_v50, %v8308_v9  ;;  %v2494_v41 = vpop.f32.mrf.mxu1  ;;  %v6446_v9 = vor.u32 %v7454_v4, %v6445_v3 }
 0x28f   :  { %v8408_v44 = vadd.f32 %v2589_v29, %v2541_v8  ;;  %2908 = vmatpush.bf16.msrb.mxu2 %v5810_v20  ;;  %2957 = vmatpush.bf16.msrb.mxu3 %v5938_v47  ;;  %v6431_v47 = vld [vmem:[#allocation5 + $0x5f8] sm:$0xf0] }
 0x290   :  { %v2495_v49 = vadd.f32 %v2494_v41, %v2446_v5  ;;  %2640 = vmatmul.bf16.gmra.mxu0 %v7977_v10  ;;  %v7260_v5 = vld [vmem:[#allocation5 + $0xc] sm:$0xf]  ;;  %v5679_v41 = vld [vmem:[#allocation5 + $0x18] sm:$0xf0] }
 0x291   :  { %2689 = vmatmul.bf16.gmra.mxu1 %v7979_v11  ;;  %2738 = vmatmul.bf16.gmra.mxu2 %v8089_v33  ;;  %v5682_v23 = vor.u32 %v7260_v5, %v5679_v41  ;;  %v6175_v5 = vld [vmem:[#allocation5 + $0x3f8] sm:$0xf0]  ;;  %v7480_v41 = vld [vmem:[#allocation5 + $0x6ec] sm:$0xf] }
 0x292   :  { %2787 = vmatmul.bf16.gmra.mxu3 %v9150_v37  ;;  %2810 = vmatpush.bf16.msrb.mxu0 %v6446_v9  ;;  %v3236_v17 = vmax.f32 %v2495_v49, 0.0  ;;  %v9166_v49 = vld [vmem:[#allocation50_spill] sm:$0xff] }
 0x293   :  { %2859 = vmatpush.bf16.msrb.mxu1 %v5682_v23  ;;  %v6559_v23 = vld [vmem:[#allocation5 + $0x6f8] sm:$0xf0] }
 0x294   :  { %v2543_v59 = vpop.f32.mrf.mxu2 }
 0x295   :  { %v2544_v28 = vadd.f32 %v2543_v59, %v8341_v39  ;;  %v2592_v1 = vpop.f32.mrf.mxu3  ;;  %v2447_v53 = vpop.f32.mrf.mxu0 }
 0x296   :  { %v2448_v8 = vadd.f32 %v2447_v53, %v8312_v18  ;;  %v2496_v29 = vpop.f32.mrf.mxu1  ;;  %v9165_v53 = vld [vmem:[#allocation33_spill] sm:$0xff] }
 0x297   :  { %v8416_v50 = vadd.f32 %v2592_v1, %v2544_v28 }
 0x298   :  { %v2497_v34 = vadd.f32 %v2496_v29, %v2448_v8  ;;  %v7384_v29 = vld [vmem:[#allocation5 + $0x3ec] sm:$0xf] }
 0x29a   :  { %v3240_v3 = vmax.f32 %v2497_v34, 0.0 }
 0x29c   :  { %v8418_v4 = vpack.c.bf16 %v3240_v3, %v3236_v17  ;;  %v2545_v59 = vpop.f32.mrf.mxu2  ;;  %v7448_v17 = vld [vmem:[#allocation5 + $0x5ec] sm:$0xf] }
 0x29d   :  { %v2546_v20 = vadd.f32 %v2545_v59, %v8341_v39  ;;  %v2594_v2 = vpop.f32.mrf.mxu3  ;;  %v2450_v13 = vpop.f32.mrf.mxu0  ;;  %v6434_v8 = vor.u32 %v7448_v17, %v6431_v47  ;;  %v7416_v17 = vld [vmem:[#allocation5 + $0x4ec] sm:$0xf]  ;;  %v6303_v47 = vld [vmem:[#allocation5 + $0x4f8] sm:$0xf0] }
 0x29e   :  { %9164 = vst [vmem:[#allocation63_spill] sm:$0xff] %v8418_v4  ;;  %v2451_v18 = vadd.f32 %v2450_v13, %v8320_v45  ;;  %v2499_v9 = vpop.f32.mrf.mxu1  ;;  %v6178_v45 = vor.u32 %v7384_v29, %v6175_v5  ;;  %v6306_v40 = vor.u32 %v7416_v17, %v6303_v47  ;;  %v6159_v17 = vld [vmem:[#allocation5 + $0x3d8] sm:$0xf0]  ;;  %v7476_v47 = vld [vmem:[#allocation5 + $0x6cc] sm:$0xf] }
 0x29f   :  { %v8422_v28 = vadd.f32 %v2594_v2, %v2546_v20  ;;  %3097 = vmatpush.bf16.msra.mxu2 %v6434_v8  ;;  %v6562_v2 = vor.u32 %v7480_v41, %v6559_v23 }
 0x2a0   :  { %v2500_v1 = vadd.f32 %v2499_v9, %v2451_v18  ;;  %2645 = vmatmul.bf16.gmra.mxu0 %v7989_v46  ;;  %3048 = vmatpush.bf16.msra.mxu1 %v6306_v40  ;;  %v9171_v40 = vld [vmem:[#allocation54_spill] sm:$0xff] }
 0x2a1   :  { %2694 = vmatmul.bf16.gmra.mxu1 %v9165_v53  ;;  %2743 = vmatmul.bf16.gmra.mxu2 %v9166_v49 }
 0x2a2   :  { %2792 = vmatmul.bf16.gmra.mxu3 %v9153_v31  ;;  %2999 = vmatpush.bf16.msra.mxu0 %v6178_v45  ;;  %v3244_v38 = vmax.f32 %v2500_v1, 0.0  ;;  %v9170_v1 = vld [vmem:[#allocation53_spill] sm:$0xff] }
 0x2a3   :  { %3146 = vmatpush.bf16.msra.mxu3 %v6562_v2  ;;  %v9169_v2 = vld [vmem:[#allocation37_spill] sm:$0xff] }
 0x2a4   :  { %v2548_v34 = vpop.f32.mrf.mxu2 }
 0x2a5   :  { %v2549_v3 = vadd.f32 %v2548_v34, %v8341_v39  ;;  %v2597_v59 = vpop.f32.mrf.mxu3  ;;  %v2452_v20 = vpop.f32.mrf.mxu0 }
 0x2a6   :  { %v2453_v13 = vadd.f32 %v2452_v20, %v8324_v7  ;;  %v2501_v18 = vpop.f32.mrf.mxu1  ;;  %v9168_v20 = vld [vmem:[#allocation36_spill] sm:$0xff] }
 0x2a7   :  { %v8430_v9 = vadd.f32 %v2597_v59, %v2549_v3 }
 0x2a8   :  { %v2502_v4 = vadd.f32 %v2501_v18, %v2453_v13  ;;  %v7380_v18 = vld [vmem:[#allocation5 + $0x3cc] sm:$0xf] }
 0x2aa   :  { %v3248_v29 = vmax.f32 %v2502_v4, 0.0  ;;  %v6415_v4 = vld [vmem:[#allocation5 + $0x5d8] sm:$0xf0] }
 0x2ac   :  { %v8432_v5 = vpack.c.bf16 %v3248_v29, %v3244_v38  ;;  %v2550_v34 = vpop.f32.mrf.mxu2  ;;  %v7444_v38 = vld [vmem:[#allocation5 + $0x5cc] sm:$0xf] }
 0x2ad   :  { %v2551_v8 = vadd.f32 %v2550_v34, %v8341_v39  ;;  %v2599_v41 = vpop.f32.mrf.mxu3  ;;  %v2455_v23 = vpop.f32.mrf.mxu0  ;;  %v6418_v13 = vor.u32 %v7444_v38, %v6415_v4  ;;  %v6543_v34 = vld [vmem:[#allocation5 + $0x6d8] sm:$0xf0]  ;;  %v7412_v38 = vld [vmem:[#allocation5 + $0x4cc] sm:$0xf] }
 0x2ae   :  { %9167 = vst [vmem:[#allocation33_spill] sm:$0xff] %v8432_v5  ;;  %v2456_v7 = vadd.f32 %v2455_v23, %v8332_v58  ;;  %v2504_v45 = vpop.f32.mrf.mxu1  ;;  %v6162_v58 = vor.u32 %v7380_v18, %v6159_v17  ;;  %v6287_v4 = vld [vmem:[#allocation5 + $0x4d8] sm:$0xf0] }
 0x2af   :  { %v8436_v3 = vadd.f32 %v2599_v41, %v2551_v8  ;;  %3098 = vmatpush.bf16.msra.mxu2 %v6418_v13 }
 0x2b0   :  { %v2505_v59 = vadd.f32 %v2504_v45, %v2456_v7  ;;  %2650 = vmatmul.bf16.gmra.mxu0 %v9168_v20  ;;  %v6546_v7 = vor.u32 %v7476_v47, %v6543_v34 }
 0x2b1   :  { %2699 = vmatmul.bf16.gmra.mxu1 %v9169_v2  ;;  %2748 = vmatmul.bf16.gmra.mxu2 %v9170_v1  ;;  %v6290_v2 = vor.u32 %v7412_v38, %v6287_v4  ;;  %v6527_v38 = vld [vmem:[#allocation5 + $0x6b8] sm:$0xf0] }
 0x2b2   :  { %2797 = vmatmul.bf16.gmra.mxu3 %v9171_v40  ;;  %3000 = vmatpush.bf16.msra.mxu0 %v6162_v58  ;;  %v3252_v31 = vmax.f32 %v2505_v59, 0.0  ;;  %v9175_v59 = vld [vmem:[#allocation20_spill] sm:$0xff] }
 0x2b3   :  { %3147 = vmatpush.bf16.msra.mxu3 %v6546_v7  ;;  %3049 = vmatpush.bf16.msra.mxu1 %v6290_v2  ;;  %v6399_v2 = vld [vmem:[#allocation5 + $0x5b8] sm:$0xf0] }
 0x2b4   :  { %v2553_v29 = vpop.f32.mrf.mxu2  ;;  %v6143_v7 = vld [vmem:[#allocation5 + $0x3b8] sm:$0xf0] }
 0x2b5   :  { %v2554_v8 = vadd.f32 %v2553_v29, %v8341_v39  ;;  %v2602_v41 = vpop.f32.mrf.mxu3  ;;  %v2457_v23 = vpop.f32.mrf.mxu0 }
 0x2b6   :  { %v2458_v45 = vadd.f32 %v2457_v23, %v8335_v60  ;;  %v2506_v5 = vpop.f32.mrf.mxu1  ;;  %v9173_v23 = vld [vmem:[#allocation39_spill] sm:$0xff] }
 0x2b7   :  { %v8444_v40 = vadd.f32 %v2602_v41, %v2554_v8 }
 0x2b8   :  { %v2507_v1 = vadd.f32 %v2506_v5, %v2458_v45  ;;  %v9174_v5 = vld [vmem:[#allocation19_spill] sm:$0xff] }
 0x2b9   :  { %v7472_v45 = vld [vmem:[#allocation5 + $0x6ac] sm:$0xf] }
 0x2ba   :  { %v3256_v18 = vmax.f32 %v2507_v1, 0.0  ;;  %v7376_v1 = vld [vmem:[#allocation5 + $0x3ac] sm:$0xf] }
 0x2bb   :  { %v6146_v4 = vor.u32 %v7376_v1, %v6143_v7 }
 0x2bc   :  { %v8446_v17 = vpack.c.bf16 %v3256_v18, %v3252_v31  ;;  %v2555_v29 = vpop.f32.mrf.mxu2  ;;  %v7440_v31 = vld [vmem:[#allocation5 + $0x5ac] sm:$0xf]  ;;  %v6530_v18 = vor.u32 %v7472_v45, %v6527_v38  ;;  %v9176_v38 = vld [vmem:[#allocation41_spill] sm:$0xff] }
 0x2bd   :  { %v2556_v13 = vadd.f32 %v2555_v29, %v8341_v39  ;;  %v2604_v47 = vpop.f32.mrf.mxu3  ;;  %v2616_v34 = vpop.f32.mrf.mxu0  ;;  %v6402_v39 = vor.u32 %v7440_v31, %v6399_v2  ;;  %3001 = vmatpush.bf16.msra.mxu0 %v6146_v4  ;;  %v9178_v4 = vld [vmem:[#allocation22_spill] sm:$0xff] }
 0x2be   :  { %9172 = vst [vmem:[#allocation50_spill] sm:$0xff] %v8446_v17  ;;  %v2617_v60 = vadd.f32 %v2616_v34, %v8346_v55  ;;  %v2665_v58 = vpop.f32.mrf.mxu1  ;;  %3148 = vmatpush.bf16.msra.mxu3 %v6530_v18  ;;  %v7436_v18 = vld [vmem:[#allocation5 + $0x58c] sm:$0xf] }
 0x2bf   :  { %v8450_v8 = vadd.f32 %v2604_v47, %v2556_v13  ;;  %3099 = vmatpush.bf16.msra.mxu2 %v6402_v39 }
 0x2c0   :  { %v2666_v41 = vadd.f32 %v2665_v58, %v2617_v60  ;;  %2811 = vmatmul.bf16.vlgmr.msrb.gmra.mxu0 %v9173_v23  ;;  %v7408_v58 = vld [vmem:[#allocation5 + $0x4ac] sm:$0xf] }
 0x2c1   :  { %2860 = vmatmul.bf16.vlgmr.msrb.gmra.mxu1 %v9174_v5  ;;  %2909 = vmatmul.bf16.vlgmr.msrb.gmra.mxu2 %v9175_v59  ;;  %v6271_v5 = vld [vmem:[#allocation5 + $0x4b8] sm:$0xf0] }
 0x2c2   :  { %2958 = vmatmul.bf16.vlgmr.msrb.gmra.mxu3 %v7917_v54  ;;  %v6274_v31 = vor.u32 %v7408_v58, %v6271_v5  ;;  %v6511_v58 = vld [vmem:[#allocation5 + $0x698] sm:$0xf0] }
 0x2c4   :  { %v2714_v55 = vpop.f32.mrf.mxu2  ;;  %3050 = vmatpush.bf16.msra.mxu1 %v6274_v31 }
 0x2c5   :  { %v2715_v29 = vadd.f32 %v2714_v55, %v2666_v41  ;;  %v2763_v13 = vpop.f32.mrf.mxu3  ;;  %v2618_v47 = vpop.f32.mrf.mxu0  ;;  %v9177_v55 = vld [vmem:[#allocation21_spill] sm:$0xff] }
 0x2c6   :  { %v2619_v34 = vadd.f32 %v2618_v47, %v8352_v63  ;;  %v2667_v60 = vpop.f32.mrf.mxu1 }
 0x2c7   :  { %v8457_v54 = vadd.f32 %v2763_v13, %v2715_v29  ;;  %v6383_v29 = vld [vmem:[#allocation5 + $0x598] sm:$0xf0]  ;;  %v7372_v13 = vld [vmem:[#allocation5 + $0x38c] sm:$0xf] }
 0x2c8   :  { %v2668_v59 = vadd.f32 %v2667_v60, %v2619_v34  ;;  %v6386_v47 = vor.u32 %v7436_v18, %v6383_v29  ;;  %v6127_v34 = vld [vmem:[#allocation5 + $0x398] sm:$0xf0]  ;;  %v7468_v60 = vld [vmem:[#allocation5 + $0x68c] sm:$0xf] }
 0x2c9   :  { %v6130_v5 = vor.u32 %v7372_v13, %v6127_v34 }
 0x2ca   :  { %3100 = vmatpush.bf16.msra.mxu2 %v6386_v47 }
 0x2cb   :  { %3002 = vmatpush.bf16.msra.mxu0 %v6130_v5  ;;  %v9181_v5 = vld [vmem:[#allocation24_spill] sm:$0xff] }
 0x2cc   :  { %v2716_v2 = vpop.f32.mrf.mxu2 }
 0x2cd   :  { %v2717_v17 = vadd.f32 %v2716_v2, %v2668_v59  ;;  %v2765_v1 = vpop.f32.mrf.mxu3  ;;  %v2621_v7 = vpop.f32.mrf.mxu0 }
 0x2ce   :  { %v2622_v41 = vadd.f32 %v2621_v7, %v8360_v12  ;;  %v2670_v45 = vpop.f32.mrf.mxu1 }
 0x2cf   :  { %v8460_v39 = vadd.f32 %v2765_v1, %v2717_v17  ;;  %v6514_v17 = vor.u32 %v7468_v60, %v6511_v58  ;;  %v9179_v58 = vld [vmem:[#allocation43_spill] sm:$0xff] }
 0x2d0   :  { %v2671_v63 = vadd.f32 %v2670_v45, %v2622_v41  ;;  %2816 = vmatmul.bf16.gmra.mxu0 %v9176_v38  ;;  %v7404_v41 = vld [vmem:[#allocation5 + $0x48c] sm:$0xf]  ;;  %v6255_v45 = vld [vmem:[#allocation5 + $0x498] sm:$0xf0] }
 0x2d1   :  { %2865 = vmatmul.bf16.gmra.mxu1 %v9177_v55  ;;  %2914 = vmatmul.bf16.gmra.mxu2 %v9178_v4  ;;  %v6258_v4 = vor.u32 %v7404_v41, %v6255_v45  ;;  %v6495_v41 = vld [vmem:[#allocation5 + $0x678] sm:$0xf0] }
 0x2d2   :  { %2963 = vmatmul.bf16.gmra.mxu3 %v7929_v26 }
 0x2d3   :  { %3149 = vmatpush.bf16.msra.mxu3 %v6514_v17  ;;  %3051 = vmatpush.bf16.msra.mxu1 %v6258_v4  ;;  %v7432_v17 = vld [vmem:[#allocation5 + $0x56c] sm:$0xf] }
 0x2d4   :  { %v2719_v12 = vpop.f32.mrf.mxu2 }
 0x2d5   :  { %v2720_v59 = vadd.f32 %v2719_v12, %v2671_v63  ;;  %v2768_v31 = vpop.f32.mrf.mxu3  ;;  %v2623_v2 = vpop.f32.mrf.mxu0  ;;  %v9180_v12 = vld [vmem:[#allocation23_spill] sm:$0xff] }
 0x2d6   :  { %v2624_v1 = vadd.f32 %v2623_v2, %v8366_v22  ;;  %v2672_v7 = vpop.f32.mrf.mxu1 }
 0x2d7   :  { %v8467_v26 = vadd.f32 %v2768_v31, %v2720_v59  ;;  %v6367_v59 = vld [vmem:[#allocation5 + $0x578] sm:$0xf0]  ;;  %v7368_v31 = vld [vmem:[#allocation5 + $0x36c] sm:$0xf] }
 0x2d8   :  { %v2673_v55 = vadd.f32 %v2672_v7, %v2624_v1  ;;  %v6370_v2 = vor.u32 %v7432_v17, %v6367_v59  ;;  %v6111_v1 = vld [vmem:[#allocation5 + $0x378] sm:$0xf0]  ;;  %v7464_v7 = vld [vmem:[#allocation5 + $0x66c] sm:$0xf] }
 0x2d9   :  { %v6114_v45 = vor.u32 %v7368_v31, %v6111_v1 }
 0x2da   :  { %3101 = vmatpush.bf16.msra.mxu2 %v6370_v2 }
 0x2db   :  { %3003 = vmatpush.bf16.msra.mxu0 %v6114_v45  ;;  %v9184_v45 = vld [vmem:[#allocation26_spill] sm:$0xff] }
 0x2dc   :  { %v2721_v18 = vpop.f32.mrf.mxu2 }
 0x2dd   :  { %v2722_v29 = vadd.f32 %v2721_v18, %v2673_v55  ;;  %v2770_v13 = vpop.f32.mrf.mxu3  ;;  %v2626_v34 = vpop.f32.mrf.mxu0  ;;  %v6498_v55 = vor.u32 %v7464_v7, %v6495_v41  ;;  %v9182_v41 = vld [vmem:[#allocation45_spill] sm:$0xff] }
 0x2de   :  { %v2627_v63 = vadd.f32 %v2626_v34, %v8374_v32  ;;  %v2675_v60 = vpop.f32.mrf.mxu1 }
 0x2df   :  { %v8470_v47 = vadd.f32 %v2770_v13, %v2722_v29  ;;  %3150 = vmatpush.bf16.msra.mxu3 %v6498_v55  ;;  %v7428_v55 = vld [vmem:[#allocation5 + $0x54c] sm:$0xf] }
 0x2e0   :  { %v2676_v22 = vadd.f32 %v2675_v60, %v2627_v63  ;;  %2821 = vmatmul.bf16.gmra.mxu0 %v9179_v58  ;;  %v7400_v63 = vld [vmem:[#allocation5 + $0x46c] sm:$0xf]  ;;  %v6239_v60 = vld [vmem:[#allocation5 + $0x478] sm:$0xf0] }
 0x2e1   :  { %2870 = vmatmul.bf16.gmra.mxu1 %v9180_v12  ;;  %2919 = vmatmul.bf16.gmra.mxu2 %v9181_v5  ;;  %v6242_v5 = vor.u32 %v7400_v63, %v6239_v60  ;;  %v6479_v63 = vld [vmem:[#allocation5 + $0x658] sm:$0xf0] }
 0x2e2   :  { %2968 = vmatmul.bf16.gmra.mxu3 %v7941_v51 }
 0x2e3   :  { %3052 = vmatpush.bf16.msra.mxu1 %v6242_v5 }
 0x2e4   :  { %v2724_v32 = vpop.f32.mrf.mxu2 }
 0x2e5   :  { %v2725_v4 = vadd.f32 %v2724_v32, %v2676_v22  ;;  %v2773_v18 = vpop.f32.mrf.mxu3  ;;  %v2628_v29 = vpop.f32.mrf.mxu0  ;;  %v9183_v32 = vld [vmem:[#allocation25_spill] sm:$0xff] }
 0x2e6   :  { %v2629_v13 = vadd.f32 %v2628_v29, %v8380_v48  ;;  %v2677_v34 = vpop.f32.mrf.mxu1 }
 0x2e7   :  { %v8477_v51 = vadd.f32 %v2773_v18, %v2725_v4  ;;  %v6351_v4 = vld [vmem:[#allocation5 + $0x558] sm:$0xf0]  ;;  %v7364_v18 = vld [vmem:[#allocation5 + $0x34c] sm:$0xf] }
 0x2e8   :  { %v2678_v12 = vadd.f32 %v2677_v34, %v2629_v13  ;;  %v6354_v29 = vor.u32 %v7428_v55, %v6351_v4  ;;  %v6095_v13 = vld [vmem:[#allocation5 + $0x358] sm:$0xf0]  ;;  %v7460_v34 = vld [vmem:[#allocation5 + $0x64c] sm:$0xf] }
 0x2e9   :  { %v6098_v60 = vor.u32 %v7364_v18, %v6095_v13 }
 0x2ea   :  { %3102 = vmatpush.bf16.msra.mxu2 %v6354_v29 }
 0x2eb   :  { %3004 = vmatpush.bf16.msra.mxu0 %v6098_v60  ;;  %v9187_v60 = vld [vmem:[#allocation28_spill] sm:$0xff] }
 0x2ec   :  { %v2726_v17 = vpop.f32.mrf.mxu2 }
 0x2ed   :  { %v2727_v59 = vadd.f32 %v2726_v17, %v2678_v12  ;;  %v2775_v31 = vpop.f32.mrf.mxu3  ;;  %v2631_v1 = vpop.f32.mrf.mxu0  ;;  %v6482_v12 = vor.u32 %v7460_v34, %v6479_v63  ;;  %v9185_v63 = vld [vmem:[#allocation47_spill] sm:$0xff] }
 0x2ee   :  { %v2632_v22 = vadd.f32 %v2631_v1, %v8388_v24  ;;  %v2680_v7 = vpop.f32.mrf.mxu1 }
 0x2ef   :  { %v8480_v2 = vadd.f32 %v2775_v31, %v2727_v59  ;;  %3151 = vmatpush.bf16.msra.mxu3 %v6482_v12  ;;  %v7424_v12 = vld [vmem:[#allocation5 + $0x52c] sm:$0xf] }
 0x2f0   :  { %v2681_v48 = vadd.f32 %v2680_v7, %v2632_v22  ;;  %2826 = vmatmul.bf16.gmra.mxu0 %v9182_v41  ;;  %v7396_v22 = vld [vmem:[#allocation5 + $0x44c] sm:$0xf]  ;;  %v6223_v7 = vld [vmem:[#allocation5 + $0x458] sm:$0xf0] }
 0x2f1   :  { %2875 = vmatmul.bf16.gmra.mxu1 %v9183_v32  ;;  %2924 = vmatmul.bf16.gmra.mxu2 %v9184_v45  ;;  %v6226_v45 = vor.u32 %v7396_v22, %v6223_v7  ;;  %v6463_v22 = vld [vmem:[#allocation5 + $0x638] sm:$0xf0] }
 0x2f2   :  { %2973 = vmatmul.bf16.gmra.mxu3 %v7953_v14 }
 0x2f3   :  { %3053 = vmatpush.bf16.msra.mxu1 %v6226_v45 }
 0x2f4   :  { %v2729_v24 = vpop.f32.mrf.mxu2 }
 0x2f5   :  { %v2730_v5 = vadd.f32 %v2729_v24, %v2681_v48  ;;  %v2778_v17 = vpop.f32.mrf.mxu3  ;;  %v2633_v59 = vpop.f32.mrf.mxu0  ;;  %v9186_v24 = vld [vmem:[#allocation27_spill] sm:$0xff] }
 0x2f6   :  { %v2634_v31 = vadd.f32 %v2633_v59, %v8394_v21  ;;  %v2682_v1 = vpop.f32.mrf.mxu1 }
 0x2f7   :  { %v8487_v14 = vadd.f32 %v2778_v17, %v2730_v5  ;;  %v6335_v5 = vld [vmem:[#allocation5 + $0x538] sm:$0xf0]  ;;  %v7360_v17 = vld [vmem:[#allocation5 + $0x32c] sm:$0xf] }
 0x2f8   :  { %v2683_v32 = vadd.f32 %v2682_v1, %v2634_v31  ;;  %v6338_v59 = vor.u32 %v7424_v12, %v6335_v5  ;;  %v6079_v31 = vld [vmem:[#allocation5 + $0x338] sm:$0xf0]  ;;  %v7456_v1 = vld [vmem:[#allocation5 + $0x62c] sm:$0xf] }
 0x2f9   :  { %v6082_v7 = vor.u32 %v7360_v17, %v6079_v31 }
 0x2fa   :  { %3103 = vmatpush.bf16.msra.mxu2 %v6338_v59 }
 0x2fb   :  { %3005 = vmatpush.bf16.msra.mxu0 %v6082_v7  ;;  %v9190_v7 = vld [vmem:[#allocation30_spill] sm:$0xff] }
 0x2fc   :  { %v2731_v55 = vpop.f32.mrf.mxu2 }
 0x2fd   :  { %v2732_v4 = vadd.f32 %v2731_v55, %v2683_v32  ;;  %v2780_v18 = vpop.f32.mrf.mxu3  ;;  %v2636_v13 = vpop.f32.mrf.mxu0  ;;  %v6466_v32 = vor.u32 %v7456_v1, %v6463_v22  ;;  %v9188_v22 = vld [vmem:[#allocation49_spill] sm:$0xff] }
 0x2fe   :  { %v2637_v48 = vadd.f32 %v2636_v13, %v8402_v25  ;;  %v2685_v34 = vpop.f32.mrf.mxu1 }
 0x2ff   :  { %v8490_v29 = vadd.f32 %v2780_v18, %v2732_v4  ;;  %3152 = vmatpush.bf16.msra.mxu3 %v6466_v32  ;;  %v7420_v32 = vld [vmem:[#allocation5 + $0x50c] sm:$0xf] }
 0x300   :  { %v2686_v21 = vadd.f32 %v2685_v34, %v2637_v48  ;;  %2831 = vmatmul.bf16.gmra.mxu0 %v9185_v63  ;;  %v7392_v48 = vld [vmem:[#allocation5 + $0x42c] sm:$0xf]  ;;  %v6207_v34 = vld [vmem:[#allocation5 + $0x438] sm:$0xf0] }
 0x301   :  { %2880 = vmatmul.bf16.gmra.mxu1 %v9186_v24  ;;  %2929 = vmatmul.bf16.gmra.mxu2 %v9187_v60  ;;  %v6210_v60 = vor.u32 %v7392_v48, %v6207_v34  ;;  %v6447_v48 = vld [vmem:[#allocation5 + $0x618] sm:$0xf0] }
 0x302   :  { %2978 = vmatmul.bf16.gmra.mxu3 %v7965_v42 }
 0x303   :  { %3054 = vmatpush.bf16.msra.mxu1 %v6210_v60 }
 0x304   :  { %v2734_v25 = vpop.f32.mrf.mxu2 }
 0x305   :  { %v2735_v45 = vadd.f32 %v2734_v25, %v2686_v21  ;;  %v2783_v55 = vpop.f32.mrf.mxu3  ;;  %v2638_v4 = vpop.f32.mrf.mxu0  ;;  %v9189_v25 = vld [vmem:[#allocation29_spill] sm:$0xff] }
 0x306   :  { %v2639_v18 = vadd.f32 %v2638_v4, %v8408_v44  ;;  %v2687_v13 = vpop.f32.mrf.mxu1 }
 0x307   :  { %v8497_v42 = vadd.f32 %v2783_v55, %v2735_v45  ;;  %v6319_v45 = vld [vmem:[#allocation5 + $0x518] sm:$0xf0]  ;;  %v7356_v55 = vld [vmem:[#allocation5 + $0x30c] sm:$0xf] }
 0x308   :  { %v2688_v24 = vadd.f32 %v2687_v13, %v2639_v18  ;;  %v6322_v4 = vor.u32 %v7420_v32, %v6319_v45  ;;  %v6063_v18 = vld [vmem:[#allocation5 + $0x318] sm:$0xf0]  ;;  %v7452_v13 = vld [vmem:[#allocation5 + $0x60c] sm:$0xf] }
 0x309   :  { %v6066_v34 = vor.u32 %v7356_v55, %v6063_v18 }
 0x30a   :  { %3104 = vmatpush.bf16.msra.mxu2 %v6322_v4 }
 0x30b   :  { %3006 = vmatpush.bf16.msra.mxu0 %v6066_v34  ;;  %v9193_v34 = vld [vmem:[#allocation32_spill] sm:$0xff] }
 0x30c   :  { %v2736_v12 = vpop.f32.mrf.mxu2 }
 0x30d   :  { %v2737_v5 = vadd.f32 %v2736_v12, %v2688_v24  ;;  %v2785_v17 = vpop.f32.mrf.mxu3  ;;  %v2641_v31 = vpop.f32.mrf.mxu0  ;;  %v6450_v24 = vor.u32 %v7452_v13, %v6447_v48  ;;  %v9191_v48 = vld [vmem:[#allocation52_spill] sm:$0xff] }
 0x30e   :  { %v2642_v21 = vadd.f32 %v2641_v31, %v8416_v50  ;;  %v2690_v1 = vpop.f32.mrf.mxu1 }
 0x30f   :  { %v8500_v59 = vadd.f32 %v2785_v17, %v2737_v5  ;;  %3153 = vmatpush.bf16.msra.mxu3 %v6450_v24 }
 0x310   :  { %v2691_v44 = vadd.f32 %v2690_v1, %v2642_v21  ;;  %2836 = vmatmul.bf16.gmra.mxu0 %v9188_v22  ;;  %v7388_v21 = vld [vmem:[#allocation5 + $0x40c] sm:$0xf]  ;;  %v6191_v1 = vld [vmem:[#allocation5 + $0x418] sm:$0xf0] }
 0x311   :  { %2885 = vmatmul.bf16.gmra.mxu1 %v9189_v25  ;;  %2934 = vmatmul.bf16.gmra.mxu2 %v9190_v7  ;;  %v6194_v7 = vor.u32 %v7388_v21, %v6191_v1 }
 0x312   :  { %2983 = vmatmul.bf16.gmra.mxu3 %v7977_v10 }
 0x313   :  { %3055 = vmatpush.bf16.msra.mxu1 %v6194_v7 }
 0x314   :  { %v2739_v50 = vpop.f32.mrf.mxu2 }
 0x315   :  { %v2740_v60 = vadd.f32 %v2739_v50, %v2691_v44  ;;  %v2788_v12 = vpop.f32.mrf.mxu3  ;;  %v2643_v5 = vpop.f32.mrf.mxu0  ;;  %v9192_v50 = vld [vmem:[#allocation31_spill] sm:$0xff] }
 0x316   :  { %v2644_v17 = vadd.f32 %v2643_v5, %v8422_v28  ;;  %v2692_v31 = vpop.f32.mrf.mxu1 }
 0x317   :  { %v8507_v10 = vadd.f32 %v2788_v12, %v2740_v60 }
 0x318   :  { %v2693_v25 = vadd.f32 %v2692_v31, %v2644_v17 }
 0x31c   :  { %v2741_v32 = vpop.f32.mrf.mxu2 }
 0x31d   :  { %v2742_v45 = vadd.f32 %v2741_v32, %v2693_v25  ;;  %v2790_v55 = vpop.f32.mrf.mxu3  ;;  %v2646_v18 = vpop.f32.mrf.mxu0 }
 0x31e   :  { %v2647_v44 = vadd.f32 %v2646_v18, %v8430_v9  ;;  %v2695_v13 = vpop.f32.mrf.mxu1 }
 0x31f   :  { %v8510_v4 = vadd.f32 %v2790_v55, %v2742_v45 }
 0x320   :  { %v2696_v28 = vadd.f32 %v2695_v13, %v2647_v44  ;;  %2841 = vmatmul.bf16.gmra.mxu0 %v9191_v48  ;;  %v9194_v44 = vld [vmem:[#allocation55_spill] sm:$0xff]  ;;  %v9195_v13 = vld [vmem:[#allocation34_spill] sm:$0xff] }
 0x321   :  { %2890 = vmatmul.bf16.gmra.mxu1 %v9192_v50  ;;  %2939 = vmatmul.bf16.gmra.mxu2 %v9193_v34  ;;  %v7577_v50 = vld [vmem:[#allocation8 + $0x2ec] sm:$0xf0] }
 0x322   :  { %2988 = vmatmul.bf16.gmra.mxu3 %v7989_v46 }
 0x324   :  { %v2744_v24 = vpop.f32.mrf.mxu2 }
 0x325   :  { %v2745_v60 = vadd.f32 %v2744_v24, %v2696_v28  ;;  %v2793_v12 = vpop.f32.mrf.mxu3  ;;  %v2648_v5 = vpop.f32.mrf.mxu0  ;;  %v9196_v28 = vld [vmem:[#allocation35_spill] sm:$0xff] }
 0x326   :  { %v2649_v17 = vadd.f32 %v2648_v5, %v8436_v3  ;;  %v2697_v31 = vpop.f32.mrf.mxu1  ;;  %v6933_v3 = vld [vmem:[#allocation8 + $0x2e0] sm:$0xf] }
 0x327   :  { %v8517_v9 = vadd.f32 %v2793_v12, %v2745_v60  ;;  %v6934_v34 = vor.u32 %v7577_v50, %v6933_v3 }
 0x328   :  { %v2698_v21 = vadd.f32 %v2697_v31, %v2649_v17 }
 0x329   :  { %4167 = vmatpush.bf16.msrb.mxu2 %v6934_v34 }
 0x32c   :  { %v2746_v1 = vpop.f32.mrf.mxu2 }
 0x32d   :  { %v2747_v25 = vadd.f32 %v2746_v1, %v2698_v21  ;;  %v2795_v7 = vpop.f32.mrf.mxu3  ;;  %v2651_v32 = vpop.f32.mrf.mxu0  ;;  %v6677_v21 = vld [vmem:[#allocation8 + $0xe0] sm:$0xf]  ;;  %v7513_v1 = vld [vmem:[#allocation8 + $0xec] sm:$0xf0] }
 0x32e   :  { %v2652_v45 = vadd.f32 %v2651_v32, %v8444_v40  ;;  %v2700_v55 = vpop.f32.mrf.mxu1  ;;  %v6678_v32 = vor.u32 %v7513_v1, %v6677_v21  ;;  %v7573_v21 = vld [vmem:[#allocation8 + $0x2cc] sm:$0xf0] }
 0x32f   :  { %v8520_v18 = vadd.f32 %v2795_v7, %v2747_v25  ;;  %v7061_v25 = vld [vmem:[#allocation8 + $0x3e0] sm:$0xf] }
 0x330   :  { %v2701_v46 = vadd.f32 %v2700_v55, %v2652_v45  ;;  %2846 = vmatmul.bf16.gmra.mxu0 %v9194_v44  ;;  %v7609_v45 = vld [vmem:[#allocation8 + $0x3ec] sm:$0xf0]  ;;  %v6805_v55 = vld [vmem:[#allocation8 + $0x1e0] sm:$0xf] }
 0x331   :  { %2895 = vmatmul.bf16.gmra.mxu1 %v9195_v13  ;;  %2944 = vmatmul.bf16.gmra.mxu2 %v9196_v28  ;;  %v7545_v13 = vld [vmem:[#allocation8 + $0x1ec] sm:$0xf0] }
 0x332   :  { %2993 = vmatmul.bf16.gmra.mxu3 %v9168_v20  ;;  %v7062_v20 = vor.u32 %v7609_v45, %v7061_v25  ;;  %4069 = vmatpush.bf16.msrb.mxu0 %v6678_v32 }
 0x334   :  { %v2749_v24 = vpop.f32.mrf.mxu2  ;;  %4216 = vmatpush.bf16.msrb.mxu3 %v7062_v20 }
 0x335   :  { %v2750_v60 = vadd.f32 %v2749_v24, %v2701_v46  ;;  %v2798_v12 = vpop.f32.mrf.mxu3  ;;  %v2653_v5 = vpop.f32.mrf.mxu0  ;;  %v6806_v46 = vor.u32 %v7545_v13, %v6805_v55  ;;  %v6661_v55 = vld [vmem:[#allocation8 + $0xc0] sm:$0xf]  ;;  %v7509_v13 = vld [vmem:[#allocation8 + $0xcc] sm:$0xf0] }
 0x336   :  { %v2654_v40 = vadd.f32 %v2653_v5, %v8450_v8  ;;  %v2702_v17 = vpop.f32.mrf.mxu1  ;;  %v7660_v8 = vld [vmem:[#allocation7] sm:$0xf] }
 0x337   :  { %v8527_v31 = vadd.f32 %v2798_v12, %v2750_v60  ;;  %v8529_v24 = vperm.slane %v7660_v8, 3  ;;  %4118 = vmatpush.bf16.msrb.mxu1 %v6806_v46  ;;  %v7541_v8 = vld [vmem:[#allocation8 + $0x1cc] sm:$0xf0] }
 0x338   :  { %v2703_v7 = vadd.f32 %v2702_v17, %v2654_v40  ;;  %v6917_v17 = vld [vmem:[#allocation8 + $0x2c0] sm:$0xf] }
 0x339   :  { %v6918_v1 = vor.u32 %v7573_v21, %v6917_v17 }
 0x33b   :  { %4168 = vmatpush.bf16.msrb.mxu2 %v6918_v1 }
 0x33c   :  { %v2751_v28 = vpop.f32.mrf.mxu2 }
 0x33d   :  { %v2752_v3 = vadd.f32 %v2751_v28, %v2703_v7  ;;  %v2800_v50 = vpop.f32.mrf.mxu3  ;;  %v2812_v34 = vpop.f32.mrf.mxu0  ;;  %v6662_v28 = vor.u32 %v7509_v13, %v6661_v55 }
 0x33e   :  { %v2813_v60 = vadd.f32 %v2812_v34, %v8457_v54  ;;  %v2861_v12 = vpop.f32.mrf.mxu1  ;;  %v6789_v34 = vld [vmem:[#allocation8 + $0x1c0] sm:$0xf] }
 0x33f   :  { %v8532_v5 = vadd.f32 %v2800_v50, %v2752_v3  ;;  %v2862_v40 = vadd.f32 %v2861_v12, %v8529_v24  ;;  %4070 = vmatpush.bf16.msrb.mxu0 %v6662_v28  ;;  %v6645_v28 = vld [vmem:[#allocation8 + $0xa0] sm:$0xf] }
 0x340   :  { %3007 = vmatmul.bf16.vlgmr.msra.gmra.mxu0 %v7919_v57  ;;  %v3197_v46 = vmax.f32 %v2813_v60, 0.0 }
 0x341   :  { %3056 = vmatmul.bf16.vlgmr.msra.gmra.mxu1 %v8011_v0  ;;  %3105 = vmatmul.bf16.vlgmr.msra.gmra.mxu2 %v9134_v61  ;;  %v7045_v0 = vld [vmem:[#allocation8 + $0x3c0] sm:$0xf] }
 0x342   :  { %3154 = vmatmul.bf16.vlgmr.msra.gmra.mxu3 %v9173_v23  ;;  %v7605_v23 = vld [vmem:[#allocation8 + $0x3cc] sm:$0xf0] }
 0x343   :  { %v7046_v3 = vor.u32 %v7605_v23, %v7045_v0  ;;  %v7505_v23 = vld [vmem:[#allocation8 + $0xac] sm:$0xf0] }
 0x344   :  { %v2910_v25 = vpop.f32.mrf.mxu2 }
 0x345   :  { %v2911_v7 = vadd.f32 %v2910_v25, %v2862_v40  ;;  %v2959_v32 = vpop.f32.mrf.mxu3  ;;  %v2814_v54 = vpop.f32.mrf.mxu0  ;;  %4217 = vmatpush.bf16.msrb.mxu3 %v7046_v3 }
 0x346   :  { %v2815_v45 = vadd.f32 %v2814_v54, %v8460_v39  ;;  %v2863_v20 = vpop.f32.mrf.mxu1  ;;  %v6790_v39 = vor.u32 %v7541_v8, %v6789_v34  ;;  %v6901_v54 = vld [vmem:[#allocation8 + $0x2a0] sm:$0xf]  ;;  %v6646_v34 = vor.u32 %v7505_v23, %v6645_v28 }
 0x347   :  { %v8540_v57 = vadd.f32 %v2959_v32, %v2911_v7  ;;  %v2864_v12 = vadd.f32 %v2863_v20, %v8529_v24 }
 0x348   :  { %v3201_v61 = vmax.f32 %v2815_v45, 0.0  ;;  %4119 = vmatpush.bf16.msrb.mxu1 %v6790_v39  ;;  %v7569_v45 = vld [vmem:[#allocation8 + $0x2ac] sm:$0xf0]  ;;  %4071 = vmatpush.bf16.msrb.mxu0 %v6646_v34  ;;  %v6773_v39 = vld [vmem:[#allocation8 + $0x1a0] sm:$0xf] }
 0x349   :  { %v6902_v20 = vor.u32 %v7569_v45, %v6901_v54 }
 0x34a   :  { %v8542_v50 = vpack.c.bf16 %v3201_v61, %v3197_v46 }
 0x34b   :  { %4169 = vmatpush.bf16.msrb.mxu2 %v6902_v20 }
 0x34c   :  { %v2912_v40 = vpop.f32.mrf.mxu2 }
 0x34d   :  { %v2913_v17 = vadd.f32 %v2912_v40, %v2864_v12  ;;  %v2961_v21 = vpop.f32.mrf.mxu3  ;;  %v2817_v1 = vpop.f32.mrf.mxu0  ;;  %v7537_v40 = vld [vmem:[#allocation8 + $0x1ac] sm:$0xf0] }
 0x34e   :  { %v2818_v60 = vadd.f32 %v2817_v1, %v8467_v26  ;;  %v2866_v25 = vpop.f32.mrf.mxu1 }
 0x34f   :  { %v8546_v7 = vadd.f32 %v2961_v21, %v2913_v17  ;;  %v2867_v32 = vadd.f32 %v2866_v25, %v8529_v24 }
 0x350   :  { %3012 = vmatmul.bf16.gmra.mxu0 %v7931_v27  ;;  %v3205_v3 = vmax.f32 %v2818_v60, 0.0 }
 0x351   :  { %3061 = vmatmul.bf16.gmra.mxu1 %v8025_v6  ;;  %3110 = vmatmul.bf16.gmra.mxu2 %v9138_v36  ;;  %v7029_v6 = vld [vmem:[#allocation8 + $0x3a0] sm:$0xf] }
 0x352   :  { %3159 = vmatmul.bf16.gmra.mxu3 %v9176_v38  ;;  %v7601_v38 = vld [vmem:[#allocation8 + $0x3ac] sm:$0xf0] }
 0x353   :  { %v7030_v8 = vor.u32 %v7601_v38, %v7029_v6  ;;  %v6629_v6 = vld [vmem:[#allocation8 + $0x80] sm:$0xf] }
 0x354   :  { %v2915_v55 = vpop.f32.mrf.mxu2 }
 0x355   :  { %v2916_v13 = vadd.f32 %v2915_v55, %v2867_v32  ;;  %v2964_v0 = vpop.f32.mrf.mxu3  ;;  %v2819_v26 = vpop.f32.mrf.mxu0  ;;  %4218 = vmatpush.bf16.msrb.mxu3 %v7030_v8  ;;  %v6885_v55 = vld [vmem:[#allocation8 + $0x280] sm:$0xf] }
 0x356   :  { %v2820_v46 = vadd.f32 %v2819_v26, %v8470_v47  ;;  %v2868_v61 = vpop.f32.mrf.mxu1  ;;  %v6774_v47 = vor.u32 %v7537_v40, %v6773_v39  ;;  %v6757_v39 = vld [vmem:[#allocation8 + $0x180] sm:$0xf]  ;;  %v7533_v40 = vld [vmem:[#allocation8 + $0x18c] sm:$0xf0] }
 0x357   :  { %v8554_v27 = vadd.f32 %v2964_v0, %v2916_v13  ;;  %v2869_v17 = vadd.f32 %v2868_v61, %v8529_v24  ;;  %v7565_v13 = vld [vmem:[#allocation8 + $0x28c] sm:$0xf0] }
 0x358   :  { %v3209_v36 = vmax.f32 %v2820_v46, 0.0  ;;  %4120 = vmatpush.bf16.msrb.mxu1 %v6774_v47  ;;  %v6886_v0 = vor.u32 %v7565_v13, %v6885_v55  ;;  %v6869_v55 = vld [vmem:[#allocation8 + $0x260] sm:$0xf]  ;;  %v7561_v13 = vld [vmem:[#allocation8 + $0x26c] sm:$0xf0] }
 0x35a   :  { %v8556_v12 = vpack.c.bf16 %v3209_v36, %v3205_v3  ;;  %4170 = vmatpush.bf16.msrb.mxu2 %v6886_v0  ;;  %v7501_v3 = vld [vmem:[#allocation8 + $0x8c] sm:$0xf0]  ;;  %v6870_v0 = vor.u32 %v7561_v13, %v6869_v55 }
 0x35b   :  { %v6630_v34 = vor.u32 %v7501_v3, %v6629_v6  ;;  %v7497_v6 = vld [vmem:[#allocation8 + $0x6c] sm:$0xf0] }
 0x35c   :  { %v2917_v21 = vpop.f32.mrf.mxu2 }
 0x35d   :  { %v2918_v1 = vadd.f32 %v2917_v21, %v2869_v17  ;;  %v2966_v25 = vpop.f32.mrf.mxu3  ;;  %v2822_v32 = vpop.f32.mrf.mxu0  ;;  %4072 = vmatpush.bf16.msrb.mxu0 %v6630_v34  ;;  %v6741_v34 = vld [vmem:[#allocation8 + $0x160] sm:$0xf] }
 0x35e   :  { %v2823_v60 = vadd.f32 %v2822_v32, %v8477_v51  ;;  %v2871_v54 = vpop.f32.mrf.mxu1  ;;  %4171 = vmatpush.bf16.msrb.mxu2 %v6870_v0 }
 0x35f   :  { %v8560_v45 = vadd.f32 %v2966_v25, %v2918_v1  ;;  %v2872_v20 = vadd.f32 %v2871_v54, %v8529_v24 }
 0x360   :  { %3017 = vmatmul.bf16.gmra.mxu0 %v7943_v52  ;;  %v3213_v36 = vmax.f32 %v2823_v60, 0.0 }
 0x361   :  { %3066 = vmatmul.bf16.gmra.mxu1 %v8041_v35  ;;  %3115 = vmatmul.bf16.gmra.mxu2 %v9141_v19  ;;  %v7013_v35 = vld [vmem:[#allocation8 + $0x380] sm:$0xf] }
 0x362   :  { %3164 = vmatmul.bf16.gmra.mxu3 %v9179_v58  ;;  %v7597_v58 = vld [vmem:[#allocation8 + $0x38c] sm:$0xf0] }
 0x363   :  { %v7014_v38 = vor.u32 %v7597_v58, %v7013_v35  ;;  %v7529_v58 = vld [vmem:[#allocation8 + $0x16c] sm:$0xf0] }
 0x364   :  { %v2920_v26 = vpop.f32.mrf.mxu2 }
 0x365   :  { %v2921_v46 = vadd.f32 %v2920_v26, %v2872_v20  ;;  %v2969_v61 = vpop.f32.mrf.mxu3  ;;  %v2824_v51 = vpop.f32.mrf.mxu0  ;;  %4219 = vmatpush.bf16.msrb.mxu3 %v7014_v38 }
 0x366   :  { %v2825_v28 = vadd.f32 %v2824_v51, %v8480_v2  ;;  %v2873_v23 = vpop.f32.mrf.mxu1  ;;  %v6758_v2 = vor.u32 %v7533_v40, %v6757_v39 }
 0x367   :  { %v8568_v52 = vadd.f32 %v2969_v61, %v2921_v46  ;;  %v2874_v17 = vadd.f32 %v2873_v23, %v8529_v24  ;;  %v6613_v23 = vld [vmem:[#allocation8 + $0x60] sm:$0xf] }
 0x368   :  { %v3217_v19 = vmax.f32 %v2825_v28, 0.0  ;;  %4121 = vmatpush.bf16.msrb.mxu1 %v6758_v2  ;;  %v6614_v35 = vor.u32 %v7497_v6, %v6613_v23 }
 0x36a   :  { %v8570_v8 = vpack.c.bf16 %v3217_v19, %v3213_v36  ;;  %4073 = vmatpush.bf16.msrb.mxu0 %v6614_v35 }
 0x36c   :  { %v2922_v47 = vpop.f32.mrf.mxu2 }
 0x36d   :  { %v2923_v21 = vadd.f32 %v2922_v47, %v2874_v17  ;;  %v2971_v1 = vpop.f32.mrf.mxu3  ;;  %v2827_v25 = vpop.f32.mrf.mxu0 }
 0x36e   :  { %v2828_v32 = vadd.f32 %v2827_v25, %v8487_v14  ;;  %v2876_v60 = vpop.f32.mrf.mxu1 }
 0x36f   :  { %v8574_v54 = vadd.f32 %v2971_v1, %v2923_v21  ;;  %v2877_v20 = vadd.f32 %v2876_v60, %v8529_v24  ;;  %v7557_v60 = vld [vmem:[#allocation8 + $0x24c] sm:$0xf0] }
 0x370   :  { %3022 = vmatmul.bf16.gmra.mxu0 %v7955_v15  ;;  %v3221_v3 = vmax.f32 %v2828_v32, 0.0  ;;  %v6853_v32 = vld [vmem:[#allocation8 + $0x240] sm:$0xf] }
 0x371   :  { %3071 = vmatmul.bf16.gmra.mxu1 %v8057_v16  ;;  %3120 = vmatmul.bf16.gmra.mxu2 %v9144_v30  ;;  %v6997_v16 = vld [vmem:[#allocation8 + $0x360] sm:$0xf] }
 0x372   :  { %3169 = vmatmul.bf16.gmra.mxu3 %v9182_v41  ;;  %v7593_v41 = vld [vmem:[#allocation8 + $0x36c] sm:$0xf0] }
 0x373   :  { %v6998_v36 = vor.u32 %v7593_v41, %v6997_v16  ;;  %v6725_v16 = vld [vmem:[#allocation8 + $0x140] sm:$0xf] }
 0x374   :  { %v2925_v26 = vpop.f32.mrf.mxu2 }
 0x375   :  { %v2926_v46 = vadd.f32 %v2925_v26, %v2877_v20  ;;  %v2974_v61 = vpop.f32.mrf.mxu3  ;;  %v2829_v14 = vpop.f32.mrf.mxu0  ;;  %4220 = vmatpush.bf16.msrb.mxu3 %v6998_v36  ;;  %v6854_v20 = vor.u32 %v7557_v60, %v6853_v32  ;;  %v6581_v60 = vld [vmem:[#allocation8 + $0x20] sm:$0xf] }
 0x376   :  { %v2830_v51 = vadd.f32 %v2829_v14, %v8490_v29  ;;  %v2878_v28 = vpop.f32.mrf.mxu1  ;;  %v6742_v29 = vor.u32 %v7529_v58, %v6741_v34  ;;  %v7493_v14 = vld [vmem:[#allocation8 + $0x4c] sm:$0xf0] }
 0x377   :  { %v8582_v15 = vadd.f32 %v2974_v61, %v2926_v46  ;;  %v2879_v38 = vadd.f32 %v2878_v28, %v8529_v24  ;;  %4172 = vmatpush.bf16.msrb.mxu2 %v6854_v20  ;;  %v6597_v61 = vld [vmem:[#allocation8 + $0x40] sm:$0xf]  ;;  %v7489_v20 = vld [vmem:[#allocation8 + $0x2c] sm:$0xf0] }
 0x378   :  { %v3225_v30 = vmax.f32 %v2830_v51, 0.0  ;;  %4122 = vmatpush.bf16.msrb.mxu1 %v6742_v29  ;;  %v6598_v28 = vor.u32 %v7493_v14, %v6597_v61 }
 0x37a   :  { %v8584_v19 = vpack.c.bf16 %v3225_v30, %v3221_v3  ;;  %4074 = vmatpush.bf16.msrb.mxu0 %v6598_v28  ;;  %v7525_v3 = vld [vmem:[#allocation8 + $0x14c] sm:$0xf0] }
 0x37c   :  { %v2927_v39 = vpop.f32.mrf.mxu2 }
 0x37d   :  { %v2928_v40 = vadd.f32 %v2927_v39, %v2879_v38  ;;  %v2976_v17 = vpop.f32.mrf.mxu3  ;;  %v2832_v2 = vpop.f32.mrf.mxu0  ;;  %v6837_v39 = vld [vmem:[#allocation8 + $0x220] sm:$0xf] }
 0x37e   :  { %v2833_v47 = vadd.f32 %v2832_v2, %v8497_v42  ;;  %v2881_v21 = vpop.f32.mrf.mxu1 }
 0x37f   :  { %v8588_v1 = vadd.f32 %v2976_v17, %v2928_v40  ;;  %v2882_v25 = vadd.f32 %v2881_v21, %v8529_v24  ;;  %v7553_v40 = vld [vmem:[#allocation8 + $0x22c] sm:$0xf0] }
 0x380   :  { %3027 = vmatmul.bf16.gmra.mxu0 %v7967_v43  ;;  %v3229_v51 = vmax.f32 %v2833_v47, 0.0  ;;  %v6838_v17 = vor.u32 %v7553_v40, %v6837_v39  ;;  %v9197_v39 = vld [vmem:[#allocation51_spill] sm:$0xff] }
 0x381   :  { %3076 = vmatmul.bf16.gmra.mxu1 %v8073_v56  ;;  %3125 = vmatmul.bf16.gmra.mxu2 %v9147_v62  ;;  %v6981_v56 = vld [vmem:[#allocation8 + $0x340] sm:$0xf] }
 0x382   :  { %3174 = vmatmul.bf16.gmra.mxu3 %v9185_v63  ;;  %v7589_v63 = vld [vmem:[#allocation8 + $0x34c] sm:$0xf0]  ;;  %4173 = vmatpush.bf16.msrb.mxu2 %v6838_v17 }
 0x383   :  { %v6982_v23 = vor.u32 %v7589_v63, %v6981_v56  ;;  %v6565_v56 = vld [vmem:[#allocation8] sm:$0xf] }
 0x384   :  { %v2930_v55 = vpop.f32.mrf.mxu2 }
 0x385   :  { %v2931_v13 = vadd.f32 %v2930_v55, %v2882_v25  ;;  %v2979_v0 = vpop.f32.mrf.mxu3  ;;  %v2834_v42 = vpop.f32.mrf.mxu0  ;;  %4221 = vmatpush.bf16.msrb.mxu3 %v6982_v23 }
 0x386   :  { %v2835_v26 = vadd.f32 %v2834_v42, %v8500_v59  ;;  %v2883_v46 = vpop.f32.mrf.mxu1  ;;  %v6726_v59 = vor.u32 %v7525_v3, %v6725_v16  ;;  %v7517_v3 = vld [vmem:[#allocation8 + $0x10c] sm:$0xf0] }
 0x387   :  { %v8596_v43 = vadd.f32 %v2979_v0, %v2931_v13  ;;  %v2884_v30 = vadd.f32 %v2883_v46, %v8529_v24  ;;  %v6582_v13 = vor.u32 %v7489_v20, %v6581_v60  ;;  %v6709_v0 = vld [vmem:[#allocation8 + $0x120] sm:$0xf]  ;;  %v7581_v60 = vld [vmem:[#allocation8 + $0x30c] sm:$0xf0] }
 0x388   :  { %v3233_v62 = vmax.f32 %v2835_v26, 0.0  ;;  %4123 = vmatpush.bf16.msrb.mxu1 %v6726_v59  ;;  %v7521_v26 = vld [vmem:[#allocation8 + $0x12c] sm:$0xf0] }
 0x389   :  { %4075 = vmatpush.bf16.msrb.mxu0 %v6582_v13  ;;  %v6710_v61 = vor.u32 %v7521_v26, %v6709_v0  ;;  %v7549_v59 = vld [vmem:[#allocation8 + $0x20c] sm:$0xf0]  ;;  %v9198_v0 = vld [vmem:[#allocation37_spill] sm:$0xff] }
 0x38a   :  { %v8598_v6 = vpack.c.bf16 %v3233_v62, %v3229_v51  ;;  %v7485_v51 = vld [vmem:[#allocation8 + $0xc] sm:$0xf0]  ;;  %v6693_v62 = vld [vmem:[#allocation8 + $0x100] sm:$0xf]  ;;  %v9199_v26 = vld [vmem:[#allocation53_spill] sm:$0xff] }
 0x38b   :  { %v6566_v16 = vor.u32 %v7485_v51, %v6565_v56 }
 0x38c   :  { %v2932_v35 = vpop.f32.mrf.mxu2  ;;  %4124 = vmatpush.bf16.msrb.mxu1 %v6710_v61  ;;  %v9200_v61 = vld [vmem:[#allocation54_spill] sm:$0xff] }
 0x38d   :  { %v8601_v41 = vadd.f32 %v2932_v35, %v2884_v30  ;;  %v8603_v36 = vpop.f32.mrf.mxu3  ;;  %v2837_v34 = vpop.f32.mrf.mxu0  ;;  %v6821_v30 = vld [vmem:[#allocation8 + $0x200] sm:$0xf]  ;;  %4076 = vmatpush.bf16.msrb.mxu0 %v6566_v16 }
 0x38e   :  { %v2838_v58 = vadd.f32 %v2837_v34, %v8507_v10  ;;  %v2886_v38 = vpop.f32.mrf.mxu1 }
 0x38f   :  { %v2887_v29 = vadd.f32 %v2886_v38, %v8529_v24  ;;  %v6822_v38 = vor.u32 %v7549_v59, %v6821_v30 }
 0x390   :  { %3032 = vmatmul.bf16.gmra.mxu0 %v7979_v11  ;;  %v3237_v55 = vmax.f32 %v2838_v58, 0.0  ;;  %v6694_v58 = vor.u32 %v7517_v3, %v6693_v62 }
 0x391   :  { %3081 = vmatmul.bf16.gmra.mxu1 %v8089_v33  ;;  %3130 = vmatmul.bf16.gmra.mxu2 %v9150_v37  ;;  %v6965_v33 = vld [vmem:[#allocation8 + $0x320] sm:$0xf] }
 0x392   :  { %3179 = vmatmul.bf16.gmra.mxu3 %v9188_v22  ;;  %v7585_v22 = vld [vmem:[#allocation8 + $0x32c] sm:$0xf0]  ;;  %4125 = vmatpush.bf16.msrb.mxu1 %v6694_v58  ;;  %v6679_v58 = vld [vmem:[#allocation8 + $0xf0] sm:$0xf0] }
 0x393   :  { %v6966_v42 = vor.u32 %v7585_v22, %v6965_v33  ;;  %4174 = vmatpush.bf16.msrb.mxu2 %v6822_v38  ;;  %v7607_v38 = vld [vmem:[#allocation8 + $0x3e4] sm:$0xf] }
 0x394   :  { %v2935_v2 = vpop.f32.mrf.mxu2 }
 0x395   :  { %v2936_v47 = vadd.f32 %v2935_v2, %v2887_v29  ;;  %v2984_v21 = vpop.f32.mrf.mxu3  ;;  %v2839_v25 = vpop.f32.mrf.mxu0  ;;  %4222 = vmatpush.bf16.msrb.mxu3 %v6966_v42 }
 0x396   :  { %v2840_v10 = vadd.f32 %v2839_v25, %v8510_v4  ;;  %v2888_v32 = vpop.f32.mrf.mxu1 }
 0x397   :  { %v8612_v11 = vadd.f32 %v2984_v21, %v2936_v47  ;;  %v2889_v14 = vadd.f32 %v2888_v32, %v8529_v24  ;;  %v6949_v32 = vld [vmem:[#allocation8 + $0x300] sm:$0xf] }
 0x398   :  { %v3241_v37 = vmax.f32 %v2840_v10, 0.0 }
 0x39a   :  { %v8614_v46 = vpack.c.bf16 %v3241_v37, %v3237_v55 }
 0x39c   :  { %v2937_v4 = vpop.f32.mrf.mxu2 }
 0x39d   :  { %v8617_v28 = vadd.f32 %v2937_v4, %v2889_v14  ;;  %v8619_v63 = vpop.f32.mrf.mxu3  ;;  %v2842_v23 = vpop.f32.mrf.mxu0  ;;  %v7575_v14 = vld [vmem:[#allocation8 + $0x2e4] sm:$0xf]  ;;  %v6935_v4 = vld [vmem:[#allocation8 + $0x2f0] sm:$0xf0] }
 0x39e   :  { %v2843_v35 = vadd.f32 %v2842_v23, %v8517_v9  ;;  %v2891_v34 = vpop.f32.mrf.mxu1  ;;  %v6938_v51 = vor.u32 %v7575_v14, %v6935_v4  ;;  %v7507_v4 = vld [vmem:[#allocation8 + $0xc4] sm:$0xf] }
 0x39f   :  { %v2892_v29 = vadd.f32 %v2891_v34, %v8529_v24  ;;  %v7511_v34 = vld [vmem:[#allocation8 + $0xe4] sm:$0xf] }
 0x3a0   :  { %3037 = vmatmul.bf16.gmra.mxu0 %v9165_v53  ;;  %v3245_v53 = vmax.f32 %v2843_v35, 0.0  ;;  %4363 = vmatpush.bf16.msra.mxu2 %v6938_v51 }
 0x3a1   :  { %3086 = vmatmul.bf16.gmra.mxu1 %v9166_v49  ;;  %3135 = vmatmul.bf16.gmra.mxu2 %v9197_v39  ;;  %v6950_v49 = vor.u32 %v7581_v60, %v6949_v32  ;;  %v7063_v39 = vld [vmem:[#allocation8 + $0x3f0] sm:$0xf0]  ;;  %v9201_v60 = vld [vmem:[#allocation56_spill] sm:$0xff] }
 0x3a2   :  { %3184 = vmatmul.bf16.gmra.mxu3 %v9191_v48 }
 0x3a3   :  { %4223 = vmatpush.bf16.msrb.mxu3 %v6950_v49  ;;  %v9202_v49 = vld [vmem:[#allocation40_spill] sm:$0xff] }
 0x3a4   :  { %v2940_v40 = vpop.f32.mrf.mxu2 }
 0x3a5   :  { %v2941_v17 = vadd.f32 %v2940_v40, %v2892_v29  ;;  %v2989_v2 = vpop.f32.mrf.mxu3  ;;  %v2844_v9 = vpop.f32.mrf.mxu0  ;;  %v7543_v40 = vld [vmem:[#allocation8 + $0x1e4] sm:$0xf] }
 0x3a6   :  { %v2845_v47 = vadd.f32 %v2844_v9, %v8520_v18  ;;  %v2893_v21 = vpop.f32.mrf.mxu1  ;;  %v7066_v9 = vor.u32 %v7607_v38, %v7063_v39 }
 0x3a7   :  { %v8628_v25 = vadd.f32 %v2989_v2, %v2941_v17  ;;  %v2894_v33 = vadd.f32 %v2893_v21, %v8529_v24  ;;  %v6807_v17 = vld [vmem:[#allocation8 + $0x1f0] sm:$0xf0] }
 0x3a8   :  { %v3249_v10 = vmax.f32 %v2845_v47, 0.0  ;;  %v6810_v47 = vor.u32 %v7543_v40, %v6807_v17  ;;  %4412 = vmatpush.bf16.msra.mxu3 %v7066_v9  ;;  %v9203_v40 = vld [vmem:[#allocation57_spill] sm:$0xff]  ;;  %v9204_v9 = vld [vmem:[#allocation42_spill] sm:$0xff] }
 0x3aa   :  { %v8630_v20 = vpack.c.bf16 %v3249_v10, %v3245_v53  ;;  %4314 = vmatpush.bf16.msra.mxu1 %v6810_v47 }
 0x3ac   :  { %v2942_v48 = vpop.f32.mrf.mxu2 }
 0x3ad   :  { %v8633_v55 = vadd.f32 %v2942_v48, %v2894_v33  ;;  %v8635_v37 = vpop.f32.mrf.mxu3  ;;  %v2847_v13 = vpop.f32.mrf.mxu0  ;;  %v7571_v33 = vld [vmem:[#allocation8 + $0x2c4] sm:$0xf]  ;;  %v6919_v48 = vld [vmem:[#allocation8 + $0x2d0] sm:$0xf0] }
 0x3ae   :  { %v2848_v18 = vadd.f32 %v2847_v13, %v8527_v31  ;;  %v2896_v22 = vpop.f32.mrf.mxu1 }
 0x3af   :  { %v2897_v42 = vadd.f32 %v2896_v22, %v8529_v24 }
 0x3b0   :  { %3042 = vmatmul.bf16.gmra.mxu0 %v9198_v0  ;;  %v3253_v59 = vmax.f32 %v2848_v18, 0.0  ;;  %v6922_v18 = vor.u32 %v7571_v33, %v6919_v48 }
 0x3b1   :  { %3091 = vmatmul.bf16.gmra.mxu1 %v9199_v26  ;;  %3140 = vmatmul.bf16.gmra.mxu2 %v9200_v61 }
 0x3b2   :  { %3189 = vmatmul.bf16.gmra.mxu3 %v9194_v44  ;;  %v6682_v44 = vor.u32 %v7511_v34, %v6679_v58  ;;  %4364 = vmatpush.bf16.msra.mxu2 %v6922_v18 }
 0x3b4   :  { %v2945_v56 = vpop.f32.mrf.mxu2  ;;  %4265 = vmatpush.bf16.msra.mxu0 %v6682_v44 }
 0x3b5   :  { %v2946_v62 = vadd.f32 %v2945_v56, %v2897_v42  ;;  %v2994_v23 = vpop.f32.mrf.mxu3  ;;  %v2849_v16 = vpop.f32.mrf.mxu0  ;;  %v6663_v56 = vld [vmem:[#allocation8 + $0xd0] sm:$0xf0] }
 0x3b6   :  { %v2850_v31 = vadd.f32 %v2849_v16, %v8532_v5  ;;  %v2898_v3 = vpop.f32.mrf.mxu1  ;;  %v6666_v51 = vor.u32 %v7507_v4, %v6663_v56  ;;  %v7539_v16 = vld [vmem:[#allocation8 + $0x1c4] sm:$0xf]  ;;  %v7031_v56 = vld [vmem:[#allocation8 + $0x3b0] sm:$0xf0] }
 0x3b7   :  { %v8644_v30 = vadd.f32 %v2994_v23, %v2946_v62  ;;  %v2899_v2 = vadd.f32 %v2898_v3, %v8529_v24  ;;  %v7603_v62 = vld [vmem:[#allocation8 + $0x3c4] sm:$0xf]  ;;  %v7047_v23 = vld [vmem:[#allocation8 + $0x3d0] sm:$0xf0] }
 0x3b8   :  { %v3257_v35 = vmax.f32 %v2850_v31, 0.0  ;;  %v6791_v3 = vld [vmem:[#allocation8 + $0x1d0] sm:$0xf0]  ;;  %4266 = vmatpush.bf16.msra.mxu0 %v6666_v51  ;;  %v7599_v4 = vld [vmem:[#allocation8 + $0x3a4] sm:$0xf] }
 0x3ba   :  { %v8646_v29 = vpack.c.bf16 %v3257_v35, %v3253_v59  ;;  %v6794_v35 = vor.u32 %v7539_v16, %v6791_v3 }
 0x3bc   :  { %v2947_v5 = vpop.f32.mrf.mxu2  ;;  %4315 = vmatpush.bf16.msra.mxu1 %v6794_v35 }
 0x3bd   :  { %v8649_v21 = vadd.f32 %v2947_v5, %v2899_v2  ;;  %v8651_v53 = vpop.f32.mrf.mxu3  ;;  %v3008_v10 = vpop.f32.mrf.mxu0 }
 0x3be   :  { %v3057_v32 = vpop.f32.mrf.mxu1  ;;  %v3009_v24 = vadd.f32 %v3008_v10, %v8540_v57  ;;  %v7050_v57 = vor.u32 %v7603_v62, %v7047_v23  ;;  %v7567_v10 = vld [vmem:[#allocation8 + $0x2a4] sm:$0xf]  ;;  %v7034_v62 = vor.u32 %v7599_v4, %v7031_v56  ;;  %v6775_v23 = vld [vmem:[#allocation8 + $0x1b0] sm:$0xf0] }
 0x3c0   :  { %4077 = vmatmul.bf16.vlgmr.msrb.gmra.mxu0 %v9201_v60  ;;  %v3058_v26 = vadd.f32 %v3057_v32, %v3009_v24  ;;  %4413 = vmatpush.bf16.msra.mxu3 %v7050_v57  ;;  %v6903_v32 = vld [vmem:[#allocation8 + $0x2b0] sm:$0xf0] }
 0x3c1   :  { %4126 = vmatmul.bf16.vlgmr.msrb.gmra.mxu1 %v9202_v49  ;;  %4175 = vmatmul.bf16.vlgmr.msrb.gmra.mxu2 %v8542_v50  ;;  %v6906_v33 = vor.u32 %v7567_v10, %v6903_v32 }
 0x3c3   :  { %4365 = vmatpush.bf16.msra.mxu2 %v6906_v33 }
 0x3c4   :  { %v3106_v13 = vpop.f32.mrf.mxu2  ;;  %4414 = vmatpush.bf16.msra.mxu3 %v7034_v62 }
 0x3c5   :  { %v3155_v22 = vpop.f32.mrf.mxu3  ;;  %v3010_v0 = vpop.f32.mrf.mxu0  ;;  %v3107_v14 = vadd.f32 %v3106_v13, %v3058_v26  ;;  %v7503_v26 = vld [vmem:[#allocation8 + $0xa4] sm:$0xf] }
 0x3c6   :  { %v3059_v42 = vpop.f32.mrf.mxu1  ;;  %v3011_v61 = vadd.f32 %v3010_v0, %v8546_v7 }
 0x3c7   :  { %v3156_v34 = vadd.f32 %v3155_v22, %v3107_v14 }
 0x3c8   :  { %v3060_v31 = vadd.f32 %v3059_v42, %v3011_v61  ;;  %v6647_v61 = vld [vmem:[#allocation8 + $0xb0] sm:$0xf0] }
 0x3c9   :  { %v3198_v17 = vmax.f32 %v3156_v34, 0.0  ;;  %v6650_v14 = vor.u32 %v7503_v26, %v6647_v61  ;;  %v7595_v61 = vld [vmem:[#allocation8 + $0x384] sm:$0xf] }
 0x3cb   :  { %4267 = vmatpush.bf16.msra.mxu0 %v6650_v14  ;;  %v7015_v14 = vld [vmem:[#allocation8 + $0x390] sm:$0xf0] }
 0x3cc   :  { %v3108_v59 = vpop.f32.mrf.mxu2  ;;  %v7018_v56 = vor.u32 %v7595_v61, %v7015_v14  ;;  %v6999_v61 = vld [vmem:[#allocation8 + $0x370] sm:$0xf0] }
 0x3cd   :  { %v3109_v58 = vadd.f32 %v3108_v59, %v3060_v31  ;;  %v3157_v38 = vpop.f32.mrf.mxu3  ;;  %v3013_v44 = vpop.f32.mrf.mxu0 }
 0x3ce   :  { %v3062_v39 = vpop.f32.mrf.mxu1  ;;  %v3014_v5 = vadd.f32 %v3013_v44, %v8554_v27  ;;  %v7535_v27 = vld [vmem:[#allocation8 + $0x1a4] sm:$0xf]  ;;  %4415 = vmatpush.bf16.msra.mxu3 %v7018_v56 }
 0x3cf   :  { %v3158_v7 = vadd.f32 %v3157_v38, %v3109_v58  ;;  %v6778_v31 = vor.u32 %v7535_v27, %v6775_v23  ;;  %v9205_v58 = vld [vmem:[#allocation58_spill] sm:$0xff]  ;;  %v6759_v27 = vld [vmem:[#allocation8 + $0x190] sm:$0xf0] }
 0x3d0   :  { %4082 = vmatmul.bf16.gmra.mxu0 %v9203_v40  ;;  %v3063_v22 = vadd.f32 %v3062_v39, %v3014_v5  ;;  %v9206_v39 = vld [vmem:[#allocation44_spill] sm:$0xff]  ;;  %v6887_v5 = vld [vmem:[#allocation8 + $0x290] sm:$0xf0] }
 0x3d1   :  { %v3202_v2 = vmax.f32 %v3158_v7, 0.0  ;;  %4131 = vmatmul.bf16.gmra.mxu1 %v9204_v9  ;;  %4180 = vmatmul.bf16.gmra.mxu2 %v8556_v12 }
 0x3d2   :  { %4316 = vmatpush.bf16.msra.mxu1 %v6778_v31 }
 0x3d3   :  { %v8661_v47 = vpack.c.bf16 %v3202_v2, %v3198_v17  ;;  %v7563_v2 = vld [vmem:[#allocation8 + $0x284] sm:$0xf] }
 0x3d4   :  { %v3111_v24 = vpop.f32.mrf.mxu2  ;;  %v6890_v32 = vor.u32 %v7563_v2, %v6887_v5  ;;  %v6871_v2 = vld [vmem:[#allocation8 + $0x270] sm:$0xf0] }
 0x3d5   :  { %v3160_v48 = vpop.f32.mrf.mxu3  ;;  %4224 = vmatmul.bf16.vlgmr.msrb.gmra.mxu3 %v8661_v47  ;;  %v3015_v13 = vpop.f32.mrf.mxu0  ;;  %v3112_v42 = vadd.f32 %v3111_v24, %v3063_v22 }
 0x3d6   :  { %v3064_v18 = vpop.f32.mrf.mxu1  ;;  %v3016_v0 = vadd.f32 %v3015_v13, %v8560_v45  ;;  %4366 = vmatpush.bf16.msra.mxu2 %v6890_v32 }
 0x3d7   :  { %v3161_v57 = vadd.f32 %v3160_v48, %v3112_v42  ;;  %v6631_v42 = vld [vmem:[#allocation8 + $0x90] sm:$0xf0] }
 0x3d8   :  { %v3065_v51 = vadd.f32 %v3064_v18, %v3016_v0  ;;  %v7499_v0 = vld [vmem:[#allocation8 + $0x84] sm:$0xf] }
 0x3d9   :  { %v3206_v38 = vmax.f32 %v3161_v57, 0.0  ;;  %v6634_v26 = vor.u32 %v7499_v0, %v6631_v42  ;;  %v6615_v0 = vld [vmem:[#allocation8 + $0x70] sm:$0xf0] }
 0x3db   :  { %4268 = vmatpush.bf16.msra.mxu0 %v6634_v26  ;;  %v7591_v26 = vld [vmem:[#allocation8 + $0x364] sm:$0xf] }
 0x3dc   :  { %v3113_v16 = vpop.f32.mrf.mxu2 }
 0x3dd   :  { %v3114_v3 = vadd.f32 %v3113_v16, %v3065_v51  ;;  %v3162_v59 = vpop.f32.mrf.mxu3  ;;  %v3018_v35 = vpop.f32.mrf.mxu0 }
 0x3de   :  { %v3067_v34 = vpop.f32.mrf.mxu1  ;;  %v3019_v17 = vadd.f32 %v3018_v35, %v8568_v52  ;;  %v7531_v52 = vld [vmem:[#allocation8 + $0x184] sm:$0xf] }
 0x3df   :  { %v3163_v45 = vadd.f32 %v3162_v59, %v3114_v3  ;;  %v6762_v62 = vor.u32 %v7531_v52, %v6759_v27  ;;  %v9207_v59 = vld [vmem:[#allocation59_spill] sm:$0xff]  ;;  %v7002_v52 = vor.u32 %v7591_v26, %v6999_v61  ;;  %v6983_v61 = vld [vmem:[#allocation8 + $0x350] sm:$0xf0] }
 0x3e0   :  { %4087 = vmatmul.bf16.gmra.mxu0 %v9205_v58  ;;  %v3068_v13 = vadd.f32 %v3067_v34, %v3019_v17  ;;  %v7559_v17 = vld [vmem:[#allocation8 + $0x264] sm:$0xf] }
 0x3e1   :  { %v3210_v44 = vmax.f32 %v3163_v45, 0.0  ;;  %4136 = vmatmul.bf16.gmra.mxu1 %v9206_v39  ;;  %4185 = vmatmul.bf16.gmra.mxu2 %v8570_v8  ;;  %v9208_v45 = vld [vmem:[#allocation46_spill] sm:$0xff] }
 0x3e2   :  { %4317 = vmatpush.bf16.msra.mxu1 %v6762_v62  ;;  %4416 = vmatpush.bf16.msra.mxu3 %v7002_v52 }
 0x3e3   :  { %v8669_v7 = vpack.c.bf16 %v3210_v44, %v3206_v38 }
 0x3e4   :  { %v3116_v10 = vpop.f32.mrf.mxu2 }
 0x3e5   :  { %v3165_v24 = vpop.f32.mrf.mxu3  ;;  %4229 = vmatmul.bf16.gmra.mxu3 %v8669_v7  ;;  %v3020_v33 = vpop.f32.mrf.mxu0  ;;  %v3117_v22 = vadd.f32 %v3116_v10, %v3068_v13  ;;  %v6874_v10 = vor.u32 %v7559_v17, %v6871_v2  ;;  %v7555_v17 = vld [vmem:[#allocation8 + $0x244] sm:$0xf]  ;;  %v6855_v2 = vld [vmem:[#allocation8 + $0x250] sm:$0xf0] }
 0x3e6   :  { %v3069_v48 = vpop.f32.mrf.mxu1  ;;  %v3021_v18 = vadd.f32 %v3020_v33, %v8574_v54 }
 0x3e7   :  { %v3166_v23 = vadd.f32 %v3165_v24, %v3117_v22  ;;  %4367 = vmatpush.bf16.msra.mxu2 %v6874_v10  ;;  %v7495_v22 = vld [vmem:[#allocation8 + $0x64] sm:$0xf]  ;;  %v6858_v10 = vor.u32 %v7555_v17, %v6855_v2 }
 0x3e8   :  { %v3070_v4 = vadd.f32 %v3069_v48, %v3021_v18  ;;  %v6618_v42 = vor.u32 %v7495_v22, %v6615_v0  ;;  %v7491_v0 = vld [vmem:[#allocation8 + $0x44] sm:$0xf] }
 0x3e9   :  { %v3214_v35 = vmax.f32 %v3166_v23, 0.0  ;;  %v7551_v2 = vld [vmem:[#allocation8 + $0x224] sm:$0xf] }
 0x3ea   :  { %4269 = vmatpush.bf16.msra.mxu0 %v6618_v42  ;;  %v6599_v42 = vld [vmem:[#allocation8 + $0x50] sm:$0xf0] }
 0x3eb   :  { %4368 = vmatpush.bf16.msra.mxu2 %v6858_v10  ;;  %v6602_v26 = vor.u32 %v7491_v0, %v6599_v42  ;;  %v7487_v0 = vld [vmem:[#allocation8 + $0x24] sm:$0xf]  ;;  %v6583_v42 = vld [vmem:[#allocation8 + $0x30] sm:$0xf0] }
 0x3ec   :  { %v3118_v51 = vpop.f32.mrf.mxu2 }
 0x3ed   :  { %v3119_v16 = vadd.f32 %v3118_v51, %v3070_v4  ;;  %v3167_v31 = vpop.f32.mrf.mxu3  ;;  %v3023_v57 = vpop.f32.mrf.mxu0  ;;  %v6743_v4 = vld [vmem:[#allocation8 + $0x170] sm:$0xf0] }
 0x3ee   :  { %v3072_v3 = vpop.f32.mrf.mxu1  ;;  %v3024_v44 = vadd.f32 %v3023_v57, %v8582_v15  ;;  %v7527_v15 = vld [vmem:[#allocation8 + $0x164] sm:$0xf]  ;;  %v9209_v57 = vld [vmem:[#allocation60_spill] sm:$0xff]  ;;  %4270 = vmatpush.bf16.msra.mxu0 %v6602_v26 }
 0x3ef   :  { %v3168_v54 = vadd.f32 %v3167_v31, %v3119_v16  ;;  %v6746_v27 = vor.u32 %v7527_v15, %v6743_v4  ;;  %v7523_v15 = vld [vmem:[#allocation8 + $0x144] sm:$0xf]  ;;  %v6727_v4 = vld [vmem:[#allocation8 + $0x150] sm:$0xf0] }
 0x3f0   :  { %4092 = vmatmul.bf16.gmra.mxu0 %v9207_v59  ;;  %v3073_v48 = vadd.f32 %v3072_v3, %v3024_v44  ;;  %v7519_v26 = vld [vmem:[#allocation8 + $0x124] sm:$0xf] }
 0x3f1   :  { %v3218_v34 = vmax.f32 %v3168_v54, 0.0  ;;  %4141 = vmatmul.bf16.gmra.mxu1 %v9208_v45  ;;  %4190 = vmatmul.bf16.gmra.mxu2 %v8584_v19 }
 0x3f2   :  { %4318 = vmatpush.bf16.msra.mxu1 %v6746_v27 }
 0x3f3   :  { %v8677_v38 = vpack.c.bf16 %v3218_v34, %v3214_v35  ;;  %v9210_v35 = vld [vmem:[#allocation48_spill] sm:$0xff] }
 0x3f4   :  { %v3121_v5 = vpop.f32.mrf.mxu2 }
 0x3f5   :  { %v3170_v32 = vpop.f32.mrf.mxu3  ;;  %4234 = vmatmul.bf16.gmra.mxu3 %v8677_v38  ;;  %v3025_v24 = vpop.f32.mrf.mxu0  ;;  %v3122_v18 = vadd.f32 %v3121_v5, %v3073_v48 }
 0x3f6   :  { %v3074_v33 = vpop.f32.mrf.mxu1  ;;  %v3026_v13 = vadd.f32 %v3025_v24, %v8588_v1 }
 0x3f7   :  { %v3171_v51 = vadd.f32 %v3170_v32, %v3122_v18  ;;  %v2982_v32 = vadd.f32 %v8603_v36, %v8601_v41  ;;  %v6730_v41 = vor.u32 %v7523_v15, %v6727_v4  ;;  %v6967_v15 = vld [vmem:[#allocation8 + $0x330] sm:$0xf0] }
 0x3f8   :  { %v3075_v14 = vadd.f32 %v3074_v33, %v3026_v13 }
 0x3f9   :  { %v3222_v3 = vmax.f32 %v3171_v51, 0.0  ;;  %4319 = vmatpush.bf16.msra.mxu1 %v6730_v41  ;;  %v6567_v41 = vld [vmem:[#allocation8 + $0x10] sm:$0xf0] }
 0x3fc   :  { %v3123_v56 = vpop.f32.mrf.mxu2 }
 0x3fd   :  { %v3124_v62 = vadd.f32 %v3123_v56, %v3075_v14  ;;  %v3172_v23 = vpop.f32.mrf.mxu3  ;;  %v3028_v16 = vpop.f32.mrf.mxu0 }
 0x3fe   :  { %v3077_v31 = vpop.f32.mrf.mxu1  ;;  %v3029_v44 = vadd.f32 %v3028_v16, %v8596_v43  ;;  %v7587_v43 = vld [vmem:[#allocation8 + $0x344] sm:$0xf] }
 0x3ff   :  { %v3173_v1 = vadd.f32 %v3172_v23, %v3124_v62  ;;  %v6986_v52 = vor.u32 %v7587_v43, %v6983_v61  ;;  %v7583_v61 = vld [vmem:[#allocation8 + $0x324] sm:$0xf] }
 0x400   :  { %4097 = vmatmul.bf16.gmra.mxu0 %v9209_v57  ;;  %v3078_v13 = vadd.f32 %v3077_v31, %v3029_v44  ;;  %v9211_v31 = vld [vmem:[#allocation61_spill] sm:$0xff] }
 0x401   :  { %v3226_v54 = vmax.f32 %v3173_v1, 0.0  ;;  %4146 = vmatmul.bf16.gmra.mxu1 %v9210_v35  ;;  %4195 = vmatmul.bf16.gmra.mxu2 %v8598_v6 }
 0x402   :  { %4417 = vmatpush.bf16.msra.mxu3 %v6986_v52  ;;  %v6711_v52 = vld [vmem:[#allocation8 + $0x130] sm:$0xf0] }
 0x403   :  { %v8685_v34 = vpack.c.bf16 %v3226_v54, %v3222_v3  ;;  %v9212_v54 = vld [vmem:[#allocation63_spill] sm:$0xff] }
 0x404   :  { %v3126_v5 = vpop.f32.mrf.mxu2 }
 0x405   :  { %v3175_v24 = vpop.f32.mrf.mxu3  ;;  %4239 = vmatmul.bf16.gmra.mxu3 %v8685_v34  ;;  %v3030_v33 = vpop.f32.mrf.mxu0  ;;  %v3127_v22 = vadd.f32 %v3126_v5, %v3078_v13  ;;  %v6839_v5 = vld [vmem:[#allocation8 + $0x230] sm:$0xf0] }
 0x406   :  { %v3079_v48 = vpop.f32.mrf.mxu1  ;;  %v3031_v18 = vadd.f32 %v3030_v33, %v2982_v32  ;;  %v6842_v32 = vor.u32 %v7551_v2, %v6839_v5  ;;  %v6823_v5 = vld [vmem:[#allocation8 + $0x210] sm:$0xf0] }
 0x407   :  { %v3176_v36 = vadd.f32 %v3175_v24, %v3127_v22  ;;  %v2987_v24 = vadd.f32 %v8619_v63, %v8617_v28  ;;  %v6714_v28 = vor.u32 %v7519_v26, %v6711_v52 }
 0x408   :  { %v3080_v14 = vadd.f32 %v3079_v48, %v3031_v18  ;;  %4369 = vmatpush.bf16.msra.mxu2 %v6842_v32 }
 0x409   :  { %v3230_v1 = vmax.f32 %v3176_v36, 0.0  ;;  %v7515_v36 = vld [vmem:[#allocation8 + $0x104] sm:$0xf]  ;;  %4320 = vmatpush.bf16.msra.mxu1 %v6714_v28 }
 0x40c   :  { %v3128_v56 = vpop.f32.mrf.mxu2 }
 0x40d   :  { %v3129_v27 = vadd.f32 %v3128_v56, %v3080_v14  ;;  %v3177_v51 = vpop.f32.mrf.mxu3  ;;  %v3033_v62 = vpop.f32.mrf.mxu0  ;;  %v6970_v14 = vor.u32 %v7583_v61, %v6967_v15  ;;  %v7483_v56 = vld [vmem:[#allocation8 + $0x4] sm:$0xf]  ;;  %v6951_v61 = vld [vmem:[#allocation8 + $0x310] sm:$0xf0] }
 0x40e   :  { %v3082_v23 = vpop.f32.mrf.mxu1  ;;  %v3034_v17 = vadd.f32 %v3033_v62, %v8612_v11  ;;  %v6586_v11 = vor.u32 %v7487_v0, %v6583_v42  ;;  %v2992_v42 = vadd.f32 %v8635_v37, %v8633_v55  ;;  %v9215_v37 = vld [vmem:[#allocation38_spill] sm:$0xff] }
 0x40f   :  { %v3178_v16 = vadd.f32 %v3177_v51, %v3129_v27  ;;  %4418 = vmatpush.bf16.msra.mxu3 %v6970_v14 }
 0x410   :  { %4102 = vmatmul.bf16.gmra.mxu0 %v9211_v31  ;;  %v3083_v18 = vadd.f32 %v3082_v23, %v3034_v17 }
 0x411   :  { %v3234_v3 = vmax.f32 %v3178_v16, 0.0  ;;  %4151 = vmatmul.bf16.gmra.mxu1 %v9212_v54  ;;  %4200 = vmatmul.bf16.gmra.mxu2 %v8614_v46  ;;  %v6570_v16 = vor.u32 %v7483_v56, %v6567_v41 }
 0x412   :  { %4271 = vmatpush.bf16.msra.mxu0 %v6586_v11  ;;  %v7579_v11 = vld [vmem:[#allocation8 + $0x304] sm:$0xf] }
 0x413   :  { %v8694_v44 = vpack.c.bf16 %v3234_v3, %v3230_v1  ;;  %v6695_v1 = vld [vmem:[#allocation8 + $0x110] sm:$0xf0]  ;;  %v7547_v3 = vld [vmem:[#allocation8 + $0x204] sm:$0xf]  ;;  %v6954_v14 = vor.u32 %v7579_v11, %v6951_v61  ;;  %v7610_v11 = vld [vmem:[#allocation8 + $0x3f4] sm:$0xf0] }
 0x414   :  { %v3131_v10 = vpop.f32.mrf.mxu2  ;;  %v6698_v2 = vor.u32 %v7515_v36, %v6695_v1  ;;  %v6826_v32 = vor.u32 %v7547_v3, %v6823_v5  ;;  %v6941_v1 = vld [vmem:[#allocation8 + $0x2e8] sm:$0xf]  ;;  %v7578_v3 = vld [vmem:[#allocation8 + $0x2f4] sm:$0xf0] }
 0x415   :  { %v3180_v33 = vpop.f32.mrf.mxu3  ;;  %4244 = vmatmul.bf16.gmra.mxu3 %v8694_v44  ;;  %v3035_v48 = vpop.f32.mrf.mxu0  ;;  %v3132_v43 = vadd.f32 %v3131_v10, %v3083_v18  ;;  %v9214_v18 = vld [vmem:[#allocation33_spill] sm:$0xff] }
 0x416   :  { %v3084_v13 = vpop.f32.mrf.mxu1  ;;  %v3036_v22 = vadd.f32 %v3035_v48, %v2987_v24  ;;  %4272 = vmatpush.bf16.msra.mxu0 %v6570_v16  ;;  %v9213_v24 = vld [vmem:[#allocation62_spill] sm:$0xff]  ;;  %4321 = vmatpush.bf16.msra.mxu1 %v6698_v2 }
 0x417   :  { %v3181_v27 = vadd.f32 %v3180_v33, %v3132_v43  ;;  %4370 = vmatpush.bf16.msra.mxu2 %v6826_v32  ;;  %4419 = vmatpush.bf16.msra.mxu3 %v6954_v14  ;;  %v9216_v16 = vld [vmem:[#allocation50_spill] sm:$0xff]  ;;  %v2997_v32 = vadd.f32 %v8651_v53, %v8649_v21 }
 0x418   :  { %v3085_v4 = vadd.f32 %v3084_v13, %v3036_v22  ;;  %v8718_v14 = vld [vmem:[#allocation10] sm:$0xf] }
 0x419   :  { %v3238_v48 = vmax.f32 %v3181_v27, 0.0  ;;  %v8721_v53 = vperm.slane %v8718_v14, 0 }
 0x41c   :  { %v3133_v63 = vpop.f32.mrf.mxu2 }
 0x41d   :  { %v3134_v51 = vadd.f32 %v3133_v63, %v3085_v4  ;;  %v3182_v62 = vpop.f32.mrf.mxu3  ;;  %v3038_v23 = vpop.f32.mrf.mxu0 }
 0x41e   :  { %v3087_v17 = vpop.f32.mrf.mxu1  ;;  %v3039_v22 = vadd.f32 %v3038_v23, %v8628_v25 }
 0x41f   :  { %v3183_v10 = vadd.f32 %v3182_v62, %v3134_v51 }
 0x420   :  { %4107 = vmatmul.bf16.gmra.mxu0 %v9213_v24  ;;  %v3088_v52 = vadd.f32 %v3087_v17, %v3039_v22  ;;  %v6942_v17 = vor.u32 %v7578_v3, %v6941_v1  ;;  %v6685_v22 = vld [vmem:[#allocation8 + $0xe8] sm:$0xf] }
 0x421   :  { %v3242_v13 = vmax.f32 %v3183_v10, 0.0  ;;  %4156 = vmatmul.bf16.gmra.mxu1 %v9214_v18  ;;  %4205 = vmatmul.bf16.gmra.mxu2 %v8630_v20 }
 0x422   :  { %4559 = vmatpush.bf16.msrb.mxu2 %v6942_v17 }
 0x423   :  { %v8703_v33 = vpack.c.bf16 %v3242_v13, %v3238_v48 }
 0x424   :  { %v3136_v0 = vpop.f32.mrf.mxu2 }
 0x425   :  { %v3185_v26 = vpop.f32.mrf.mxu3  ;;  %4249 = vmatmul.bf16.gmra.mxu3 %v8703_v33  ;;  %v3040_v43 = vpop.f32.mrf.mxu0  ;;  %v3137_v28 = vadd.f32 %v3136_v0, %v3088_v52  ;;  %v7514_v0 = vld [vmem:[#allocation8 + $0xf4] sm:$0xf0]  ;;  %v6813_v52 = vld [vmem:[#allocation8 + $0x1e8] sm:$0xf] }
 0x426   :  { %v3089_v15 = vpop.f32.mrf.mxu1  ;;  %v3041_v4 = vadd.f32 %v3040_v43, %v2992_v42  ;;  %v7069_v42 = vld [vmem:[#allocation8 + $0x3e8] sm:$0xf]  ;;  %v6686_v43 = vor.u32 %v7514_v0, %v6685_v22 }
 0x427   :  { %v3186_v41 = vadd.f32 %v3185_v26, %v3137_v28  ;;  %v6669_v22 = vld [vmem:[#allocation8 + $0xc8] sm:$0xf] }
 0x428   :  { %v3090_v63 = vadd.f32 %v3089_v15, %v3041_v4  ;;  %4461 = vmatpush.bf16.msrb.mxu0 %v6686_v43  ;;  %v7546_v4 = vld [vmem:[#allocation8 + $0x1f4] sm:$0xf0] }
 0x429   :  { %v3246_v62 = vmax.f32 %v3186_v41, 0.0  ;;  %v6814_v21 = vor.u32 %v7546_v4, %v6813_v52  ;;  %v7510_v43 = vld [vmem:[#allocation8 + $0xd4] sm:$0xf0]  ;;  %v6797_v4 = vld [vmem:[#allocation8 + $0x1c8] sm:$0xf] }
 0x42b   :  { %4510 = vmatpush.bf16.msrb.mxu1 %v6814_v21 }
 0x42c   :  { %v3138_v56 = vpop.f32.mrf.mxu2 }
 0x42d   :  { %v3139_v25 = vadd.f32 %v3138_v56, %v3090_v63  ;;  %v3187_v36 = vpop.f32.mrf.mxu3  ;;  %v3043_v27 = vpop.f32.mrf.mxu0 }
 0x42e   :  { %v3092_v51 = vpop.f32.mrf.mxu1  ;;  %v3044_v5 = vadd.f32 %v3043_v27, %v8644_v30  ;;  %v7070_v30 = vor.u32 %v7610_v11, %v7069_v42  ;;  %v7053_v11 = vld [vmem:[#allocation8 + $0x3c8] sm:$0xf] }
 0x42f   :  { %v3188_v55 = vadd.f32 %v3187_v36, %v3139_v25 }
 0x430   :  { %4112 = vmatmul.bf16.gmra.mxu0 %v9215_v37  ;;  %v3093_v61 = vadd.f32 %v3092_v51, %v3044_v5  ;;  %4608 = vmatpush.bf16.msrb.mxu3 %v7070_v30 }
 0x431   :  { %v3250_v23 = vmax.f32 %v3188_v55, 0.0  ;;  %4161 = vmatmul.bf16.gmra.mxu1 %v9216_v16  ;;  %4210 = vmatmul.bf16.gmra.mxu2 %v8646_v29 }
 0x433   :  { %v8712_v2 = vpack.c.bf16 %v3250_v23, %v3246_v62 }
 0x434   :  { %v3141_v10 = vpop.f32.mrf.mxu2 }
 0x435   :  { %v3190_v48 = vpop.f32.mrf.mxu3  ;;  %4254 = vmatmul.bf16.gmra.mxu3 %v8712_v2  ;;  %v3045_v13 = vpop.f32.mrf.mxu0  ;;  %v3142_v28 = vadd.f32 %v3141_v10, %v3093_v61  ;;  %v7606_v61 = vld [vmem:[#allocation8 + $0x3d4] sm:$0xf0] }
 0x436   :  { %v3094_v26 = vpop.f32.mrf.mxu1  ;;  %v3046_v15 = vadd.f32 %v3045_v13, %v2997_v32  ;;  %v7574_v13 = vld [vmem:[#allocation8 + $0x2d4] sm:$0xf0]  ;;  %v7054_v30 = vor.u32 %v7606_v61, %v7053_v11  ;;  %v6781_v61 = vld [vmem:[#allocation8 + $0x1a8] sm:$0xf] }
 0x437   :  { %v3191_v41 = vadd.f32 %v3190_v48, %v3142_v28  ;;  %v6925_v48 = vld [vmem:[#allocation8 + $0x2c8] sm:$0xf]  ;;  %v7542_v28 = vld [vmem:[#allocation8 + $0x1d4] sm:$0xf0] }
 0x438   :  { %v3095_v63 = vadd.f32 %v3094_v26, %v3046_v15  ;;  %v6926_v26 = vor.u32 %v7574_v13, %v6925_v48  ;;  %v6670_v15 = vor.u32 %v7510_v43, %v6669_v22  ;;  %4609 = vmatpush.bf16.msrb.mxu3 %v7054_v30  ;;  %v6798_v21 = vor.u32 %v7542_v28, %v6797_v4  ;;  %v7037_v48 = vld [vmem:[#allocation8 + $0x3a8] sm:$0xf] }
 0x439   :  { %v3254_v1 = vmax.f32 %v3191_v41, 0.0 }
 0x43a   :  { %4560 = vmatpush.bf16.msrb.mxu2 %v6926_v26  ;;  %4462 = vmatpush.bf16.msrb.mxu0 %v6670_v15  ;;  %v7538_v15 = vld [vmem:[#allocation8 + $0x1b4] sm:$0xf0] }
 0x43b   :  { %4511 = vmatpush.bf16.msrb.mxu1 %v6798_v21 }
 0x43c   :  { %v3143_v56 = vpop.f32.mrf.mxu2 }
 0x43d   :  { %v3144_v25 = vadd.f32 %v3143_v56, %v3095_v63  ;;  %v4078_v36 = vpop.f32.mrf.mxu0  ;;  %v3192_v27 = vpop.f32.mrf.mxu3 }
 0x43e   :  { %v4079_v51 = vadd.f32 %v4078_v36, %v8721_v53  ;;  %v4127_v55 = vpop.f32.mrf.mxu1 }
 0x43f   :  { %v3193_v62 = vadd.f32 %v3192_v27, %v3144_v25 }
 0x440   :  { %v4128_v23 = vadd.f32 %v4127_v55, %v4079_v51  ;;  %4273 = vmatmul.bf16.vlgmr.msra.gmra.mxu0 %v9201_v60  ;;  %v6909_v51 = vld [vmem:[#allocation8 + $0x2a8] sm:$0xf]  ;;  %v7570_v55 = vld [vmem:[#allocation8 + $0x2b4] sm:$0xf0] }
 0x441   :  { %v3258_v3 = vmax.f32 %v3193_v62, 0.0  ;;  %4322 = vmatmul.bf16.vlgmr.msra.gmra.mxu1 %v9202_v49  ;;  %4371 = vmatmul.bf16.vlgmr.msra.gmra.mxu2 %v8542_v50 }
 0x443   :  { %v8727_v17 = vpack.c.bf16 %v3258_v3, %v3254_v1 }
 0x444   :  { %v4176_v5 = vpop.f32.mrf.mxu2 }
 0x445   :  { %v4177_v10 = vadd.f32 %v4176_v5, %v4128_v23  ;;  %4259 = vmatmul.bf16.gmra.mxu3 %v8727_v17  ;;  %v4080_v32 = vpop.f32.mrf.mxu0  ;;  %v6910_v23 = vor.u32 %v7570_v55, %v6909_v51  ;;  %v6653_v5 = vld [vmem:[#allocation8 + $0xa8] sm:$0xf] }
 0x446   :  { %v4081_v0 = vadd.f32 %v4080_v32, %v8721_v53  ;;  %v4129_v42 = vpop.f32.mrf.mxu1  ;;  %v7506_v32 = vld [vmem:[#allocation8 + $0xb4] sm:$0xf0]  ;;  %v6893_v55 = vld [vmem:[#allocation8 + $0x288] sm:$0xf] }
 0x447   :  { %4561 = vmatpush.bf16.msrb.mxu2 %v6910_v23 }
 0x448   :  { %v4130_v52 = vadd.f32 %v4129_v42, %v4081_v0  ;;  %v6654_v0 = vor.u32 %v7506_v32, %v6653_v5  ;;  %v7602_v42 = vld [vmem:[#allocation8 + $0x3b4] sm:$0xf0] }
 0x449   :  { %v7038_v26 = vor.u32 %v7602_v42, %v7037_v48 }
 0x44a   :  { %4463 = vmatpush.bf16.msrb.mxu0 %v6654_v0  ;;  %v7021_v0 = vld [vmem:[#allocation8 + $0x388] sm:$0xf] }
 0x44b   :  { %4610 = vmatpush.bf16.msrb.mxu3 %v7038_v26 }
 0x44c   :  { %v4178_v63 = vpop.f32.mrf.mxu2 }
 0x44d   :  { %v4179_v56 = vadd.f32 %v4178_v63, %v4130_v52  ;;  %v4083_v41 = vpop.f32.mrf.mxu0  ;;  %v6782_v52 = vor.u32 %v7538_v15, %v6781_v61 }
 0x44e   :  { %v4084_v25 = vadd.f32 %v4083_v41, %v8721_v53  ;;  %v4132_v36 = vpop.f32.mrf.mxu1 }
 0x44f   :  { %4512 = vmatpush.bf16.msrb.mxu1 %v6782_v52  ;;  %v7534_v52 = vld [vmem:[#allocation8 + $0x194] sm:$0xf0] }
 0x450   :  { %v4133_v27 = vadd.f32 %v4132_v36, %v4084_v25  ;;  %4278 = vmatmul.bf16.gmra.mxu0 %v9203_v40 }
 0x451   :  { %4327 = vmatmul.bf16.gmra.mxu1 %v9204_v9  ;;  %4376 = vmatmul.bf16.gmra.mxu2 %v8556_v12 }
 0x454   :  { %v4181_v62 = vpop.f32.mrf.mxu2 }
 0x455   :  { %v4182_v1 = vadd.f32 %v4181_v62, %v4133_v27  ;;  %4420 = vmatmul.bf16.vlgmr.msra.gmra.mxu3 %v8661_v47  ;;  %v4085_v3 = vpop.f32.mrf.mxu0  ;;  %v7566_v62 = vld [vmem:[#allocation8 + $0x294] sm:$0xf0] }
 0x456   :  { %v4086_v13 = vadd.f32 %v4085_v3, %v8721_v53  ;;  %v4134_v22 = vpop.f32.mrf.mxu1  ;;  %v6894_v3 = vor.u32 %v7566_v62, %v6893_v55 }
 0x458   :  { %v4135_v43 = vadd.f32 %v4134_v22, %v4086_v13  ;;  %v4225_v11 = vpop.f32.mrf.mxu3  ;;  %v6637_v13 = vld [vmem:[#allocation8 + $0x88] sm:$0xf]  ;;  %v7502_v22 = vld [vmem:[#allocation8 + $0x94] sm:$0xf0]  ;;  %4562 = vmatpush.bf16.msrb.mxu2 %v6894_v3 }
 0x459   :  { %v4226_v30 = vadd.f32 %v4225_v11, %v4177_v10  ;;  %v6638_v26 = vor.u32 %v7502_v22, %v6637_v13  ;;  %v7562_v3 = vld [vmem:[#allocation8 + $0x274] sm:$0xf0] }
 0x45b   :  { %v4853_v51 = vmax.f32 %v4226_v30, 0.0  ;;  %4464 = vmatpush.bf16.msrb.mxu0 %v6638_v26  ;;  %v6765_v30 = vld [vmem:[#allocation8 + $0x188] sm:$0xf] }
 0x45c   :  { %v4183_v4 = vpop.f32.mrf.mxu2  ;;  %v7005_v26 = vld [vmem:[#allocation8 + $0x368] sm:$0xf] }
 0x45d   :  { %v4184_v28 = vadd.f32 %v4183_v4, %v4135_v43  ;;  %v4088_v21 = vpop.f32.mrf.mxu0  ;;  %v7598_v43 = vld [vmem:[#allocation8 + $0x394] sm:$0xf0] }
 0x45e   :  { %v4089_v63 = vadd.f32 %v4088_v21, %v8721_v53  ;;  %v4137_v41 = vpop.f32.mrf.mxu1  ;;  %v7022_v11 = vor.u32 %v7598_v43, %v7021_v0  ;;  %v6766_v21 = vor.u32 %v7534_v52, %v6765_v30 }
 0x460   :  { %v4138_v25 = vadd.f32 %v4137_v41, %v4089_v63  ;;  %v4227_v36 = vpop.f32.mrf.mxu3  ;;  %4283 = vmatmul.bf16.gmra.mxu0 %v9205_v58  ;;  %4611 = vmatpush.bf16.msrb.mxu3 %v7022_v11 }
 0x461   :  { %v4228_v27 = vadd.f32 %v4227_v36, %v4179_v56  ;;  %4332 = vmatmul.bf16.gmra.mxu1 %v9206_v39  ;;  %4381 = vmatmul.bf16.gmra.mxu2 %v8570_v8 }
 0x462   :  { %4513 = vmatpush.bf16.msrb.mxu1 %v6766_v21  ;;  %v6749_v21 = vld [vmem:[#allocation8 + $0x168] sm:$0xf] }
 0x463   :  { %v4857_v10 = vmax.f32 %v4228_v27, 0.0 }
 0x464   :  { %v4186_v23 = vpop.f32.mrf.mxu2 }
 0x465   :  { %v8741_v5 = vpack.c.bf16 %v4857_v10, %v4853_v51  ;;  %v4187_v32 = vadd.f32 %v4186_v23, %v4138_v25  ;;  %4425 = vmatmul.bf16.gmra.mxu3 %v8669_v7  ;;  %v4090_v48 = vpop.f32.mrf.mxu0  ;;  %v6877_v23 = vld [vmem:[#allocation8 + $0x268] sm:$0xf] }
 0x466   :  { %v4091_v56 = vadd.f32 %v4090_v48, %v8721_v53  ;;  %v4139_v42 = vpop.f32.mrf.mxu1  ;;  %v6878_v13 = vor.u32 %v7562_v3, %v6877_v23 }
 0x468   :  { %v4140_v61 = vadd.f32 %v4139_v42, %v4091_v56  ;;  %v4230_v15 = vpop.f32.mrf.mxu3  ;;  %v6621_v56 = vld [vmem:[#allocation8 + $0x68] sm:$0xf]  ;;  %v7498_v42 = vld [vmem:[#allocation8 + $0x74] sm:$0xf0]  ;;  %4563 = vmatpush.bf16.msrb.mxu2 %v6878_v13 }
 0x469   :  { %v4231_v4 = vadd.f32 %v4230_v15, %v4182_v1  ;;  %v7594_v15 = vld [vmem:[#allocation8 + $0x374] sm:$0xf0]  ;;  %v6861_v13 = vld [vmem:[#allocation8 + $0x248] sm:$0xf] }
 0x46a   :  { %v7006_v30 = vor.u32 %v7594_v15, %v7005_v26  ;;  %v6989_v15 = vld [vmem:[#allocation8 + $0x348] sm:$0xf] }
 0x46b   :  { %v4861_v62 = vmax.f32 %v4231_v4, 0.0 }
 0x46c   :  { %v4188_v63 = vpop.f32.mrf.mxu2  ;;  %4612 = vmatpush.bf16.msrb.mxu3 %v7006_v30 }
 0x46d   :  { %v4189_v41 = vadd.f32 %v4188_v63, %v4140_v61  ;;  %v4093_v25 = vpop.f32.mrf.mxu0  ;;  %v6622_v61 = vor.u32 %v7498_v42, %v6621_v56  ;;  %v7530_v63 = vld [vmem:[#allocation8 + $0x174] sm:$0xf0] }
 0x46e   :  { %v4094_v36 = vadd.f32 %v4093_v25, %v8721_v53  ;;  %v4142_v27 = vpop.f32.mrf.mxu1 }
 0x46f   :  { %4465 = vmatpush.bf16.msrb.mxu0 %v6622_v61  ;;  %v7494_v61 = vld [vmem:[#allocation8 + $0x54] sm:$0xf0] }
 0x470   :  { %v4143_v51 = vadd.f32 %v4142_v27, %v4094_v36  ;;  %v4232_v10 = vpop.f32.mrf.mxu3  ;;  %4288 = vmatmul.bf16.gmra.mxu0 %v9207_v59  ;;  %v6750_v36 = vor.u32 %v7530_v63, %v6749_v21  ;;  %v7590_v21 = vld [vmem:[#allocation8 + $0x354] sm:$0xf0] }
 0x471   :  { %v4233_v55 = vadd.f32 %v4232_v10, %v4184_v28  ;;  %4337 = vmatmul.bf16.gmra.mxu1 %v9208_v45  ;;  %4386 = vmatmul.bf16.gmra.mxu2 %v8584_v19  ;;  %v6990_v63 = vor.u32 %v7590_v21, %v6989_v15  ;;  %v7490_v21 = vld [vmem:[#allocation8 + $0x34] sm:$0xf0] }
 0x472   :  { %4514 = vmatpush.bf16.msrb.mxu1 %v6750_v36 }
 0x473   :  { %v4865_v1 = vmax.f32 %v4233_v55, 0.0  ;;  %4613 = vmatpush.bf16.msrb.mxu3 %v6990_v63  ;;  %v6973_v63 = vld [vmem:[#allocation8 + $0x328] sm:$0xf] }
 0x474   :  { %v4191_v48 = vpop.f32.mrf.mxu2 }
 0x475   :  { %v4192_v22 = vadd.f32 %v4191_v48, %v4143_v51  ;;  %4430 = vmatmul.bf16.gmra.mxu3 %v8677_v38  ;;  %v4095_v0 = vpop.f32.mrf.mxu0  ;;  %v8750_v43 = vpack.c.bf16 %v4865_v1, %v4861_v62 }
 0x476   :  { %v4096_v28 = vadd.f32 %v4095_v0, %v8721_v53  ;;  %v4144_v11 = vpop.f32.mrf.mxu1  ;;  %v7558_v0 = vld [vmem:[#allocation8 + $0x254] sm:$0xf0] }
 0x477   :  { %v6862_v42 = vor.u32 %v7558_v0, %v6861_v13 }
 0x478   :  { %v4145_v52 = vadd.f32 %v4144_v11, %v4096_v28  ;;  %v4235_v4 = vpop.f32.mrf.mxu3  ;;  %v6605_v11 = vld [vmem:[#allocation8 + $0x48] sm:$0xf] }
 0x479   :  { %v4236_v25 = vadd.f32 %v4235_v4, %v4187_v32  ;;  %4564 = vmatpush.bf16.msrb.mxu2 %v6862_v42  ;;  %v6606_v4 = vor.u32 %v7494_v61, %v6605_v11  ;;  %v7554_v11 = vld [vmem:[#allocation8 + $0x234] sm:$0xf0] }
 0x47b   :  { %v4869_v48 = vmax.f32 %v4236_v25, 0.0  ;;  %4466 = vmatpush.bf16.msrb.mxu0 %v6606_v4  ;;  %v6589_v4 = vld [vmem:[#allocation8 + $0x28] sm:$0xf] }
 0x47c   :  { %v4193_v27 = vpop.f32.mrf.mxu2 }
 0x47d   :  { %v4194_v51 = vadd.f32 %v4193_v27, %v4145_v52  ;;  %v4098_v10 = vpop.f32.mrf.mxu0  ;;  %v6733_v27 = vld [vmem:[#allocation8 + $0x148] sm:$0xf] }
 0x47e   :  { %v4099_v55 = vadd.f32 %v4098_v10, %v8721_v53  ;;  %v4147_v62 = vpop.f32.mrf.mxu1  ;;  %v7526_v10 = vld [vmem:[#allocation8 + $0x154] sm:$0xf0] }
 0x480   :  { %v4148_v1 = vadd.f32 %v4147_v62, %v4099_v55  ;;  %v4237_v23 = vpop.f32.mrf.mxu3  ;;  %4293 = vmatmul.bf16.gmra.mxu0 %v9209_v57  ;;  %v6734_v62 = vor.u32 %v7526_v10, %v6733_v27  ;;  %v6590_v27 = vor.u32 %v7490_v21, %v6589_v4  ;;  %v7586_v10 = vld [vmem:[#allocation8 + $0x334] sm:$0xf0] }
 0x481   :  { %v4238_v3 = vadd.f32 %v4237_v23, %v4189_v41  ;;  %4342 = vmatmul.bf16.gmra.mxu1 %v9210_v35  ;;  %4391 = vmatmul.bf16.gmra.mxu2 %v8598_v6 }
 0x482   :  { %4515 = vmatpush.bf16.msrb.mxu1 %v6734_v62  ;;  %4467 = vmatpush.bf16.msrb.mxu0 %v6590_v27 }
 0x483   :  { %v4873_v32 = vmax.f32 %v4238_v3, 0.0 }
 0x484   :  { %v4196_v56 = vpop.f32.mrf.mxu2 }
 0x485   :  { %v4197_v26 = vadd.f32 %v4196_v56, %v4148_v1  ;;  %4435 = vmatmul.bf16.gmra.mxu3 %v8685_v34  ;;  %v4100_v28 = vpop.f32.mrf.mxu0  ;;  %v8758_v30 = vpack.c.bf16 %v4873_v32, %v4869_v48 }
 0x486   :  { %v4101_v41 = vadd.f32 %v4100_v28, %v8721_v53  ;;  %v4149_v52 = vpop.f32.mrf.mxu1  ;;  %v6845_v28 = vld [vmem:[#allocation8 + $0x228] sm:$0xf] }
 0x487   :  { %v6846_v15 = vor.u32 %v7554_v11, %v6845_v28 }
 0x488   :  { %v4150_v25 = vadd.f32 %v4149_v52, %v4101_v41  ;;  %v4240_v36 = vpop.f32.mrf.mxu3 }
 0x489   :  { %v4241_v55 = vadd.f32 %v4240_v36, %v4192_v22  ;;  %4565 = vmatpush.bf16.msrb.mxu2 %v6846_v15  ;;  %v7518_v15 = vld [vmem:[#allocation8 + $0x114] sm:$0xf0] }
 0x48b   :  { %v4877_v42 = vmax.f32 %v4241_v55, 0.0  ;;  %v6974_v55 = vor.u32 %v7586_v10, %v6973_v63 }
 0x48c   :  { %v4198_v1 = vpop.f32.mrf.mxu2 }
 0x48d   :  { %v4199_v23 = vadd.f32 %v4198_v1, %v4150_v25  ;;  %v4103_v3 = vpop.f32.mrf.mxu0  ;;  %4614 = vmatpush.bf16.msrb.mxu3 %v6974_v55 }
 0x48e   :  { %v4104_v48 = vadd.f32 %v4103_v3, %v8721_v53  ;;  %v4152_v32 = vpop.f32.mrf.mxu1  ;;  %v6717_v3 = vld [vmem:[#allocation8 + $0x128] sm:$0xf] }
 0x490   :  { %v4153_v13 = vadd.f32 %v4152_v32, %v4104_v48  ;;  %v4242_v0 = vpop.f32.mrf.mxu3  ;;  %4298 = vmatmul.bf16.gmra.mxu0 %v9211_v31  ;;  %v7522_v48 = vld [vmem:[#allocation8 + $0x134] sm:$0xf0] }
 0x491   :  { %v4243_v56 = vadd.f32 %v4242_v0, %v4194_v51  ;;  %4347 = vmatmul.bf16.gmra.mxu1 %v9212_v54  ;;  %4396 = vmatmul.bf16.gmra.mxu2 %v8614_v46 }
 0x493   :  { %v4881_v22 = vmax.f32 %v4243_v56, 0.0  ;;  %v6573_v56 = vld [vmem:[#allocation8 + $0x8] sm:$0xf] }
 0x494   :  { %v4201_v61 = vpop.f32.mrf.mxu2 }
 0x495   :  { %v4202_v41 = vadd.f32 %v4201_v61, %v4153_v13  ;;  %4440 = vmatmul.bf16.gmra.mxu3 %v8694_v44  ;;  %v4105_v52 = vpop.f32.mrf.mxu0  ;;  %v8766_v25 = vpack.c.bf16 %v4881_v22, %v4877_v42  ;;  %v6718_v13 = vor.u32 %v7522_v48, %v6717_v3  ;;  %v7486_v42 = vld [vmem:[#allocation8 + $0x14] sm:$0xf0]  ;;  %v6701_v22 = vld [vmem:[#allocation8 + $0x108] sm:$0xf] }
 0x496   :  { %v4106_v51 = vadd.f32 %v4105_v52, %v8721_v53  ;;  %v4154_v36 = vpop.f32.mrf.mxu1  ;;  %v6574_v61 = vor.u32 %v7486_v42, %v6573_v56  ;;  %v6829_v52 = vld [vmem:[#allocation8 + $0x208] sm:$0xf]  ;;  %v6702_v63 = vor.u32 %v7518_v15, %v6701_v22 }
 0x497   :  { %9217 = vst [vmem:[#allocation36_spill] sm:$0xff] %v8766_v25  ;;  %4516 = vmatpush.bf16.msrb.mxu1 %v6718_v13  ;;  %v6957_v13 = vld [vmem:[#allocation8 + $0x308] sm:$0xf] }
 0x498   :  { %v4155_v62 = vadd.f32 %v4154_v36, %v4106_v51  ;;  %v4245_v1 = vpop.f32.mrf.mxu3  ;;  %v7550_v51 = vld [vmem:[#allocation8 + $0x214] sm:$0xf0]  ;;  %4468 = vmatpush.bf16.msrb.mxu0 %v6574_v61 }
 0x499   :  { %v4246_v32 = vadd.f32 %v4245_v1, %v4197_v26  ;;  %v6830_v36 = vor.u32 %v7550_v51, %v6829_v52 }
 0x49b   :  { %4517 = vmatpush.bf16.msrb.mxu1 %v6702_v63  ;;  %4566 = vmatpush.bf16.msrb.mxu2 %v6830_v36  ;;  %v4885_v55 = vmax.f32 %v4246_v32, 0.0 }
 0x49c   :  { %v4203_v0 = vpop.f32.mrf.mxu2 }
 0x49d   :  { %v4204_v28 = vadd.f32 %v4203_v0, %v4155_v62  ;;  %v4108_v11 = vpop.f32.mrf.mxu0  ;;  %v7582_v0 = vld [vmem:[#allocation8 + $0x314] sm:$0xf0] }
 0x49e   :  { %v4109_v4 = vadd.f32 %v4108_v11, %v8721_v53  ;;  %v4157_v21 = vpop.f32.mrf.mxu1 }
 0x4a0   :  { %v4158_v26 = vadd.f32 %v4157_v21, %v4109_v4  ;;  %v4247_v27 = vpop.f32.mrf.mxu3  ;;  %4303 = vmatmul.bf16.gmra.mxu0 %v9213_v24 }
 0x4a1   :  { %v4248_v10 = vadd.f32 %v4247_v27, %v4199_v23  ;;  %4352 = vmatmul.bf16.gmra.mxu1 %v9214_v18  ;;  %4401 = vmatmul.bf16.gmra.mxu2 %v8630_v20  ;;  %v6958_v23 = vor.u32 %v7582_v0, %v6957_v13  ;;  %v7512_v0 = vld [vmem:[#allocation8 + $0xec] sm:$0xf] }
 0x4a3   :  { %v4889_v62 = vmax.f32 %v4248_v10, 0.0  ;;  %4615 = vmatpush.bf16.msrb.mxu3 %v6958_v23 }
 0x4a4   :  { %v4206_v1 = vpop.f32.mrf.mxu2 }
 0x4a5   :  { %v4207_v3 = vadd.f32 %v4206_v1, %v4158_v26  ;;  %4445 = vmatmul.bf16.gmra.mxu3 %v8703_v33  ;;  %v4110_v48 = vpop.f32.mrf.mxu0  ;;  %v8774_v56 = vpack.c.bf16 %v4889_v62, %v4885_v55  ;;  %v7576_v55 = vld [vmem:[#allocation8 + $0x2ec] sm:$0xf]  ;;  %v6943_v62 = vld [vmem:[#allocation8 + $0x2f8] sm:$0xf0] }
 0x4a6   :  { %v4111_v42 = vadd.f32 %v4110_v48, %v8721_v53  ;;  %v4159_v22 = vpop.f32.mrf.mxu1  ;;  %v6946_v1 = vor.u32 %v7576_v55, %v6943_v62  ;;  %v8786_v55 = vperm.slane %v8718_v14, 1 }
 0x4a7   :  { %9218 = vst [vmem:[#allocation39_spill] sm:$0xff] %v8774_v56 }
 0x4a8   :  { %v4160_v11 = vadd.f32 %v4159_v22, %v4111_v42  ;;  %v4250_v61 = vpop.f32.mrf.mxu3  ;;  %v6687_v42 = vld [vmem:[#allocation8 + $0xf8] sm:$0xf0]  ;;  %v7608_v22 = vld [vmem:[#allocation8 + $0x3ec] sm:$0xf]  ;;  %4755 = vmatpush.bf16.msra.mxu2 %v6946_v1 }
 0x4a9   :  { %v4251_v15 = vadd.f32 %v4250_v61, %v4202_v41  ;;  %v6690_v61 = vor.u32 %v7512_v0, %v6687_v42 }
 0x4ab   :  { %v4893_v27 = vmax.f32 %v4251_v15, 0.0  ;;  %v7071_v15 = vld [vmem:[#allocation8 + $0x3f8] sm:$0xf0]  ;;  %4657 = vmatpush.bf16.msra.mxu0 %v6690_v61 }
 0x4ac   :  { %v4208_v52 = vpop.f32.mrf.mxu2  ;;  %v6927_v61 = vld [vmem:[#allocation8 + $0x2d8] sm:$0xf0] }
 0x4ad   :  { %v4209_v32 = vadd.f32 %v4208_v52, %v4160_v11  ;;  %v4113_v4 = vpop.f32.mrf.mxu0  ;;  %v7074_v52 = vor.u32 %v7608_v22, %v7071_v15  ;;  %v7508_v15 = vld [vmem:[#allocation8 + $0xcc] sm:$0xf] }
 0x4ae   :  { %v4114_v21 = vadd.f32 %v4113_v4, %v8721_v53  ;;  %v4162_v63 = vpop.f32.mrf.mxu1 }
 0x4af   :  { %4804 = vmatpush.bf16.msra.mxu3 %v7074_v52 }
 0x4b0   :  { %v4163_v51 = vadd.f32 %v4162_v63, %v4114_v21  ;;  %v4252_v36 = vpop.f32.mrf.mxu3  ;;  %4308 = vmatmul.bf16.gmra.mxu0 %v9215_v37  ;;  %v7544_v63 = vld [vmem:[#allocation8 + $0x1ec] sm:$0xf] }
 0x4b1   :  { %v4253_v26 = vadd.f32 %v4252_v36, %v4204_v28  ;;  %4357 = vmatmul.bf16.gmra.mxu1 %v9216_v16  ;;  %4406 = vmatmul.bf16.gmra.mxu2 %v8646_v29 }
 0x4b3   :  { %v4897_v10 = vmax.f32 %v4253_v26, 0.0 }
 0x4b4   :  { %v4211_v41 = vpop.f32.mrf.mxu2 }
 0x4b5   :  { %v4212_v48 = vadd.f32 %v4211_v41, %v4163_v51  ;;  %4450 = vmatmul.bf16.gmra.mxu3 %v8712_v2  ;;  %v4115_v13 = vpop.f32.mrf.mxu0  ;;  %v8782_v23 = vpack.c.bf16 %v4897_v10, %v4893_v27  ;;  %v6815_v51 = vld [vmem:[#allocation8 + $0x1f8] sm:$0xf0] }
 0x4b6   :  { %v4116_v28 = vadd.f32 %v4115_v13, %v8721_v53  ;;  %v4164_v11 = vpop.f32.mrf.mxu1  ;;  %v6818_v26 = vor.u32 %v7544_v63, %v6815_v51  ;;  %v6671_v63 = vld [vmem:[#allocation8 + $0xd8] sm:$0xf0]  ;;  %v7604_v51 = vld [vmem:[#allocation8 + $0x3cc] sm:$0xf] }
 0x4b7   :  { %9219 = vst [vmem:[#allocation19_spill] sm:$0xff] %v8782_v23 }
 0x4b8   :  { %v4165_v4 = vadd.f32 %v4164_v11, %v4116_v28  ;;  %v4255_v21 = vpop.f32.mrf.mxu3  ;;  %4706 = vmatpush.bf16.msra.mxu1 %v6818_v26  ;;  %v7572_v11 = vld [vmem:[#allocation8 + $0x2cc] sm:$0xf]  ;;  %v7055_v26 = vld [vmem:[#allocation8 + $0x3d8] sm:$0xf0] }
 0x4b9   :  { %v4256_v36 = vadd.f32 %v4255_v21, %v4207_v3 }
 0x4bb   :  { %v4901_v3 = vmax.f32 %v4256_v36, 0.0  ;;  %v7058_v36 = vor.u32 %v7604_v51, %v7055_v26 }
 0x4bc   :  { %v4213_v27 = vpop.f32.mrf.mxu2 }
 0x4bd   :  { %v4214_v10 = vadd.f32 %v4213_v27, %v4165_v4  ;;  %v4274_v53 = vpop.f32.mrf.mxu0  ;;  %v6674_v27 = vor.u32 %v7508_v15, %v6671_v63  ;;  %4805 = vmatpush.bf16.msra.mxu3 %v7058_v36  ;;  %v7504_v36 = vld [vmem:[#allocation8 + $0xac] sm:$0xf] }
 0x4be   :  { %v4275_v62 = vadd.f32 %v4274_v53, %v8786_v55  ;;  %v4323_v41 = vpop.f32.mrf.mxu1 }
 0x4bf   :  { %4658 = vmatpush.bf16.msra.mxu0 %v6674_v27 }
 0x4c0   :  { %v4324_v1 = vadd.f32 %v4323_v41, %v4275_v62  ;;  %v4257_v13 = vpop.f32.mrf.mxu3  ;;  %4469 = vmatmul.bf16.vlgmr.msrb.gmra.mxu0 %v9201_v60  ;;  %v7540_v41 = vld [vmem:[#allocation8 + $0x1cc] sm:$0xf] }
 0x4c1   :  { %v4258_v0 = vadd.f32 %v4257_v13, %v4209_v32  ;;  %4518 = vmatmul.bf16.vlgmr.msrb.gmra.mxu1 %v9202_v49  ;;  %4567 = vmatmul.bf16.vlgmr.msrb.gmra.mxu2 %v8542_v50  ;;  %v6930_v32 = vor.u32 %v7572_v11, %v6927_v61 }
 0x4c3   :  { %v4905_v42 = vmax.f32 %v4258_v0, 0.0  ;;  %4756 = vmatpush.bf16.msra.mxu2 %v6930_v32  ;;  %v6911_v32 = vld [vmem:[#allocation8 + $0x2b8] sm:$0xf0] }
 0x4c4   :  { %v4372_v14 = vpop.f32.mrf.mxu2 }
 0x4c5   :  { %v4373_v22 = vadd.f32 %v4372_v14, %v4324_v1  ;;  %4455 = vmatmul.bf16.gmra.mxu3 %v8727_v17  ;;  %v4276_v28 = vpop.f32.mrf.mxu0  ;;  %v8793_v52 = vpack.c.bf16 %v4905_v42, %v4901_v3  ;;  %v6799_v1 = vld [vmem:[#allocation8 + $0x1d8] sm:$0xf0] }
 0x4c6   :  { %v4277_v4 = vadd.f32 %v4276_v28, %v8786_v55  ;;  %v4325_v21 = vpop.f32.mrf.mxu1  ;;  %v6802_v0 = vor.u32 %v7540_v41, %v6799_v1 }
 0x4c7   :  { %9220 = vst [vmem:[#allocation20_spill] sm:$0xff] %v8793_v52 }
 0x4c8   :  { %v4326_v53 = vadd.f32 %v4325_v21, %v4277_v4  ;;  %v4260_v62 = vpop.f32.mrf.mxu3  ;;  %4707 = vmatpush.bf16.msra.mxu1 %v6802_v0  ;;  %v7568_v21 = vld [vmem:[#allocation8 + $0x2ac] sm:$0xf] }
 0x4c9   :  { %v4261_v13 = vadd.f32 %v4260_v62, %v4212_v48  ;;  %v6914_v51 = vor.u32 %v7568_v21, %v6911_v32  ;;  %v7600_v62 = vld [vmem:[#allocation8 + $0x3ac] sm:$0xf] }
 0x4cb   :  { %v4909_v48 = vmax.f32 %v4261_v13, 0.0  ;;  %4757 = vmatpush.bf16.msra.mxu2 %v6914_v51  ;;  %v7039_v13 = vld [vmem:[#allocation8 + $0x3b8] sm:$0xf0] }
 0x4cc   :  { %v4374_v3 = vpop.f32.mrf.mxu2  ;;  %v7042_v0 = vor.u32 %v7600_v62, %v7039_v13  ;;  %v7564_v62 = vld [vmem:[#allocation8 + $0x28c] sm:$0xf] }
 0x4cd   :  { %v4375_v42 = vadd.f32 %v4374_v3, %v4326_v53  ;;  %v4279_v14 = vpop.f32.mrf.mxu0  ;;  %v6655_v53 = vld [vmem:[#allocation8 + $0xb8] sm:$0xf0] }
 0x4ce   :  { %v4280_v28 = vadd.f32 %v4279_v14, %v8786_v55  ;;  %v4328_v11 = vpop.f32.mrf.mxu1  ;;  %v6658_v1 = vor.u32 %v7504_v36, %v6655_v53  ;;  %4806 = vmatpush.bf16.msra.mxu3 %v7042_v0 }
 0x4d0   :  { %v4329_v61 = vadd.f32 %v4328_v11, %v4280_v28  ;;  %v4262_v52 = vpop.f32.mrf.mxu3  ;;  %4474 = vmatmul.bf16.gmra.mxu0 %v9203_v40  ;;  %v7536_v28 = vld [vmem:[#allocation8 + $0x1ac] sm:$0xf]  ;;  %v6783_v11 = vld [vmem:[#allocation8 + $0x1b8] sm:$0xf0] }
 0x4d1   :  { %v4263_v15 = vadd.f32 %v4262_v52, %v4214_v10  ;;  %4523 = vmatmul.bf16.gmra.mxu1 %v9204_v9  ;;  %4572 = vmatmul.bf16.gmra.mxu2 %v8556_v12 }
 0x4d2   :  { %4659 = vmatpush.bf16.msra.mxu0 %v6658_v1 }
 0x4d3   :  { %v4913_v4 = vmax.f32 %v4263_v15, 0.0  ;;  %v6786_v15 = vor.u32 %v7536_v28, %v6783_v11  ;;  %v6639_v28 = vld [vmem:[#allocation8 + $0x98] sm:$0xf0]  ;;  %v7596_v11 = vld [vmem:[#allocation8 + $0x38c] sm:$0xf] }
 0x4d4   :  { %v4377_v63 = vpop.f32.mrf.mxu2 }
 0x4d5   :  { %v4378_v26 = vadd.f32 %v4377_v63, %v4329_v61  ;;  %4616 = vmatmul.bf16.vlgmr.msrb.gmra.mxu3 %v8661_v47  ;;  %v4281_v27 = vpop.f32.mrf.mxu0  ;;  %v8801_v41 = vpack.c.bf16 %v4913_v4, %v4909_v48  ;;  %4708 = vmatpush.bf16.msra.mxu1 %v6786_v15 }
 0x4d6   :  { %v4282_v10 = vadd.f32 %v4281_v27, %v8786_v55  ;;  %v4330_v52 = vpop.f32.mrf.mxu1 }
 0x4d7   :  { %9221 = vst [vmem:[#allocation41_spill] sm:$0xff] %v8801_v41 }
 0x4d8   :  { %v4331_v3 = vadd.f32 %v4330_v52, %v4282_v10  ;;  %v4421_v14 = vpop.f32.mrf.mxu3  ;;  %v6895_v10 = vld [vmem:[#allocation8 + $0x298] sm:$0xf0] }
 0x4d9   :  { %v4422_v61 = vadd.f32 %v4421_v14, %v4373_v22  ;;  %v6898_v1 = vor.u32 %v7564_v62, %v6895_v10  ;;  %v7500_v14 = vld [vmem:[#allocation8 + $0x8c] sm:$0xf] }
 0x4db   :  { %v4854_v53 = vmax.f32 %v4422_v61, 0.0  ;;  %4758 = vmatpush.bf16.msra.mxu2 %v6898_v1  ;;  %v7023_v61 = vld [vmem:[#allocation8 + $0x398] sm:$0xf0] }
 0x4dc   :  { %v4379_v21 = vpop.f32.mrf.mxu2 }
 0x4dd   :  { %v4380_v32 = vadd.f32 %v4379_v21, %v4331_v3  ;;  %v4284_v48 = vpop.f32.mrf.mxu0  ;;  %v6642_v21 = vor.u32 %v7500_v14, %v6639_v28 }
 0x4de   :  { %v4285_v4 = vadd.f32 %v4284_v48, %v8786_v55  ;;  %v4333_v63 = vpop.f32.mrf.mxu1  ;;  %v7026_v48 = vor.u32 %v7596_v11, %v7023_v61  ;;  %v7560_v11 = vld [vmem:[#allocation8 + $0x26c] sm:$0xf] }
 0x4df   :  { %4660 = vmatpush.bf16.msra.mxu0 %v6642_v21 }
 0x4e0   :  { %v4334_v27 = vadd.f32 %v4333_v63, %v4285_v4  ;;  %v4423_v51 = vpop.f32.mrf.mxu3  ;;  %4479 = vmatmul.bf16.gmra.mxu0 %v9205_v58  ;;  %4807 = vmatpush.bf16.msra.mxu3 %v7026_v48 }
 0x4e1   :  { %v4424_v36 = vadd.f32 %v4423_v51, %v4375_v42  ;;  %4528 = vmatmul.bf16.gmra.mxu1 %v9206_v39  ;;  %4577 = vmatmul.bf16.gmra.mxu2 %v8570_v8  ;;  %v7532_v51 = vld [vmem:[#allocation8 + $0x18c] sm:$0xf] }
 0x4e3   :  { %v4858_v22 = vmax.f32 %v4424_v36, 0.0  ;;  %v6767_v36 = vld [vmem:[#allocation8 + $0x198] sm:$0xf0] }
 0x4e4   :  { %v4382_v52 = vpop.f32.mrf.mxu2 }
 0x4e5   :  { %v8808_v13 = vpack.c.bf16 %v4858_v22, %v4854_v53  ;;  %v4383_v0 = vadd.f32 %v4382_v52, %v4334_v27  ;;  %4621 = vmatmul.bf16.gmra.mxu3 %v8669_v7  ;;  %v4286_v3 = vpop.f32.mrf.mxu0  ;;  %v6770_v27 = vor.u32 %v7532_v51, %v6767_v36  ;;  %v7592_v51 = vld [vmem:[#allocation8 + $0x36c] sm:$0xf] }
 0x4e6   :  { %v4287_v42 = vadd.f32 %v4286_v3, %v8786_v55  ;;  %v4335_v15 = vpop.f32.mrf.mxu1 }
 0x4e7   :  { %4709 = vmatpush.bf16.msra.mxu1 %v6770_v27 }
 0x4e8   :  { %v4336_v4 = vadd.f32 %v4335_v15, %v4287_v42  ;;  %v4426_v63 = vpop.f32.mrf.mxu3  ;;  %v6879_v42 = vld [vmem:[#allocation8 + $0x278] sm:$0xf0] }
 0x4e9   :  { %v4427_v53 = vadd.f32 %v4426_v63, %v4378_v26  ;;  %v6882_v21 = vor.u32 %v7560_v11, %v6879_v42  ;;  %v6623_v63 = vld [vmem:[#allocation8 + $0x78] sm:$0xf0] }
 0x4eb   :  { %v4862_v28 = vmax.f32 %v4427_v53, 0.0  ;;  %4759 = vmatpush.bf16.msra.mxu2 %v6882_v21  ;;  %v7007_v53 = vld [vmem:[#allocation8 + $0x378] sm:$0xf0] }
 0x4ec   :  { %v4384_v22 = vpop.f32.mrf.mxu2 }
 0x4ed   :  { %v4385_v62 = vadd.f32 %v4384_v22, %v4336_v4  ;;  %v4289_v10 = vpop.f32.mrf.mxu0  ;;  %v7496_v4 = vld [vmem:[#allocation8 + $0x6c] sm:$0xf] }
 0x4ee   :  { %v4290_v52 = vadd.f32 %v4289_v10, %v8786_v55  ;;  %v4338_v3 = vpop.f32.mrf.mxu1  ;;  %v6626_v22 = vor.u32 %v7496_v4, %v6623_v63  ;;  %v7010_v10 = vor.u32 %v7592_v51, %v7007_v53  ;;  %v7556_v51 = vld [vmem:[#allocation8 + $0x24c] sm:$0xf] }
 0x4f0   :  { %v4339_v41 = vadd.f32 %v4338_v3, %v4290_v52  ;;  %v4428_v1 = vpop.f32.mrf.mxu3  ;;  %4484 = vmatmul.bf16.gmra.mxu0 %v9207_v59  ;;  %4808 = vmatpush.bf16.msra.mxu3 %v7010_v10 }
 0x4f1   :  { %v4429_v14 = vadd.f32 %v4428_v1, %v4380_v32  ;;  %4533 = vmatmul.bf16.gmra.mxu1 %v9208_v45  ;;  %4582 = vmatmul.bf16.gmra.mxu2 %v8584_v19  ;;  %v7528_v1 = vld [vmem:[#allocation8 + $0x16c] sm:$0xf] }
 0x4f2   :  { %4661 = vmatpush.bf16.msra.mxu0 %v6626_v22 }
 0x4f3   :  { %v4866_v26 = vmax.f32 %v4429_v14, 0.0 }
 0x4f4   :  { %v4387_v15 = vpop.f32.mrf.mxu2 }
 0x4f5   :  { %v4388_v61 = vadd.f32 %v4387_v15, %v4339_v41  ;;  %4626 = vmatmul.bf16.gmra.mxu3 %v8677_v38  ;;  %v4291_v48 = vpop.f32.mrf.mxu0  ;;  %v8817_v36 = vpack.c.bf16 %v4866_v26, %v4862_v28  ;;  %v6751_v41 = vld [vmem:[#allocation8 + $0x178] sm:$0xf0] }
 0x4f6   :  { %v4292_v32 = vadd.f32 %v4291_v48, %v8786_v55  ;;  %v4340_v27 = vpop.f32.mrf.mxu1  ;;  %v6754_v11 = vor.u32 %v7528_v1, %v6751_v41  ;;  %v7588_v1 = vld [vmem:[#allocation8 + $0x34c] sm:$0xf] }
 0x4f8   :  { %v4341_v52 = vadd.f32 %v4340_v27, %v4292_v32  ;;  %v4431_v3 = vpop.f32.mrf.mxu3  ;;  %4710 = vmatpush.bf16.msra.mxu1 %v6754_v11  ;;  %v6863_v32 = vld [vmem:[#allocation8 + $0x258] sm:$0xf0] }
 0x4f9   :  { %v4432_v14 = vadd.f32 %v4431_v3, %v4383_v0  ;;  %v6866_v22 = vor.u32 %v7556_v51, %v6863_v32  ;;  %v6607_v3 = vld [vmem:[#allocation8 + $0x58] sm:$0xf0] }
 0x4fb   :  { %v4870_v63 = vmax.f32 %v4432_v14, 0.0  ;;  %4760 = vmatpush.bf16.msra.mxu2 %v6866_v22  ;;  %v6991_v14 = vld [vmem:[#allocation8 + $0x358] sm:$0xf0] }
 0x4fc   :  { %v4389_v42 = vpop.f32.mrf.mxu2 }
 0x4fd   :  { %v4390_v15 = vadd.f32 %v4389_v42, %v4341_v52  ;;  %v4294_v28 = vpop.f32.mrf.mxu0  ;;  %v7492_v52 = vld [vmem:[#allocation8 + $0x4c] sm:$0xf] }
 0x4fe   :  { %v4295_v26 = vadd.f32 %v4294_v28, %v8786_v55  ;;  %v4343_v48 = vpop.f32.mrf.mxu1  ;;  %v6610_v42 = vor.u32 %v7492_v52, %v6607_v3  ;;  %v6994_v28 = vor.u32 %v7588_v1, %v6991_v14  ;;  %v7552_v1 = vld [vmem:[#allocation8 + $0x22c] sm:$0xf] }
 0x500   :  { %v4344_v23 = vadd.f32 %v4343_v48, %v4295_v26  ;;  %v4433_v21 = vpop.f32.mrf.mxu3  ;;  %4489 = vmatmul.bf16.gmra.mxu0 %v9209_v57  ;;  %4809 = vmatpush.bf16.msra.mxu3 %v6994_v28 }
 0x501   :  { %v4434_v4 = vadd.f32 %v4433_v21, %v4385_v62  ;;  %4538 = vmatmul.bf16.gmra.mxu1 %v9210_v35  ;;  %4587 = vmatmul.bf16.gmra.mxu2 %v8598_v6  ;;  %v7524_v21 = vld [vmem:[#allocation8 + $0x14c] sm:$0xf] }
 0x502   :  { %4662 = vmatpush.bf16.msra.mxu0 %v6610_v42 }
 0x503   :  { %v4874_v0 = vmax.f32 %v4434_v4, 0.0 }
 0x504   :  { %v4392_v27 = vpop.f32.mrf.mxu2 }
 0x505   :  { %v4393_v53 = vadd.f32 %v4392_v27, %v4344_v23  ;;  %4631 = vmatmul.bf16.gmra.mxu3 %v8685_v34  ;;  %v4296_v10 = vpop.f32.mrf.mxu0  ;;  %v8825_v41 = vpack.c.bf16 %v4874_v0, %v4870_v63  ;;  %v6735_v23 = vld [vmem:[#allocation8 + $0x158] sm:$0xf0] }
 0x506   :  { %v4297_v62 = vadd.f32 %v4296_v10, %v8786_v55  ;;  %v4345_v11 = vpop.f32.mrf.mxu1  ;;  %v6738_v51 = vor.u32 %v7524_v21, %v6735_v23  ;;  %v7584_v21 = vld [vmem:[#allocation8 + $0x32c] sm:$0xf] }
 0x508   :  { %v4346_v26 = vadd.f32 %v4345_v11, %v4297_v62  ;;  %v4436_v48 = vpop.f32.mrf.mxu3  ;;  %4711 = vmatpush.bf16.msra.mxu1 %v6738_v51  ;;  %v6847_v62 = vld [vmem:[#allocation8 + $0x238] sm:$0xf0] }
 0x509   :  { %v4437_v4 = vadd.f32 %v4436_v48, %v4388_v61  ;;  %v6850_v42 = vor.u32 %v7552_v1, %v6847_v62  ;;  %v6591_v48 = vld [vmem:[#allocation8 + $0x38] sm:$0xf0] }
 0x50b   :  { %v4878_v3 = vmax.f32 %v4437_v4, 0.0  ;;  %4761 = vmatpush.bf16.msra.mxu2 %v6850_v42  ;;  %v6975_v4 = vld [vmem:[#allocation8 + $0x338] sm:$0xf0] }
 0x50c   :  { %v4394_v32 = vpop.f32.mrf.mxu2  ;;  %v6703_v42 = vld [vmem:[#allocation8 + $0x118] sm:$0xf0] }
 0x50d   :  { %v4395_v27 = vadd.f32 %v4394_v32, %v4346_v26  ;;  %v4299_v63 = vpop.f32.mrf.mxu0  ;;  %v7488_v26 = vld [vmem:[#allocation8 + $0x2c] sm:$0xf] }
 0x50e   :  { %v4300_v0 = vadd.f32 %v4299_v63, %v8786_v55  ;;  %v4348_v10 = vpop.f32.mrf.mxu1  ;;  %v6594_v32 = vor.u32 %v7488_v26, %v6591_v48  ;;  %v6978_v63 = vor.u32 %v7584_v21, %v6975_v4  ;;  %v7548_v26 = vld [vmem:[#allocation8 + $0x20c] sm:$0xf] }
 0x510   :  { %v4349_v56 = vadd.f32 %v4348_v10, %v4300_v0  ;;  %v4438_v22 = vpop.f32.mrf.mxu3  ;;  %4494 = vmatmul.bf16.gmra.mxu0 %v9211_v31  ;;  %4810 = vmatpush.bf16.msra.mxu3 %v6978_v63 }
 0x511   :  { %v4439_v52 = vadd.f32 %v4438_v22, %v4390_v15  ;;  %4543 = vmatmul.bf16.gmra.mxu1 %v9212_v54  ;;  %4592 = vmatmul.bf16.gmra.mxu2 %v8614_v46  ;;  %v7520_v22 = vld [vmem:[#allocation8 + $0x12c] sm:$0xf] }
 0x512   :  { %4663 = vmatpush.bf16.msra.mxu0 %v6594_v32 }
 0x513   :  { %v4882_v61 = vmax.f32 %v4439_v52, 0.0 }
 0x514   :  { %v4397_v11 = vpop.f32.mrf.mxu2 }
 0x515   :  { %v4398_v14 = vadd.f32 %v4397_v11, %v4349_v56  ;;  %4636 = vmatmul.bf16.gmra.mxu3 %v8694_v44  ;;  %v4301_v28 = vpop.f32.mrf.mxu0  ;;  %v8833_v23 = vpack.c.bf16 %v4882_v61, %v4878_v3  ;;  %v6719_v56 = vld [vmem:[#allocation8 + $0x138] sm:$0xf0]  ;;  %v7484_v11 = vld [vmem:[#allocation8 + $0xc] sm:$0xf] }
 0x516   :  { %v4302_v15 = vadd.f32 %v4301_v28, %v8786_v55  ;;  %v4350_v51 = vpop.f32.mrf.mxu1  ;;  %v6722_v1 = vor.u32 %v7520_v22, %v6719_v56  ;;  %v6575_v3 = vld [vmem:[#allocation8 + $0x18] sm:$0xf0]  ;;  %v7516_v61 = vld [vmem:[#allocation8 + $0x10c] sm:$0xf] }
 0x517   :  { %9222 = vst [vmem:[#allocation21_spill] sm:$0xff] %v8833_v23  ;;  %v6578_v25 = vor.u32 %v7484_v11, %v6575_v3 }
 0x518   :  { %v4351_v0 = vadd.f32 %v4350_v51, %v4302_v15  ;;  %v4441_v10 = vpop.f32.mrf.mxu3  ;;  %4712 = vmatpush.bf16.msra.mxu1 %v6722_v1  ;;  %v6706_v15 = vor.u32 %v7516_v61, %v6703_v42  ;;  %v6831_v51 = vld [vmem:[#allocation8 + $0x218] sm:$0xf0] }
 0x519   :  { %v4442_v52 = vadd.f32 %v4441_v10, %v4393_v53  ;;  %4664 = vmatpush.bf16.msra.mxu0 %v6578_v25  ;;  %v6834_v32 = vor.u32 %v7548_v26, %v6831_v51  ;;  %v7580_v25 = vld [vmem:[#allocation8 + $0x30c] sm:$0xf] }
 0x51b   :  { %4762 = vmatpush.bf16.msra.mxu2 %v6834_v32 }
 0x51c   :  { %v4399_v62 = vpop.f32.mrf.mxu2  ;;  %4713 = vmatpush.bf16.msra.mxu1 %v6706_v15 }
 0x51d   :  { %v4400_v23 = vadd.f32 %v4399_v62, %v4351_v0  ;;  %v4304_v28 = vpop.f32.mrf.mxu0  ;;  %v4886_v0 = vmax.f32 %v4442_v52, 0.0  ;;  %v6959_v62 = vld [vmem:[#allocation8 + $0x318] sm:$0xf0] }
 0x51e   :  { %v4305_v48 = vadd.f32 %v4304_v28, %v8786_v55  ;;  %v4353_v21 = vpop.f32.mrf.mxu1 }
 0x520   :  { %v4354_v53 = vadd.f32 %v4353_v21, %v4305_v48  ;;  %v4443_v4 = vpop.f32.mrf.mxu3  ;;  %4499 = vmatmul.bf16.gmra.mxu0 %v9213_v24 }
 0x521   :  { %v4444_v63 = vadd.f32 %v4443_v4, %v4395_v27  ;;  %4548 = vmatmul.bf16.gmra.mxu1 %v9214_v18  ;;  %4597 = vmatmul.bf16.gmra.mxu2 %v8630_v20  ;;  %v6962_v27 = vor.u32 %v7580_v25, %v6959_v62 }
 0x523   :  { %v4890_v10 = vmax.f32 %v4444_v63, 0.0  ;;  %4811 = vmatpush.bf16.msra.mxu3 %v6962_v27 }
 0x524   :  { %v4402_v22 = vpop.f32.mrf.mxu2 }
 0x525   :  { %v4403_v56 = vadd.f32 %v4402_v22, %v4354_v53  ;;  %4641 = vmatmul.bf16.gmra.mxu3 %v8703_v33  ;;  %v4306_v1 = vpop.f32.mrf.mxu0  ;;  %v8841_v11 = vpack.c.bf16 %v4890_v10, %v4886_v0 }
 0x526   :  { %v4307_v3 = vadd.f32 %v4306_v1, %v8786_v55  ;;  %v4355_v61 = vpop.f32.mrf.mxu1 }
 0x528   :  { %v4356_v28 = vadd.f32 %v4355_v61, %v4307_v3  ;;  %v4446_v42 = vpop.f32.mrf.mxu3 }
 0x529   :  { %v4447_v26 = vadd.f32 %v4446_v42, %v4398_v14 }
 0x52b   :  { %v4894_v63 = vmax.f32 %v4447_v26, 0.0 }
 0x52c   :  { %v4404_v48 = vpop.f32.mrf.mxu2 }
 0x52d   :  { %v4405_v52 = vadd.f32 %v4404_v48, %v4356_v28  ;;  %v4309_v21 = vpop.f32.mrf.mxu0 }
 0x52e   :  { %v4310_v15 = vadd.f32 %v4309_v21, %v8786_v55  ;;  %v4358_v51 = vpop.f32.mrf.mxu1 }
 0x530   :  { %v4359_v32 = vadd.f32 %v4358_v51, %v4310_v15  ;;  %v4448_v53 = vpop.f32.mrf.mxu3  ;;  %4504 = vmatmul.bf16.gmra.mxu0 %v9215_v37 }
 0x531   :  { %v4449_v4 = vadd.f32 %v4448_v53, %v4400_v23  ;;  %4553 = vmatmul.bf16.gmra.mxu1 %v9216_v16  ;;  %4602 = vmatmul.bf16.gmra.mxu2 %v8646_v29  ;;  %v8852_v23 = vld [vmem:[#allocation10] sm:$0xf] }
 0x532   :  { %v8855_v28 = vperm.slane %v8852_v23, 2 }
 0x533   :  { %v4898_v0 = vmax.f32 %v4449_v4, 0.0 }
 0x534   :  { %v4407_v10 = vpop.f32.mrf.mxu2 }
 0x535   :  { %v4408_v22 = vadd.f32 %v4407_v10, %v4359_v32  ;;  %4646 = vmatmul.bf16.gmra.mxu3 %v8712_v2  ;;  %v4311_v14 = vpop.f32.mrf.mxu0  ;;  %v8849_v1 = vpack.c.bf16 %v4898_v0, %v4894_v63  ;;  %v7634_v10 = vld [vmem:[#allocation11 + $0xb8] sm:$0xff] }
 0x536   :  { %v4312_v25 = vadd.f32 %v4311_v14, %v8786_v55  ;;  %v4360_v62 = vpop.f32.mrf.mxu1  ;;  %5307 = vmatpush.bf16.msrb.mxu2 %v7634_v10  ;;  %v7633_v10 = vld [vmem:[#allocation11 + $0xb0] sm:$0xff] }
 0x538   :  { %v4361_v3 = vadd.f32 %v4360_v62, %v4312_v25  ;;  %v4451_v61 = vpop.f32.mrf.mxu3 }
 0x539   :  { %v4452_v27 = vadd.f32 %v4451_v61, %v4403_v56 }
 0x53a   :  { %5308 = vmatpush.bf16.msrb.mxu2 %v7633_v10 }
 0x53b   :  { %v4902_v56 = vmax.f32 %v4452_v27, 0.0 }
 0x53c   :  { %v4409_v42 = vpop.f32.mrf.mxu2 }
 0x53d   :  { %v4410_v26 = vadd.f32 %v4409_v42, %v4361_v3  ;;  %v4470_v48 = vpop.f32.mrf.mxu0  ;;  %v7618_v3 = vld [vmem:[#allocation11 + $0x38] sm:$0xff] }
 0x53e   :  { %v4471_v21 = vadd.f32 %v4470_v48, %v8855_v28  ;;  %v4519_v15 = vpop.f32.mrf.mxu1  ;;  %5209 = vmatpush.bf16.msrb.mxu0 %v7618_v3 }
 0x540   :  { %v4520_v51 = vadd.f32 %v4519_v15, %v4471_v21  ;;  %v4453_v32 = vpop.f32.mrf.mxu3  ;;  %4665 = vmatmul.bf16.vlgmr.msra.gmra.mxu0 %v9201_v60 }
 0x541   :  { %v4454_v55 = vadd.f32 %v4453_v32, %v4405_v52  ;;  %4714 = vmatmul.bf16.vlgmr.msra.gmra.mxu1 %v9202_v49  ;;  %4763 = vmatmul.bf16.vlgmr.msra.gmra.mxu2 %v8542_v50  ;;  %v7642_v49 = vld [vmem:[#allocation11 + $0xf8] sm:$0xff] }
 0x542   :  { %5356 = vmatpush.bf16.msrb.mxu3 %v7642_v49  ;;  %v7626_v50 = vld [vmem:[#allocation11 + $0x78] sm:$0xff] }
 0x543   :  { %v4906_v53 = vmax.f32 %v4454_v55, 0.0  ;;  %5258 = vmatpush.bf16.msrb.mxu1 %v7626_v50 }
 0x544   :  { %v4568_v4 = vpop.f32.mrf.mxu2 }
 0x545   :  { %v4569_v63 = vadd.f32 %v4568_v4, %v4520_v51  ;;  %4651 = vmatmul.bf16.gmra.mxu3 %v8727_v17  ;;  %v4472_v0 = vpop.f32.mrf.mxu0  ;;  %v8862_v14 = vpack.c.bf16 %v4906_v53, %v4902_v56 }
 0x546   :  { %v4473_v25 = vadd.f32 %v4472_v0, %v8855_v28  ;;  %v4521_v62 = vpop.f32.mrf.mxu1 }
 0x548   :  { %v4522_v60 = vadd.f32 %v4521_v62, %v4473_v25  ;;  %v4456_v52 = vpop.f32.mrf.mxu3 }
 0x549   :  { %v4457_v61 = vadd.f32 %v4456_v52, %v4408_v22  ;;  %v7617_v52 = vld [vmem:[#allocation11 + $0x30] sm:$0xff] }
 0x54a   :  { %5210 = vmatpush.bf16.msrb.mxu0 %v7617_v52 }
 0x54b   :  { %v4910_v22 = vmax.f32 %v4457_v61, 0.0 }
 0x54c   :  { %v4570_v27 = vpop.f32.mrf.mxu2 }
 0x54d   :  { %v4571_v42 = vadd.f32 %v4570_v27, %v4522_v60  ;;  %v4475_v48 = vpop.f32.mrf.mxu0 }
 0x54e   :  { %v4476_v21 = vadd.f32 %v4475_v48, %v8855_v28  ;;  %v4524_v15 = vpop.f32.mrf.mxu1 }
 0x550   :  { %v4525_v51 = vadd.f32 %v4524_v15, %v4476_v21  ;;  %v4458_v32 = vpop.f32.mrf.mxu3  ;;  %4670 = vmatmul.bf16.gmra.mxu0 %v9203_v40 }
 0x551   :  { %v4459_v55 = vadd.f32 %v4458_v32, %v4410_v26  ;;  %4719 = vmatmul.bf16.gmra.mxu1 %v9204_v9  ;;  %4768 = vmatmul.bf16.gmra.mxu2 %v8556_v12  ;;  %v7641_v9 = vld [vmem:[#allocation11 + $0xf0] sm:$0xff] }
 0x552   :  { %5357 = vmatpush.bf16.msrb.mxu3 %v7641_v9  ;;  %v7625_v12 = vld [vmem:[#allocation11 + $0x70] sm:$0xff] }
 0x553   :  { %v4914_v56 = vmax.f32 %v4459_v55, 0.0  ;;  %5259 = vmatpush.bf16.msrb.mxu1 %v7625_v12 }
 0x554   :  { %v4573_v53 = vpop.f32.mrf.mxu2 }
 0x555   :  { %v4574_v4 = vadd.f32 %v4573_v53, %v4525_v51  ;;  %4812 = vmatmul.bf16.vlgmr.msra.gmra.mxu3 %v8661_v47  ;;  %v4477_v0 = vpop.f32.mrf.mxu0  ;;  %v8870_v25 = vpack.c.bf16 %v4914_v56, %v4910_v22  ;;  %v7632_v53 = vld [vmem:[#allocation11 + $0xa8] sm:$0xff] }
 0x556   :  { %v4478_v62 = vadd.f32 %v4477_v0, %v8855_v28  ;;  %v4526_v60 = vpop.f32.mrf.mxu1  ;;  %5309 = vmatpush.bf16.msrb.mxu2 %v7632_v53 }
 0x558   :  { %v4527_v40 = vadd.f32 %v4526_v60, %v4478_v62  ;;  %v4617_v26 = vpop.f32.mrf.mxu3  ;;  %v7616_v62 = vld [vmem:[#allocation11 + $0x28] sm:$0xff] }
 0x559   :  { %v4618_v3 = vadd.f32 %v4617_v26, %v4569_v63  ;;  %5211 = vmatpush.bf16.msrb.mxu0 %v7616_v62 }
 0x55b   :  { %v4855_v63 = vmax.f32 %v4618_v3, 0.0 }
 0x55c   :  { %v4575_v49 = vpop.f32.mrf.mxu2 }
 0x55d   :  { %v4576_v61 = vadd.f32 %v4575_v49, %v4527_v40  ;;  %v4480_v50 = vpop.f32.mrf.mxu0 }
 0x55e   :  { %v4481_v47 = vadd.f32 %v4480_v50, %v8855_v28  ;;  %v4529_v27 = vpop.f32.mrf.mxu1 }
 0x560   :  { %v4530_v48 = vadd.f32 %v4529_v27, %v4481_v47  ;;  %v4619_v21 = vpop.f32.mrf.mxu3  ;;  %4675 = vmatmul.bf16.gmra.mxu0 %v9205_v58 }
 0x561   :  { %v4620_v15 = vadd.f32 %v4619_v21, %v4571_v42  ;;  %4724 = vmatmul.bf16.gmra.mxu1 %v9206_v39  ;;  %4773 = vmatmul.bf16.gmra.mxu2 %v8570_v8  ;;  %v7640_v39 = vld [vmem:[#allocation11 + $0xe8] sm:$0xff]  ;;  %v7631_v21 = vld [vmem:[#allocation11 + $0xa0] sm:$0xff] }
 0x562   :  { %5358 = vmatpush.bf16.msrb.mxu3 %v7640_v39  ;;  %v7624_v8 = vld [vmem:[#allocation11 + $0x68] sm:$0xff]  ;;  %5310 = vmatpush.bf16.msrb.mxu2 %v7631_v21 }
 0x563   :  { %v4859_v51 = vmax.f32 %v4620_v15, 0.0  ;;  %5260 = vmatpush.bf16.msrb.mxu1 %v7624_v8 }
 0x564   :  { %v4578_v32 = vpop.f32.mrf.mxu2 }
 0x565   :  { %v8877_v55 = vpack.c.bf16 %v4859_v51, %v4855_v63  ;;  %v4579_v22 = vadd.f32 %v4578_v32, %v4530_v48  ;;  %4817 = vmatmul.bf16.gmra.mxu3 %v8669_v7  ;;  %v4482_v56 = vpop.f32.mrf.mxu0  ;;  %v7615_v32 = vld [vmem:[#allocation11 + $0x20] sm:$0xff] }
 0x566   :  { %v4483_v0 = vadd.f32 %v4482_v56, %v8855_v28  ;;  %v4531_v10 = vpop.f32.mrf.mxu1  ;;  %5212 = vmatpush.bf16.msrb.mxu0 %v7615_v32 }
 0x568   :  { %v4532_v58 = vadd.f32 %v4531_v10, %v4483_v0  ;;  %v4622_v42 = vpop.f32.mrf.mxu3 }
 0x569   :  { %v4623_v60 = vadd.f32 %v4622_v42, %v4574_v4 }
 0x56b   :  { %v4863_v4 = vmax.f32 %v4623_v60, 0.0 }
 0x56c   :  { %v4580_v40 = vpop.f32.mrf.mxu2 }
 0x56d   :  { %v4581_v26 = vadd.f32 %v4580_v40, %v4532_v58  ;;  %v4485_v52 = vpop.f32.mrf.mxu0 }
 0x56e   :  { %v4486_v7 = vadd.f32 %v4485_v52, %v8855_v28  ;;  %v4534_v9 = vpop.f32.mrf.mxu1 }
 0x570   :  { %v4535_v3 = vadd.f32 %v4534_v9, %v4486_v7  ;;  %v4624_v12 = vpop.f32.mrf.mxu3  ;;  %4680 = vmatmul.bf16.gmra.mxu0 %v9207_v59  ;;  %v7630_v7 = vld [vmem:[#allocation11 + $0x98] sm:$0xff] }
 0x571   :  { %v4625_v49 = vadd.f32 %v4624_v12, %v4576_v61  ;;  %4729 = vmatmul.bf16.gmra.mxu1 %v9208_v45  ;;  %4778 = vmatmul.bf16.gmra.mxu2 %v8584_v19  ;;  %v7639_v45 = vld [vmem:[#allocation11 + $0xe0] sm:$0xff] }
 0x572   :  { %5359 = vmatpush.bf16.msrb.mxu3 %v7639_v45  ;;  %v7623_v19 = vld [vmem:[#allocation11 + $0x60] sm:$0xff]  ;;  %5311 = vmatpush.bf16.msrb.mxu2 %v7630_v7 }
 0x573   :  { %v4867_v50 = vmax.f32 %v4625_v49, 0.0  ;;  %5261 = vmatpush.bf16.msrb.mxu1 %v7623_v19  ;;  %v7614_v49 = vld [vmem:[#allocation11 + $0x18] sm:$0xff]  ;;  %v7629_v19 = vld [vmem:[#allocation11 + $0x90] sm:$0xff]  ;;  %v7619_v7 = vld [vmem:[#allocation11 + $0x40] sm:$0xff] }
 0x574   :  { %v4583_v47 = vpop.f32.mrf.mxu2  ;;  %5213 = vmatpush.bf16.msrb.mxu0 %v7614_v49 }
 0x575   :  { %v4584_v27 = vadd.f32 %v4583_v47, %v4535_v3  ;;  %4822 = vmatmul.bf16.gmra.mxu3 %v8677_v38  ;;  %v4487_v48 = vpop.f32.mrf.mxu0  ;;  %v8886_v15 = vpack.c.bf16 %v4867_v50, %v4863_v4 }
 0x576   :  { %v4488_v63 = vadd.f32 %v4487_v48, %v8855_v28  ;;  %v4536_v51 = vpop.f32.mrf.mxu1  ;;  %5312 = vmatpush.bf16.msrb.mxu2 %v7629_v19 }
 0x578   :  { %v4537_v59 = vadd.f32 %v4536_v51, %v4488_v63  ;;  %v4627_v61 = vpop.f32.mrf.mxu3 }
 0x579   :  { %v4628_v56 = vadd.f32 %v4627_v61, %v4579_v22 }
 0x57b   :  { %v4871_v22 = vmax.f32 %v4628_v56, 0.0 }
 0x57c   :  { %v4585_v53 = vpop.f32.mrf.mxu2 }
 0x57d   :  { %v4586_v0 = vadd.f32 %v4585_v53, %v4537_v59  ;;  %v4490_v10 = vpop.f32.mrf.mxu0  ;;  %v7613_v53 = vld [vmem:[#allocation11 + $0x10] sm:$0xff] }
 0x57e   :  { %v4491_v38 = vadd.f32 %v4490_v10, %v8855_v28  ;;  %v4539_v58 = vpop.f32.mrf.mxu1  ;;  %v7621_v10 = vld [vmem:[#allocation11 + $0x50] sm:$0xff]  ;;  %5214 = vmatpush.bf16.msrb.mxu0 %v7613_v53 }
 0x580   :  { %v4540_v42 = vadd.f32 %v4539_v58, %v4491_v38  ;;  %v4629_v62 = vpop.f32.mrf.mxu3  ;;  %4685 = vmatmul.bf16.gmra.mxu0 %v9209_v57 }
 0x581   :  { %v4630_v39 = vadd.f32 %v4629_v62, %v4581_v26  ;;  %4734 = vmatmul.bf16.gmra.mxu1 %v9210_v35  ;;  %4783 = vmatmul.bf16.gmra.mxu2 %v8598_v6  ;;  %v7638_v35 = vld [vmem:[#allocation11 + $0xd8] sm:$0xff]  ;;  %v7612_v62 = vld [vmem:[#allocation11 + $0x8] sm:$0xff] }
 0x582   :  { %5360 = vmatpush.bf16.msrb.mxu3 %v7638_v35  ;;  %v7622_v6 = vld [vmem:[#allocation11 + $0x58] sm:$0xff]  ;;  %5215 = vmatpush.bf16.msrb.mxu0 %v7612_v62 }
 0x583   :  { %v4875_v60 = vmax.f32 %v4630_v39, 0.0  ;;  %5262 = vmatpush.bf16.msrb.mxu1 %v7622_v6  ;;  %v7620_v39 = vld [vmem:[#allocation11 + $0x48] sm:$0xff] }
 0x584   :  { %v4588_v8 = vpop.f32.mrf.mxu2 }
 0x585   :  { %v4589_v40 = vadd.f32 %v4588_v8, %v4540_v42  ;;  %4827 = vmatmul.bf16.gmra.mxu3 %v8685_v34  ;;  %v4492_v52 = vpop.f32.mrf.mxu0  ;;  %v8894_v9 = vpack.c.bf16 %v4875_v60, %v4871_v22  ;;  %v7628_v22 = vld [vmem:[#allocation11 + $0x88] sm:$0xff] }
 0x586   :  { %v4493_v3 = vadd.f32 %v4492_v52, %v8855_v28  ;;  %v4541_v12 = vpop.f32.mrf.mxu1  ;;  %5313 = vmatpush.bf16.msrb.mxu2 %v7628_v22  ;;  %v7611_v52 = vld [vmem:[#allocation11] sm:$0xff] }
 0x587   :  { %5263 = vmatpush.bf16.msrb.mxu1 %v7621_v10  ;;  %5216 = vmatpush.bf16.msrb.mxu0 %v7611_v52 }
 0x588   :  { %v4542_v57 = vadd.f32 %v4541_v12, %v4493_v3  ;;  %v4632_v26 = vpop.f32.mrf.mxu3  ;;  %v7627_v3 = vld [vmem:[#allocation11 + $0x80] sm:$0xff] }
 0x589   :  { %v4633_v4 = vadd.f32 %v4632_v26, %v4584_v27 }
 0x58a   :  { %5314 = vmatpush.bf16.msrb.mxu2 %v7627_v3 }
 0x58b   :  { %v4879_v27 = vmax.f32 %v4633_v4, 0.0  ;;  %5264 = vmatpush.bf16.msrb.mxu1 %v7620_v39 }
 0x58c   :  { %v4590_v50 = vpop.f32.mrf.mxu2 }
 0x58d   :  { %v4591_v47 = vadd.f32 %v4590_v50, %v4542_v57  ;;  %v4495_v48 = vpop.f32.mrf.mxu0 }
 0x58e   :  { %v4496_v34 = vadd.f32 %v4495_v48, %v8855_v28  ;;  %v4544_v21 = vpop.f32.mrf.mxu1 }
 0x58f   :  { %5265 = vmatpush.bf16.msrb.mxu1 %v7619_v7 }
 0x590   :  { %v4545_v63 = vadd.f32 %v4544_v21, %v4496_v34  ;;  %v4634_v51 = vpop.f32.mrf.mxu3  ;;  %4690 = vmatmul.bf16.gmra.mxu0 %v9211_v31 }
 0x591   :  { %v4635_v59 = vadd.f32 %v4634_v51, %v4586_v0  ;;  %4739 = vmatmul.bf16.gmra.mxu1 %v9212_v54  ;;  %4788 = vmatmul.bf16.gmra.mxu2 %v8614_v46  ;;  %v7637_v46 = vld [vmem:[#allocation11 + $0xd0] sm:$0xff] }
 0x592   :  { %5361 = vmatpush.bf16.msrb.mxu3 %v7637_v46 }
 0x593   :  { %v4883_v61 = vmax.f32 %v4635_v59, 0.0  ;;  %v7636_v59 = vld [vmem:[#allocation11 + $0xc8] sm:$0xff] }
 0x594   :  { %v4593_v32 = vpop.f32.mrf.mxu2 }
 0x595   :  { %v4594_v45 = vadd.f32 %v4593_v32, %v4545_v63  ;;  %4832 = vmatmul.bf16.gmra.mxu3 %v8694_v44  ;;  %v4497_v56 = vpop.f32.mrf.mxu0  ;;  %v8902_v38 = vpack.c.bf16 %v4883_v61, %v4879_v27 }
 0x596   :  { %v4498_v58 = vadd.f32 %v4497_v56, %v8855_v28  ;;  %v4546_v31 = vpop.f32.mrf.mxu1  ;;  %5362 = vmatpush.bf16.msrb.mxu3 %v7636_v59 }
 0x598   :  { %v4547_v54 = vadd.f32 %v4546_v31, %v4498_v58  ;;  %v4637_v0 = vpop.f32.mrf.mxu3 }
 0x599   :  { %v4638_v42 = vadd.f32 %v4637_v0, %v4589_v40 }
 0x59b   :  { %v4887_v35 = vmax.f32 %v4638_v42, 0.0 }
 0x59c   :  { %v4595_v44 = vpop.f32.mrf.mxu2 }
 0x59d   :  { %v4596_v60 = vadd.f32 %v4595_v44, %v4547_v54  ;;  %v4500_v8 = vpop.f32.mrf.mxu0 }
 0x59e   :  { %v4501_v12 = vadd.f32 %v4500_v8, %v8855_v28  ;;  %v4549_v57 = vpop.f32.mrf.mxu1 }
 0x5a0   :  { %v4550_v26 = vadd.f32 %v4549_v57, %v4501_v12  ;;  %v4639_v40 = vpop.f32.mrf.mxu3  ;;  %4695 = vmatmul.bf16.gmra.mxu0 %v9213_v24 }
 0x5a1   :  { %v4640_v49 = vadd.f32 %v4639_v40, %v4591_v47  ;;  %4744 = vmatmul.bf16.gmra.mxu1 %v9214_v18  ;;  %4793 = vmatmul.bf16.gmra.mxu2 %v8630_v20 }
 0x5a3   :  { %v4891_v4 = vmax.f32 %v4640_v49, 0.0 }
 0x5a4   :  { %v4598_v6 = vpop.f32.mrf.mxu2 }
 0x5a5   :  { %v4599_v50 = vadd.f32 %v4598_v6, %v4550_v26  ;;  %4837 = vmatmul.bf16.gmra.mxu3 %v8703_v33  ;;  %v4502_v48 = vpop.f32.mrf.mxu0  ;;  %v8910_v34 = vpack.c.bf16 %v4891_v4, %v4887_v35 }
 0x5a6   :  { %v4503_v21 = vadd.f32 %v4502_v48, %v8855_v28  ;;  %v4551_v63 = vpop.f32.mrf.mxu1 }
 0x5a8   :  { %v4552_v51 = vadd.f32 %v4551_v63, %v4503_v21  ;;  %v4642_v24 = vpop.f32.mrf.mxu3 }
 0x5a9   :  { %v4643_v47 = vadd.f32 %v4642_v24, %v4594_v45 }
 0x5ab   :  { %v4895_v53 = vmax.f32 %v4643_v47, 0.0 }
 0x5ac   :  { %v4600_v18 = vpop.f32.mrf.mxu2 }
 0x5ad   :  { %v4601_v27 = vadd.f32 %v4600_v18, %v4552_v51  ;;  %v4505_v20 = vpop.f32.mrf.mxu0 }
 0x5ae   :  { %v4506_v61 = vadd.f32 %v4505_v20, %v8855_v28  ;;  %v4554_v32 = vpop.f32.mrf.mxu1 }
 0x5b0   :  { %v4555_v56 = vadd.f32 %v4554_v32, %v4506_v61  ;;  %v4644_v19 = vpop.f32.mrf.mxu3  ;;  %4700 = vmatmul.bf16.gmra.mxu0 %v9215_v37  ;;  %v7635_v37 = vld [vmem:[#allocation11 + $0xc0] sm:$0xff] }
 0x5b1   :  { %v4645_v33 = vadd.f32 %v4644_v19, %v4596_v60  ;;  %4749 = vmatmul.bf16.gmra.mxu1 %v9216_v16  ;;  %4798 = vmatmul.bf16.gmra.mxu2 %v8646_v29 }
 0x5b2   :  { %5363 = vmatpush.bf16.msrb.mxu3 %v7635_v37 }
 0x5b3   :  { %v4899_v10 = vmax.f32 %v4645_v33, 0.0 }
 0x5b4   :  { %v4603_v58 = vpop.f32.mrf.mxu2 }
 0x5b5   :  { %v4604_v45 = vadd.f32 %v4603_v58, %v4555_v56  ;;  %4842 = vmatmul.bf16.gmra.mxu3 %v8712_v2  ;;  %v4507_v31 = vpop.f32.mrf.mxu0  ;;  %v8918_v54 = vpack.c.bf16 %v4899_v10, %v4895_v53 }
 0x5b6   :  { %v4508_v0 = vadd.f32 %v4507_v31, %v8855_v28  ;;  %v4556_v46 = vpop.f32.mrf.mxu1 }
 0x5b8   :  { %v4557_v42 = vadd.f32 %v4556_v46, %v4508_v0  ;;  %v4647_v62 = vpop.f32.mrf.mxu3 }
 0x5b9   :  { %v4648_v39 = vadd.f32 %v4647_v62, %v4599_v50 }
 0x5bb   :  { %v4903_v2 = vmax.f32 %v4648_v39, 0.0 }
 0x5bc   :  { %v4605_v16 = vpop.f32.mrf.mxu2 }
 0x5bd   :  { %v4606_v22 = vadd.f32 %v4605_v16, %v4557_v42  ;;  %v4666_v29 = vpop.f32.mrf.mxu0  ;;  %v9223_v16 = vld [vmem:[#allocation36_spill] sm:$0xff] }
 0x5be   :  { %v4715_v44 = vpop.f32.mrf.mxu1 }
 0x5c0   :  { %v4649_v60 = vpop.f32.mrf.mxu3  ;;  %5217 = vmatmul.bf16.vlgmr.msrb.gmra.mxu0 %v8741_v5 }
 0x5c1   :  { %v4650_v8 = vadd.f32 %v4649_v60, %v4601_v27  ;;  %5266 = vmatmul.bf16.vlgmr.msrb.gmra.mxu1 %v8808_v13  ;;  %5315 = vmatmul.bf16.vlgmr.msrb.gmra.mxu2 %v8877_v55  ;;  %v8931_v55 = vperm.slane %v8852_v23, 3 }
 0x5c3   :  { %v4907_v28 = vmax.f32 %v4650_v8, 0.0  ;;  %v4667_v63 = vadd.f32 %v4666_v29, %v8931_v55  ;;  %v9224_v29 = vld [vmem:[#allocation21_spill] sm:$0xff] }
 0x5c4   :  { %v4764_v52 = vpop.f32.mrf.mxu2 }
 0x5c5   :  { %4847 = vmatmul.bf16.gmra.mxu3 %v8727_v17  ;;  %v4668_v7 = vpop.f32.mrf.mxu0  ;;  %v8925_v3 = vpack.c.bf16 %v4907_v28, %v4903_v2  ;;  %v4716_v24 = vadd.f32 %v4715_v44, %v4667_v63 }
 0x5c6   :  { %v4717_v12 = vpop.f32.mrf.mxu1 }
 0x5c8   :  { %v4652_v57 = vpop.f32.mrf.mxu3 }
 0x5c9   :  { %v4653_v26 = vadd.f32 %v4652_v57, %v4604_v45 }
 0x5cb   :  { %v4911_v17 = vmax.f32 %v4653_v26, 0.0 }
 0x5cc   :  { %v4766_v40 = vpop.f32.mrf.mxu2 }
 0x5cd   :  { %v4671_v49 = vpop.f32.mrf.mxu0 }
 0x5ce   :  { %v4720_v35 = vpop.f32.mrf.mxu1  ;;  %v4672_v58 = vadd.f32 %v4671_v49, %v8931_v55 }
 0x5d0   :  { %v4654_v5 = vpop.f32.mrf.mxu3  ;;  %5222 = vmatmul.bf16.gmra.mxu0 %v8750_v43  ;;  %v4669_v43 = vadd.f32 %v4668_v7, %v8931_v55  ;;  %v4721_v0 = vadd.f32 %v4720_v35, %v4672_v58 }
 0x5d1   :  { %v4655_v13 = vadd.f32 %v4654_v5, %v4606_v22  ;;  %5271 = vmatmul.bf16.gmra.mxu1 %v8817_v36  ;;  %5320 = vmatmul.bf16.gmra.mxu2 %v8886_v15  ;;  %v4765_v36 = vadd.f32 %v4764_v52, %v4716_v24 }
 0x5d2   :  { %v4718_v47 = vadd.f32 %v4717_v12, %v4669_v43 }
 0x5d3   :  { %v4915_v4 = vmax.f32 %v4655_v13, 0.0 }
 0x5d4   :  { %v4769_v6 = vpop.f32.mrf.mxu2  ;;  %v4767_v23 = vadd.f32 %v4766_v40, %v4718_v47 }
 0x5d5   :  { %v4673_v50 = vpop.f32.mrf.mxu0  ;;  %v8933_v48 = vpack.c.bf16 %v4915_v4, %v4911_v17 }
 0x5d6   :  { %v4722_v21 = vpop.f32.mrf.mxu1  ;;  %v4674_v31 = vadd.f32 %v4673_v50, %v8931_v55 }
 0x5d8   :  { %v4813_v51 = vpop.f32.mrf.mxu3  ;;  %v4723_v42 = vadd.f32 %v4722_v21, %v4674_v31 }
 0x5d9   :  { %v4814_v27 = vadd.f32 %v4813_v51, %v4765_v36 }
 0x5db   :  { %v4856_v32 = vmax.f32 %v4814_v27, 0.0 }
 0x5dc   :  { %v4771_v59 = vpop.f32.mrf.mxu2 }
 0x5dd   :  { %v4676_v15 = vpop.f32.mrf.mxu0  ;;  %v4772_v37 = vadd.f32 %v4771_v59, %v4723_v42 }
 0x5de   :  { %v4725_v18 = vpop.f32.mrf.mxu1  ;;  %v4677_v7 = vadd.f32 %v4676_v15, %v8931_v55 }
 0x5e0   :  { %v4815_v20 = vpop.f32.mrf.mxu3  ;;  %5227 = vmatmul.bf16.gmra.mxu0 %v8758_v30  ;;  %v4770_v30 = vadd.f32 %v4769_v6, %v4721_v0  ;;  %v4726_v26 = vadd.f32 %v4725_v18, %v4677_v7  ;;  %v9225_v6 = vld [vmem:[#allocation39_spill] sm:$0xff] }
 0x5e1   :  { %v4816_v61 = vadd.f32 %v4815_v20, %v4767_v23  ;;  %5276 = vmatmul.bf16.gmra.mxu1 %v8825_v41  ;;  %5325 = vmatmul.bf16.gmra.mxu2 %v8894_v9 }
 0x5e3   :  { %v4860_v56 = vmax.f32 %v4816_v61, 0.0 }
 0x5e4   :  { %v4774_v19 = vpop.f32.mrf.mxu2 }
 0x5e5   :  { %v4920_v33 = vpack.c.bf16 %v4860_v56, %v4856_v32  ;;  %v4678_v53 = vpop.f32.mrf.mxu0  ;;  %v4775_v49 = vadd.f32 %v4774_v19, %v4726_v26  ;;  %v9226_v19 = vld [vmem:[#allocation19_spill] sm:$0xff] }
 0x5e6   :  { %v4727_v10 = vpop.f32.mrf.mxu1  ;;  %v4679_v57 = vadd.f32 %v4678_v53, %v8931_v55 }
 0x5e7   :  { %5364 = vmatmul.bf16.vlgmr.msrb.gmra.mxu3 %v4920_v33 }
 0x5e8   :  { %v4818_v45 = vpop.f32.mrf.mxu3  ;;  %v4728_v35 = vadd.f32 %v4727_v10, %v4679_v57 }
 0x5e9   :  { %v4819_v9 = vadd.f32 %v4818_v45, %v4770_v30 }
 0x5eb   :  { %v4864_v44 = vmax.f32 %v4819_v9, 0.0 }
 0x5ec   :  { %v4776_v46 = vpop.f32.mrf.mxu2 }
 0x5ed   :  { %v4681_v62 = vpop.f32.mrf.mxu0  ;;  %v4777_v17 = vadd.f32 %v4776_v46, %v4728_v35 }
 0x5ee   :  { %v4730_v41 = vpop.f32.mrf.mxu1  ;;  %v4682_v36 = vadd.f32 %v4681_v62, %v8931_v55 }
 0x5f0   :  { %v4820_v39 = vpop.f32.mrf.mxu3  ;;  %5232 = vmatmul.bf16.gmra.mxu0 %v9223_v16  ;;  %v4731_v18 = vadd.f32 %v4730_v41, %v4682_v36 }
 0x5f1   :  { %v4821_v22 = vadd.f32 %v4820_v39, %v4772_v37  ;;  %5281 = vmatmul.bf16.gmra.mxu1 %v9224_v29  ;;  %5330 = vmatmul.bf16.gmra.mxu2 %v8902_v38  ;;  %v9227_v29 = vld [vmem:[#allocation20_spill] sm:$0xff] }
 0x5f3   :  { %v4868_v60 = vmax.f32 %v4821_v22, 0.0 }
 0x5f4   :  { %v4779_v8 = vpop.f32.mrf.mxu2 }
 0x5f5   :  { %v4683_v2 = vpop.f32.mrf.mxu0  ;;  %v4924_v28 = vpack.c.bf16 %v4868_v60, %v4864_v44  ;;  %v4780_v27 = vadd.f32 %v4779_v8, %v4731_v18 }
 0x5f6   :  { %v4732_v52 = vpop.f32.mrf.mxu1  ;;  %v4684_v15 = vadd.f32 %v4683_v2, %v8931_v55 }
 0x5f7   :  { %5369 = vmatmul.bf16.gmra.mxu3 %v4924_v28 }
 0x5f8   :  { %v4823_v12 = vpop.f32.mrf.mxu3  ;;  %v4733_v20 = vadd.f32 %v4732_v52, %v4684_v15 }
 0x5f9   :  { %v4824_v38 = vadd.f32 %v4823_v12, %v4775_v49 }
 0x5fb   :  { %v4872_v21 = vmax.f32 %v4824_v38, 0.0  ;;  %v9228_v38 = vld [vmem:[#allocation41_spill] sm:$0xff] }
 0x5fc   :  { %v4781_v40 = vpop.f32.mrf.mxu2 }
 0x5fd   :  { %v4686_v5 = vpop.f32.mrf.mxu0  ;;  %v4782_v32 = vadd.f32 %v4781_v40, %v4733_v20 }
 0x5fe   :  { %v4735_v13 = vpop.f32.mrf.mxu1  ;;  %v4687_v46 = vadd.f32 %v4686_v5, %v8931_v55 }
 0x600   :  { %v4825_v4 = vpop.f32.mrf.mxu3  ;;  %5237 = vmatmul.bf16.gmra.mxu0 %v9225_v6  ;;  %v4736_v62 = vadd.f32 %v4735_v13, %v4687_v46 }
 0x601   :  { %v4826_v50 = vadd.f32 %v4825_v4, %v4777_v17  ;;  %5286 = vmatmul.bf16.gmra.mxu1 %v8841_v11  ;;  %5335 = vmatmul.bf16.gmra.mxu2 %v8910_v34 }
 0x603   :  { %v4876_v63 = vmax.f32 %v4826_v50, 0.0 }
 0x604   :  { %v4784_v51 = vpop.f32.mrf.mxu2 }
 0x605   :  { %v4688_v43 = vpop.f32.mrf.mxu0  ;;  %v4928_v24 = vpack.c.bf16 %v4876_v63, %v4872_v21  ;;  %v4785_v37 = vadd.f32 %v4784_v51, %v4736_v62 }
 0x606   :  { %v4737_v59 = vpop.f32.mrf.mxu1  ;;  %v4689_v42 = vadd.f32 %v4688_v43, %v8931_v55 }
 0x607   :  { %5374 = vmatmul.bf16.gmra.mxu3 %v4928_v24 }
 0x608   :  { %v4828_v47 = vpop.f32.mrf.mxu3  ;;  %v4738_v9 = vadd.f32 %v4737_v59, %v4689_v42 }
 0x609   :  { %v4829_v34 = vadd.f32 %v4828_v47, %v4780_v27 }
 0x60b   :  { %v4880_v53 = vmax.f32 %v4829_v34, 0.0 }
 0x60c   :  { %v4786_v23 = vpop.f32.mrf.mxu2 }
 0x60d   :  { %v4691_v61 = vpop.f32.mrf.mxu0 }
 0x60e   :  { %v4740_v11 = vpop.f32.mrf.mxu1  ;;  %v4692_v7 = vadd.f32 %v4691_v61, %v8931_v55 }
 0x610   :  { %v4830_v56 = vpop.f32.mrf.mxu3  ;;  %5242 = vmatmul.bf16.gmra.mxu0 %v9226_v19  ;;  %v4741_v40 = vadd.f32 %v4740_v11, %v4692_v7 }
 0x611   :  { %v4831_v33 = vadd.f32 %v4830_v56, %v4782_v32  ;;  %5291 = vmatmul.bf16.gmra.mxu1 %v8849_v1  ;;  %5340 = vmatmul.bf16.gmra.mxu2 %v8918_v54  ;;  %v4787_v1 = vadd.f32 %v4786_v23, %v4738_v9 }
 0x613   :  { %v4884_v10 = vmax.f32 %v4831_v33, 0.0 }
 0x614   :  { %v4789_v58 = vpop.f32.mrf.mxu2 }
 0x615   :  { %v4693_v45 = vpop.f32.mrf.mxu0  ;;  %v4932_v31 = vpack.c.bf16 %v4884_v10, %v4880_v53  ;;  %v4790_v35 = vadd.f32 %v4789_v58, %v4741_v40 }
 0x616   :  { %v4742_v0 = vpop.f32.mrf.mxu1  ;;  %v4694_v57 = vadd.f32 %v4693_v45, %v8931_v55 }
 0x617   :  { %5379 = vmatmul.bf16.gmra.mxu3 %v4932_v31 }
 0x618   :  { %v4833_v30 = vpop.f32.mrf.mxu3  ;;  %v4743_v5 = vadd.f32 %v4742_v0, %v4694_v57 }
 0x619   :  { %v4834_v16 = vadd.f32 %v4833_v30, %v4785_v37 }
 0x61b   :  { %v4888_v60 = vmax.f32 %v4834_v16, 0.0 }
 0x61c   :  { %v4791_v41 = vpop.f32.mrf.mxu2 }
 0x61d   :  { %v4696_v39 = vpop.f32.mrf.mxu0 }
 0x61e   :  { %v4745_v54 = vpop.f32.mrf.mxu1  ;;  %v4697_v43 = vadd.f32 %v4696_v39, %v8931_v55 }
 0x620   :  { %v4835_v22 = vpop.f32.mrf.mxu3  ;;  %5247 = vmatmul.bf16.gmra.mxu0 %v9227_v29  ;;  %v4746_v47 = vadd.f32 %v4745_v54, %v4697_v43 }
 0x621   :  { %v4836_v44 = vadd.f32 %v4835_v22, %v4787_v1  ;;  %5296 = vmatmul.bf16.gmra.mxu1 %v8862_v14  ;;  %5345 = vmatmul.bf16.gmra.mxu2 %v8925_v3  ;;  %v4792_v14 = vadd.f32 %v4791_v41, %v4743_v5 }
 0x623   :  { %v4892_v8 = vmax.f32 %v4836_v44, 0.0 }
 0x624   :  { %v4794_v2 = vpop.f32.mrf.mxu2 }
 0x625   :  { %v4936_v28 = vpack.c.bf16 %v4892_v8, %v4888_v60  ;;  %v4698_v52 = vpop.f32.mrf.mxu0  ;;  %v4795_v15 = vadd.f32 %v4794_v2, %v4746_v47 }
 0x626   :  { %v4747_v26 = vpop.f32.mrf.mxu1  ;;  %v4699_v36 = vadd.f32 %v4698_v52, %v8931_v55 }
 0x627   :  { %5384 = vmatmul.bf16.gmra.mxu3 %v4936_v28 }
 0x628   :  { %v4838_v12 = vpop.f32.mrf.mxu3  ;;  %v4748_v18 = vadd.f32 %v4747_v26, %v4699_v36 }
 0x629   :  { %v4839_v17 = vadd.f32 %v4838_v12, %v4790_v35 }
 0x62b   :  { %v4896_v6 = vmax.f32 %v4839_v17, 0.0 }
 0x62c   :  { %v4796_v49 = vpop.f32.mrf.mxu2 }
 0x62d   :  { %v4701_v13 = vpop.f32.mrf.mxu0 }
 0x62e   :  { %v4750_v50 = vpop.f32.mrf.mxu1  ;;  %v4702_v19 = vadd.f32 %v4701_v13, %v8931_v55 }
 0x630   :  { %v4840_v3 = vpop.f32.mrf.mxu3  ;;  %5252 = vmatmul.bf16.gmra.mxu0 %v9228_v38  ;;  %v4751_v45 = vadd.f32 %v4750_v50, %v4702_v19 }
 0x631   :  { %v4841_v4 = vadd.f32 %v4840_v3, %v4792_v14  ;;  %5301 = vmatmul.bf16.gmra.mxu1 %v8870_v25  ;;  %5350 = vmatmul.bf16.gmra.mxu2 %v8933_v48  ;;  %v4797_v25 = vadd.f32 %v4796_v49, %v4748_v18 }
 0x633   :  { %v4900_v21 = vmax.f32 %v4841_v4, 0.0 }
 0x634   :  { %v4799_v63 = vpop.f32.mrf.mxu2 }
 0x635   :  { %v4940_v51 = vpack.c.bf16 %v4900_v21, %v4896_v6  ;;  %v4703_v24 = vpop.f32.mrf.mxu0  ;;  %v4800_v0 = vadd.f32 %v4799_v63, %v4751_v45 }
 0x636   :  { %v4752_v23 = vpop.f32.mrf.mxu1  ;;  %v4704_v58 = vadd.f32 %v4703_v24, %v8931_v55  ;;  %v8972_v55 = vld [vmem:[%s8999_s6] ss:$0 sm:$0xff]  ;;  %s7852_s6 = smov [#allocation13]  }
 0x637   :  { %5389 = vmatmul.bf16.gmra.mxu3 %v4940_v51  ;;  %s5425_s10 = sshll.u32 %s7852_s6, 4  ;;  %s5426_s10 = int_to_ptr.vmem [resolvable:$true] %s5425_s10 }
 0x638   :  { %v4843_v59 = vpop.f32.mrf.mxu3  ;;  %v4753_v46 = vadd.f32 %v4752_v23, %v4704_v58 }
 0x639   :  { %v4844_v20 = vadd.f32 %v4843_v59, %v4795_v15 }
 0x63b   :  { %v4904_v32 = vmax.f32 %v4844_v20, 0.0 }
 0x63c   :  { %v4801_v27 = vpop.f32.mrf.mxu2 }
 0x63d   :  { %v5218_v11 = vpop.f32.mrf.mxu0  ;;  %v4802_v30 = vadd.f32 %v4801_v27, %v4753_v46 }
 0x63e   :  { %v5267_v33 = vpop.f32.mrf.mxu1  ;;  %v5219_v60 = vadd.f32 %v8972_v55, %v5218_v11 }
 0x640   :  { %v4845_v48 = vpop.f32.mrf.mxu3  ;;  %v5268_v28 = vadd.f32 %v5267_v33, %v5219_v60 }
 0x641   :  { %v4846_v61 = vadd.f32 %v4845_v48, %v4797_v25 }
 0x643   :  { %v4908_v34 = vmax.f32 %v4846_v61, 0.0 }
 0x644   :  { %v5316_v53 = vpop.f32.mrf.mxu2 }
 0x645   :  { %v4944_v56 = vpack.c.bf16 %v4908_v34, %v4904_v32  ;;  %v5220_v31 = vpop.f32.mrf.mxu0  ;;  %v5317_v52 = vadd.f32 %v5316_v53, %v5268_v28 }
 0x646   :  { %v5269_v41 = vpop.f32.mrf.mxu1  ;;  %v5221_v57 = vadd.f32 %v8972_v55, %v5220_v31 }
 0x647   :  { %5394 = vmatmul.bf16.gmra.mxu3 %v4944_v56 }
 0x648   :  { %v4848_v10 = vpop.f32.mrf.mxu3  ;;  %v5270_v40 = vadd.f32 %v5269_v41, %v5221_v57 }
 0x649   :  { %v4849_v42 = vadd.f32 %v4848_v10, %v4800_v0 }
 0x64b   :  { %v4912_v39 = vmax.f32 %v4849_v42, 0.0 }
 0x64c   :  { %v5318_v9 = vpop.f32.mrf.mxu2 }
 0x64d   :  { %v5223_v54 = vpop.f32.mrf.mxu0  ;;  %v5319_v5 = vadd.f32 %v5318_v9, %v5270_v40 }
 0x64e   :  { %v5272_v22 = vpop.f32.mrf.mxu1  ;;  %v5224_v14 = vadd.f32 %v8972_v55, %v5223_v54 }
 0x650   :  { %v4850_v62 = vpop.f32.mrf.mxu3  ;;  %v5273_v38 = vadd.f32 %v5272_v22, %v5224_v14 }
 0x651   :  { %v4851_v37 = vadd.f32 %v4850_v62, %v4802_v30 }
 0x653   :  { %v4916_v1 = vmax.f32 %v4851_v37, 0.0 }
 0x654   :  { %v5321_v29 = vpop.f32.mrf.mxu2 }
 0x655   :  { %v4948_v16 = vpack.c.bf16 %v4916_v1, %v4912_v39  ;;  %v5225_v44 = vpop.f32.mrf.mxu0  ;;  %v5322_v4 = vadd.f32 %v5321_v29, %v5273_v38 }
 0x656   :  { %v5274_v8 = vpop.f32.mrf.mxu1  ;;  %v5226_v63 = vadd.f32 %v8972_v55, %v5225_v44 }
 0x657   :  { %5399 = vmatmul.bf16.gmra.mxu3 %v4948_v16 }
 0x658   :  { %v5275_v24 = vadd.f32 %v5274_v8, %v5226_v63 }
 0x65c   :  { %v5323_v2 = vpop.f32.mrf.mxu2 }
 0x65d   :  { %v5228_v7 = vpop.f32.mrf.mxu0  ;;  %v5324_v59 = vadd.f32 %v5323_v2, %v5275_v24 }
 0x65e   :  { %v5277_v49 = vpop.f32.mrf.mxu1  ;;  %v5229_v47 = vadd.f32 %v8972_v55, %v5228_v7 }
 0x660   :  { %v5278_v27 = vadd.f32 %v5277_v49, %v5229_v47 }
 0x664   :  { %v5326_v35 = vpop.f32.mrf.mxu2 }
 0x665   :  { %v5230_v3 = vpop.f32.mrf.mxu0  ;;  %v5327_v20 = vadd.f32 %v5326_v35, %v5278_v27 }
 0x666   :  { %v5279_v6 = vpop.f32.mrf.mxu1  ;;  %v5231_v61 = vadd.f32 %v8972_v55, %v5230_v3 }
 0x668   :  { %v5280_v56 = vadd.f32 %v5279_v6, %v5231_v61 }
 0x66a   :  { %v5365_v12 = vpop.f32.mrf.mxu3 }
 0x66b   :  { %v5366_v26 = vadd.f32 %v5365_v12, %v5317_v52 }
 0x66c   :  { %v5328_v50 = vpop.f32.mrf.mxu2 }
 0x66d   :  { %5405 = vst [vmem:[#allocation13] sm:$0xff] %v5366_v26  ;;  %v5233_v43 = vpop.f32.mrf.mxu0  ;;  %v5329_v19 = vadd.f32 %v5328_v50, %v5280_v56 }
 0x66e   :  { %v5282_v15 = vpop.f32.mrf.mxu1  ;;  %v5234_v10 = vadd.f32 %v8972_v55, %v5233_v43 }
 0x670   :  { %v5283_v45 = vadd.f32 %v5282_v15, %v5234_v10 }
 0x672   :  { %v5367_v13 = vpop.f32.mrf.mxu3 }
 0x673   :  { %v5368_v17 = vadd.f32 %v5367_v13, %v5319_v5 }
 0x674   :  { %v5331_v23 = vpop.f32.mrf.mxu2 }
 0x675   :  { %5406 = vst [vmem:[#allocation13 + $0x8] sm:$0xff] %v5368_v17  ;;  %v5235_v25 = vpop.f32.mrf.mxu0  ;;  %v5332_v46 = vadd.f32 %v5331_v23, %v5283_v45 }
 0x676   :  { %v5284_v32 = vpop.f32.mrf.mxu1  ;;  %v5236_v42 = vadd.f32 %v8972_v55, %v5235_v25 }
 0x678   :  { %v5285_v37 = vadd.f32 %v5284_v32, %v5236_v42 }
 0x67a   :  { %v5370_v21 = vpop.f32.mrf.mxu3 }
 0x67b   :  { %v5371_v51 = vadd.f32 %v5370_v21, %v5322_v4 }
 0x67c   :  { %v5333_v34 = vpop.f32.mrf.mxu2 }
 0x67d   :  { %5407 = vst [vmem:[#allocation13 + $0x10] sm:$0xff] %v5371_v51  ;;  %v5238_v33 = vpop.f32.mrf.mxu0  ;;  %v5334_v9 = vadd.f32 %v5333_v34, %v5285_v37 }
 0x67e   :  { %v5287_v31 = vpop.f32.mrf.mxu1  ;;  %v5239_v54 = vadd.f32 %v8972_v55, %v5238_v33 }
 0x680   :  { %v5288_v44 = vadd.f32 %v5287_v31, %v5239_v54 }
 0x682   :  { %v5372_v36 = vpop.f32.mrf.mxu3 }
 0x683   :  { %v5373_v18 = vadd.f32 %v5372_v36, %v5324_v59 }
 0x684   :  { %v5336_v0 = vpop.f32.mrf.mxu2 }
 0x685   :  { %5408 = vst [vmem:[#allocation13 + $0x18] sm:$0xff] %v5373_v18  ;;  %v5240_v41 = vpop.f32.mrf.mxu0  ;;  %v5337_v60 = vadd.f32 %v5336_v0, %v5288_v44 }
 0x686   :  { %v5289_v39 = vpop.f32.mrf.mxu1  ;;  %v5241_v2 = vadd.f32 %v8972_v55, %v5240_v41 }
 0x688   :  { %v5290_v12 = vadd.f32 %v5289_v39, %v5241_v2 }
 0x68a   :  { %v5375_v48 = vpop.f32.mrf.mxu3 }
 0x68b   :  { %v5376_v11 = vadd.f32 %v5375_v48, %v5327_v20 }
 0x68c   :  { %v5338_v1 = vpop.f32.mrf.mxu2 }
 0x68d   :  { %5409 = vst [vmem:[#allocation13 + $0x20] sm:$0xff] %v5376_v11  ;;  %v5243_v29 = vpop.f32.mrf.mxu0  ;;  %v5339_v26 = vadd.f32 %v5338_v1, %v5290_v12 }
 0x68e   :  { %v5292_v28 = vpop.f32.mrf.mxu1  ;;  %v5244_v49 = vadd.f32 %v8972_v55, %v5243_v29 }
 0x690   :  { %v5293_v14 = vadd.f32 %v5292_v28, %v5244_v49 }
 0x692   :  { %v5377_v53 = vpop.f32.mrf.mxu3 }
 0x693   :  { %v5378_v58 = vadd.f32 %v5377_v53, %v5329_v19 }
 0x694   :  { %v5341_v7 = vpop.f32.mrf.mxu2 }
 0x695   :  { %5410 = vst [vmem:[#allocation13 + $0x28] sm:$0xff] %v5378_v58  ;;  %v5245_v57 = vpop.f32.mrf.mxu0  ;;  %v5342_v17 = vadd.f32 %v5341_v7, %v5293_v14 }
 0x696   :  { %v5294_v5 = vpop.f32.mrf.mxu1  ;;  %v5246_v4 = vadd.f32 %v8972_v55, %v5245_v57 }
 0x698   :  { %v5295_v50 = vadd.f32 %v5294_v5, %v5246_v4 }
 0x69a   :  { %v5380_v30 = vpop.f32.mrf.mxu3 }
 0x69b   :  { %v5381_v62 = vadd.f32 %v5380_v30, %v5332_v46 }
 0x69c   :  { %v5343_v13 = vpop.f32.mrf.mxu2 }
 0x69d   :  { %5411 = vst [vmem:[#allocation13 + $0x30] sm:$0xff] %v5381_v62  ;;  %v5248_v3 = vpop.f32.mrf.mxu0  ;;  %v5344_v51 = vadd.f32 %v5343_v13, %v5295_v50 }
 0x69e   :  { %v5297_v21 = vpop.f32.mrf.mxu1  ;;  %v5249_v24 = vadd.f32 %v8972_v55, %v5248_v3 }
 0x6a0   :  { %v5298_v47 = vadd.f32 %v5297_v21, %v5249_v24 }
 0x6a2   :  { %v5382_v16 = vpop.f32.mrf.mxu3 }
 0x6a3   :  { %v5383_v22 = vadd.f32 %v5382_v16, %v5334_v9 }
 0x6a4   :  { %v5346_v63 = vpop.f32.mrf.mxu2 }
 0x6a5   :  { %5412 = vst [vmem:[#allocation13 + $0x38] sm:$0xff] %v5383_v22  ;;  %v5250_v36 = vpop.f32.mrf.mxu0  ;;  %v5347_v15 = vadd.f32 %v5346_v63, %v5298_v47 }
 0x6a6   :  { %v5299_v18 = vpop.f32.mrf.mxu1  ;;  %v5251_v25 = vadd.f32 %v8972_v55, %v5250_v36 }
 0x6a8   :  { %v5300_v61 = vadd.f32 %v5299_v18, %v5251_v25 }
 0x6aa   :  { %v5385_v8 = vpop.f32.mrf.mxu3 }
 0x6ab   :  { %v5386_v52 = vadd.f32 %v5385_v8, %v5337_v60 }
 0x6ac   :  { %v5348_v23 = vpop.f32.mrf.mxu2 }
 0x6ad   :  { %5413 = vst [vmem:[#allocation13 + $0x40] sm:$0xff] %v5386_v52  ;;  %v5253_v48 = vpop.f32.mrf.mxu0  ;;  %v5349_v11 = vadd.f32 %v5348_v23, %v5300_v61 }
 0x6ae   :  { %v5254_v34 = vadd.f32 %v8972_v55, %v5253_v48  ;;  %v5302_v19 = vpop.f32.mrf.mxu1 }
 0x6b0   :  { %v5303_v53 = vadd.f32 %v5302_v19, %v5254_v34 }
 0x6b2   :  { %v5387_v40 = vpop.f32.mrf.mxu3 }
 0x6b3   :  { %v5388_v35 = vadd.f32 %v5387_v40, %v5339_v26 }
 0x6b4   :  { %v5351_v33 = vpop.f32.mrf.mxu2 }
 0x6b5   :  { %5414 = vst [vmem:[#allocation13 + $0x48] sm:$0xff] %v5388_v35  ;;  %v5255_v10 = vpop.f32.mrf.mxu0  ;;  %v5352_v58 = vadd.f32 %v5351_v33, %v5303_v53 }
 0x6b6   :  { %v5256_v31 = vadd.f32 %v8972_v55, %v5255_v10  ;;  %v5304_v46 = vpop.f32.mrf.mxu1 }
 0x6b8   :  { %v5305_v42 = vadd.f32 %v5304_v46, %v5256_v31 }
 0x6ba   :  { %v5390_v38 = vpop.f32.mrf.mxu3 }
 0x6bb   :  { %v5391_v6 = vadd.f32 %v5390_v38, %v5342_v17 }
 0x6bc   :  { %v5353_v30 = vpop.f32.mrf.mxu2 }
 0x6bd   :  { %5415 = vst [vmem:[#allocation13 + $0x50] sm:$0xff] %v5391_v6  ;;  %v5354_v62 = vadd.f32 %v5353_v30, %v5305_v42 }
 0x6c2   :  { %v5392_v43 = vpop.f32.mrf.mxu3 }
 0x6c3   :  { %v5393_v59 = vadd.f32 %v5392_v43, %v5344_v51 }
 0x6c5   :  { %5416 = vst [vmem:[#allocation13 + $0x58] sm:$0xff] %v5393_v59 }
 0x6ca   :  { %v5395_v27 = vpop.f32.mrf.mxu3 }
 0x6cb   :  { %v5396_v20 = vadd.f32 %v5395_v27, %v5347_v15 }
 0x6cd   :  { %5417 = vst [vmem:[#allocation13 + $0x60] sm:$0xff] %v5396_v20 }
 0x6d2   :  { %v5397_v32 = vpop.f32.mrf.mxu3 }
 0x6d3   :  { %v5398_v56 = vadd.f32 %v5397_v32, %v5349_v11 }
 0x6d5   :  { %5418 = vst [vmem:[#allocation13 + $0x68] sm:$0xff] %v5398_v56 }
 0x6da   :  { %v5400_v45 = vpop.f32.mrf.mxu3 }
 0x6db   :  { %v5401_v0 = vadd.f32 %v5400_v45, %v5352_v58 }
 0x6dd   :  { %5419 = vst [vmem:[#allocation13 + $0x70] sm:$0xff] %v5401_v0 }
 0x6e2   :  { %v5402_v41 = vpop.f32.mrf.mxu3 }
 0x6e3   :  { %v5403_v37 = vadd.f32 %v5402_v41, %v5354_v62 }
 0x6e5   :  { %5420 = vst [vmem:[#allocation13 + $0x78] sm:$0xff] %v5403_v37 }
 0x6e6   :  { %5433 = dma.vmem_to_hbm [thread:$0]  %s5426_s10, 2048, %s5428_s13, [#allocation4], %s7853_s14, %s7853_s14, %s7854_s15  }
 0x6e7   :  { %7838 = dma.done.wait [#allocation4], 2048  }
 0x6e8   :  { %7839 = vsyncadd [#allocation4], 4294965248 }
 0x6e9   :  { %5438 = vsyncpa [#allocation3], 1 }
 0x6ea   :  { %5439 = vsyncpa [#allocation6], 1 }
 0x6eb   :  { %5440 = vsyncpa [#allocation9], 1 }
 0x6ec   :  { %5441 = vsyncpa [#allocation12], 1 }
 0x6ed   :  { %5442 = vsyncpa [#allocation4], 1 }

</bundles_post_ra>
